<compile_context>
chip_gen: v7x
topology: tpu7x:2x2x1
jax: 0.10.0
libtpu: 0.0.40
codegen_flags: <defaults>
</compile_context>

<pallas_src>
import functools
import math

import jax
import jax.numpy as jnp
from jax.experimental import pallas as pl
from jax.experimental.pallas import tpu as pltpu


_LN_EPS = 1e-5
_LANE_PAD = 128   # lane-dense padding for the (H -> 1) projection output

_CPARAMS = pltpu.CompilerParams(
    dimension_semantics=("parallel",),       # batch grid -> megacore-shardable on v7x
    vmem_limit_bytes=32 * 1024 * 1024,       # explicit: safe on v5e/v6e (128 MiB) and v7x (64 MiB)
)


def _layernorm(y, gamma, beta, eps):
    # f32 statistics over the last dim (matches PyTorch LayerNorm, biased variance)
    mean = jnp.mean(y, axis=-1, keepdims=True)
    yc = y - mean
    var = jnp.mean(yc * yc, axis=-1, keepdims=True)
    return yc * jax.lax.rsqrt(var + eps) * gamma + beta


# ------------------------- fused whole-model kernel --------------------------

def _fused_forward_kernel(x_ref, emb_w_ref, emb_b_ref,
                          in_w_ref, in_b_ref, wo_ref, out_b_ref, ln1_g_ref, ln1_b_ref,
                          l1_w_ref, l1_b_ref, l2_w_ref, l2_b_ref, ln2_g_ref, ln2_b_ref,
                          proj_w_ref, proj_b_ref, o_ref,
                          *, nlayers, nheads, scale, eps):
    bf = jnp.bfloat16
    x = x_ref[0]                                              # (S, F) f32, one batch element

    # embedding Linear (bf16 MXU, f32 accumulate)
    h = jnp.dot(x.astype(bf), emb_w_ref[...],
                preferred_element_type=jnp.float32) + emb_b_ref[...]        # (S, H)
    S, H = h.shape
    hd = H // nheads

    for l in range(nlayers):                                  # static unroll over encoder layers
        # ----------------- self-attention block (post-norm) ------------------
        # one fat fused QKV matmul for all tokens of this batch element
        qkv = jnp.dot(h.astype(bf), in_w_ref[l],
                      preferred_element_type=jnp.float32) + in_b_ref[l]     # (S, 3H)
        q = qkv[:, :H] * scale
        k = qkv[:, H:2 * H]
        v = qkv[:, 2 * H:]

        # residual + out-proj bias seed the accumulator; per-head out-proj is
        # accumulated directly (no concat, no separate (H,H) out-proj matmul).
        acc = h + out_b_ref[l]                                # (S, H) f32
        for hh in range(nheads):                              # static unroll over heads
            qh = q[:, hh * hd:(hh + 1) * hd].astype(bf)
            kh = k[:, hh * hd:(hh + 1) * hd].astype(bf)
            vh = v[:, hh * hd:(hh + 1) * hd].astype(bf)
            # scores = q @ k^T without an explicit transpose op
            s = jax.lax.dot_general(qh, kh, (((1,), (1,)), ((), ())),
                                    preferred_element_type=jnp.float32)     # (S, S)
            s = s - jnp.max(s, axis=-1, keepdims=True)
            p = jnp.exp(s)
            p = p * pl.reciprocal(jnp.sum(p, axis=-1, keepdims=True), approx=True)
            oh = jnp.dot(p.astype(bf), vh, preferred_element_type=jnp.float32)   # (S, hd)
            # fold this head's slice of the output projection into the accumulator
            acc = acc + jnp.dot(oh.astype(bf), wo_ref[l, hh],
                                preferred_element_type=jnp.float32)
        h = _layernorm(acc, ln1_g_ref[l], ln1_b_ref[l], eps)

        # ----------------------------- FFN block -----------------------------
        f = jnp.dot(h.astype(bf), l1_w_ref[l],
                    preferred_element_type=jnp.float32) + l1_b_ref[l]
        f = jnp.maximum(f, 0.0)                               # ReLU
        y = jnp.dot(f.astype(bf), l2_w_ref[l],
                    preferred_element_type=jnp.float32) + l2_b_ref[l] + h   # residual
        h = _layernorm(y, ln2_g_ref[l], ln2_b_ref[l], eps)

    # final projection (H -> 1), lane-dense padded to (S, 128) for unmasked stores
    out = jnp.dot(h.astype(bf), proj_w_ref[...],
                  preferred_element_type=jnp.float32) + proj_b_ref[...]
    o_ref[0] = out.astype(o_ref.dtype)


# ------------------------------ parameters ----------------------------------

def init_params(key, input_size, hidden, nlayers, dim_ff):
    def dense(k, din, dout, scale=0.02):
        return (scale * jax.random.normal(k, (din, dout), jnp.float32),
                jnp.zeros((dout,), jnp.float32))

    keys = jax.random.split(key, 2 + 4 * nlayers)
    params = {"emb": dense(keys[0], input_size, hidden),
              "proj": dense(keys[1], hidden, 1),
              "layers": []}
    for l in range(nlayers):
        k0, k1, k2, k3 = keys[2 + 4 * l: 6 + 4 * l]
        lw = {}
        lw["in_w"], lw["in_b"] = dense(k0, hidden, 3 * hidden)   # fused [q;k;v] projection
        lw["out_w"], lw["out_b"] = dense(k1, hidden, hidden)
        lw["l1_w"], lw["l1_b"] = dense(k2, hidden, dim_ff)
        lw["l2_w"], lw["l2_b"] = dense(k3, dim_ff, hidden)
        lw["ln1_g"] = jnp.ones((hidden,), jnp.float32)
        lw["ln1_b"] = jnp.zeros((hidden,), jnp.float32)
        lw["ln2_g"] = jnp.ones((hidden,), jnp.float32)
        lw["ln2_b"] = jnp.zeros((hidden,), jnp.float32)
        params["layers"].append(lw)
    return params


def pack_params(p, hidden, nheads, lane_pad=_LANE_PAD):
    """Stack per-layer weights along a leading layer dim, cast matmul weights to
    bf16, reshape biases / LN params to (L, 1, d), split the attention output
    projection into per-head (hd, H) row blocks, and pad the d_out=1 projection
    to a lane-dense (H, 128) weight."""
    bf = jnp.bfloat16
    hd = hidden // nheads
    L = len(p["layers"])

    def stack(name):
        return jnp.stack([lw[name] for lw in p["layers"]])

    emb_w, emb_b = p["emb"]
    proj_w, proj_b = p["proj"]
    return {
        "emb_w": emb_w.astype(bf),                                     # (F, H)
        "emb_b": emb_b.reshape(1, -1),                                 # (1, H)
        "in_w": stack("in_w").astype(bf),                              # (L, H, 3H)
        "in_b": stack("in_b").reshape(L, 1, -1),                       # (L, 1, 3H)
        "wo": stack("out_w").reshape(L, nheads, hd, hidden).astype(bf),  # (L, nh, hd, H)
        "out_b": stack("out_b").reshape(L, 1, -1),                     # (L, 1, H)
        "ln1_g": stack("ln1_g").reshape(L, 1, -1),
        "ln1_b": stack("ln1_b").reshape(L, 1, -1),
        "l1_w": stack("l1_w").astype(bf),                              # (L, H, dff)
        "l1_b": stack("l1_b").reshape(L, 1, -1),                       # (L, 1, dff)
        "l2_w": stack("l2_w").astype(bf),                              # (L, dff, H)
        "l2_b": stack("l2_b").reshape(L, 1, -1),
        "ln2_g": stack("ln2_g").reshape(L, 1, -1),
        "ln2_b": stack("ln2_b").reshape(L, 1, -1),
        "proj_w": jnp.zeros((hidden, lane_pad), bf).at[:, :1].set(proj_w.astype(bf)),
        "proj_b": jnp.zeros((1, lane_pad), jnp.float32).at[:, :1].set(proj_b.reshape(1, 1)),
    }


# ------------------------------ forward pass ---------------------------------

def itransformer_forward(dp, x, nheads):
    S, B, F = x.shape
    L, H, _ = dp["in_w"].shape
    dff = dp["l1_w"].shape[2]
    hd = H // nheads
    scale = 1.0 / math.sqrt(hd)

    # single tiny layout op outside the kernel: batch-major so each grid step's
    # BlockSpec selects one batch element's full (S, F) tile
    xb = jnp.transpose(x, (1, 0, 2))                          # (B, S, F)

    full2 = lambda b: (0, 0)
    full3 = lambda b: (0, 0, 0)
    full4 = lambda b: (0, 0, 0, 0)

    out = pl.pallas_call(
        functools.partial(_fused_forward_kernel, nlayers=L, nheads=nheads,
                          scale=scale, eps=_LN_EPS),
        out_shape=jax.ShapeDtypeStruct((B, S, _LANE_PAD), jnp.float32),
        grid=(B,),                                            # one batch element per step (>= 2 steps)
        in_specs=[
            pl.BlockSpec((1, S, F), lambda b: (b, 0, 0)),     # this batch's tokens
            pl.BlockSpec((F, H), full2),                      # embedding
            pl.BlockSpec((1, H), full2),
            pl.BlockSpec((L, H, 3 * H), full3),               # fused QKV weights (stacked)
            pl.BlockSpec((L, 1, 3 * H), full3),
            pl.BlockSpec((L, nheads, hd, H), full4),          # per-head out-proj blocks
            pl.BlockSpec((L, 1, H), full3),                   # out_b
            pl.BlockSpec((L, 1, H), full3),                   # ln1_g
            pl.BlockSpec((L, 1, H), full3),                   # ln1_b
            pl.BlockSpec((L, H, dff), full3),                 # ffn l1
            pl.BlockSpec((L, 1, dff), full3),
            pl.BlockSpec((L, dff, H), full3),                 # ffn l2
            pl.BlockSpec((L, 1, H), full3),
            pl.BlockSpec((L, 1, H), full3),                   # ln2_g
            pl.BlockSpec((L, 1, H), full3),                   # ln2_b
            pl.BlockSpec((H, _LANE_PAD), full2),              # projection (lane-padded)
            pl.BlockSpec((1, _LANE_PAD), full2),
        ],
        out_specs=pl.BlockSpec((1, S, _LANE_PAD), lambda b: (b, 0, 0)),
        compiler_params=_CPARAMS,
    )(xb, dp["emb_w"], dp["emb_b"], dp["in_w"], dp["in_b"], dp["wo"], dp["out_b"],
      dp["ln1_g"], dp["ln1_b"], dp["l1_w"], dp["l1_b"], dp["l2_w"], dp["l2_b"],
      dp["ln2_g"], dp["ln2_b"], dp["proj_w"], dp["proj_b"])

    out = out[:, :, :1]                                       # lane-dense slab -> (B, S, 1)
    return jnp.transpose(out, (1, 0, 2))                      # back to seq-first (S, B, 1)


# ---------------------------------- main -------------------------------------

if __name__ == "__main__":
    num_features = 10        # input_size from the PyTorch module
    hidden_size = 32
    num_heads = 4
    num_layers = 2
    dim_feedforward = 2048   # PyTorch TransformerEncoderLayer default
    S, B = 8, 2              # (seq, batch) — seq-first layout, batch_first=False

    key = jax.random.PRNGKey(0)
    kx, kp = jax.random.split(key)
    x = jax.random.normal(kx, (S, B, num_features), jnp.float32)
    params = init_params(kp, num_features, hidden_size, num_layers, dim_feedforward)
    dev_params = pack_params(params, hidden_size, num_heads)

    fwd = jax.jit(functools.partial(itransformer_forward, nheads=num_heads))
    out = jax.block_until_ready(fwd(dev_params, x))
    assert out.shape == (S, B, 1), out.shape
    print("KERNEL_OK")
</pallas_src>

<mosaic_0001>
module attributes {stable_mosaic.version = 11 : i64} {
  func.func @_fused_forward_kernel(%arg0: i32, %arg1: memref<1x8x10xf32, #tpu.memory_space<vmem>>, %arg2: memref<10x32xbf16, #tpu.memory_space<vmem>>, %arg3: memref<1x32xf32, #tpu.memory_space<vmem>>, %arg4: memref<2x32x96xbf16, #tpu.memory_space<vmem>>, %arg5: memref<2x1x96xf32, #tpu.memory_space<vmem>>, %arg6: memref<2x4x8x32xbf16, #tpu.memory_space<vmem>>, %arg7: memref<2x1x32xf32, #tpu.memory_space<vmem>>, %arg8: memref<2x1x32xf32, #tpu.memory_space<vmem>>, %arg9: memref<2x1x32xf32, #tpu.memory_space<vmem>>, %arg10: memref<2x32x2048xbf16, #tpu.memory_space<vmem>>, %arg11: memref<2x1x2048xf32, #tpu.memory_space<vmem>>, %arg12: memref<2x2048x32xbf16, #tpu.memory_space<vmem>>, %arg13: memref<2x1x32xf32, #tpu.memory_space<vmem>>, %arg14: memref<2x1x32xf32, #tpu.memory_space<vmem>>, %arg15: memref<2x1x32xf32, #tpu.memory_space<vmem>>, %arg16: memref<32x128xbf16, #tpu.memory_space<vmem>>, %arg17: memref<1x128xf32, #tpu.memory_space<vmem>>, %arg18: memref<1x8x128xf32, #tpu.memory_space<vmem>>) attributes {dimension_semantics = [#tpu.dimension_semantics<parallel>], iteration_bounds = array<i64: 2>, scalar_prefetch = 0 : i64, scratch_operands = 0 : i64, tpu.core_type = #tpu.core_type<tc>, window_params = [{transform_indices = @transform_0, window_bounds = array<i64: 1, 8, 10>}, {pipeline_mode = #tpu.pipeline_mode<synchronous>, transform_indices = @transform_1, window_bounds = array<i64: 10, 32>}, {pipeline_mode = #tpu.pipeline_mode<synchronous>, transform_indices = @transform_2, window_bounds = array<i64: 1, 32>}, {pipeline_mode = #tpu.pipeline_mode<synchronous>, transform_indices = @transform_3, window_bounds = array<i64: 2, 32, 96>}, {pipeline_mode = #tpu.pipeline_mode<synchronous>, transform_indices = @transform_4, window_bounds = array<i64: 2, 1, 96>}, {pipeline_mode = #tpu.pipeline_mode<synchronous>, transform_indices = @transform_5, window_bounds = array<i64: 2, 4, 8, 32>}, {pipeline_mode = #tpu.pipeline_mode<synchronous>, transform_indices = @transform_6, window_bounds = array<i64: 2, 1, 32>}, {pipeline_mode = #tpu.pipeline_mode<synchronous>, transform_indices = @transform_7, window_bounds = array<i64: 2, 1, 32>}, {pipeline_mode = #tpu.pipeline_mode<synchronous>, transform_indices = @transform_8, window_bounds = array<i64: 2, 1, 32>}, {pipeline_mode = #tpu.pipeline_mode<synchronous>, transform_indices = @transform_9, window_bounds = array<i64: 2, 32, 2048>}, {pipeline_mode = #tpu.pipeline_mode<synchronous>, transform_indices = @transform_10, window_bounds = array<i64: 2, 1, 2048>}, {pipeline_mode = #tpu.pipeline_mode<synchronous>, transform_indices = @transform_11, window_bounds = array<i64: 2, 2048, 32>}, {pipeline_mode = #tpu.pipeline_mode<synchronous>, transform_indices = @transform_12, window_bounds = array<i64: 2, 1, 32>}, {pipeline_mode = #tpu.pipeline_mode<synchronous>, transform_indices = @transform_13, window_bounds = array<i64: 2, 1, 32>}, {pipeline_mode = #tpu.pipeline_mode<synchronous>, transform_indices = @transform_14, window_bounds = array<i64: 2, 1, 32>}, {pipeline_mode = #tpu.pipeline_mode<synchronous>, transform_indices = @transform_15, window_bounds = array<i64: 32, 128>}, {pipeline_mode = #tpu.pipeline_mode<synchronous>, transform_indices = @transform_16, window_bounds = array<i64: 1, 128>}, {transform_indices = @transform_17, window_bounds = array<i64: 1, 8, 128>}]} {
    %c0 = arith.constant 0 : index
    %c0_0 = arith.constant 0 : index
    %c0_1 = arith.constant 0 : index
    %0 = vector.load %arg1[%c0, %c0_0, %c0_1] : memref<1x8x10xf32, #tpu.memory_space<vmem>>, vector<1x8x10xf32>
    %1 = vector.shape_cast %0 : vector<1x8x10xf32> to vector<8x10xf32>
    %2 = arith.truncf %1 : vector<8x10xf32> to vector<8x10xbf16>
    %c0_2 = arith.constant 0 : index
    %c0_3 = arith.constant 0 : index
    %3 = vector.load %arg2[%c0_2, %c0_3] : memref<10x32xbf16, #tpu.memory_space<vmem>>, vector<10x32xbf16>
    %cst = arith.constant dense<0.000000e+00> : vector<8x32xf32>
    %4 = tpu.matmul %2, %3, %cst {dimension_numbers = #tpu.dot_dimension_numbers<[1], [0], [0], [1], [0, 0, 1, 1], [], []>} : vector<8x10xbf16>, vector<10x32xbf16>, vector<8x32xf32> -> vector<8x32xf32>
    %c0_4 = arith.constant 0 : index
    %c0_5 = arith.constant 0 : index
    %5 = vector.load %arg3[%c0_4, %c0_5] : memref<1x32xf32, #tpu.memory_space<vmem>>, vector<1x32xf32>
    %6 = vector.broadcast %5 : vector<1x32xf32> to vector<8x32xf32>
    %7 = arith.addf %4, %6 : vector<8x32xf32>
    %8 = arith.truncf %7 : vector<8x32xf32> to vector<8x32xbf16>
    %c0_6 = arith.constant 0 : index
    %c0_7 = arith.constant 0 : index
    %c0_8 = arith.constant 0 : index
    %9 = vector.load %arg4[%c0_6, %c0_7, %c0_8] : memref<2x32x96xbf16, #tpu.memory_space<vmem>>, vector<1x32x96xbf16>
    %10 = vector.shape_cast %9 : vector<1x32x96xbf16> to vector<32x96xbf16>
    %cst_9 = arith.constant dense<0.000000e+00> : vector<8x96xf32>
    %11 = tpu.matmul %8, %10, %cst_9 {dimension_numbers = #tpu.dot_dimension_numbers<[1], [0], [0], [1], [0, 0, 1, 1], [], []>} : vector<8x32xbf16>, vector<32x96xbf16>, vector<8x96xf32> -> vector<8x96xf32>
    %c0_10 = arith.constant 0 : index
    %c0_11 = arith.constant 0 : index
    %c0_12 = arith.constant 0 : index
    %12 = vector.load %arg5[%c0_10, %c0_11, %c0_12] : memref<2x1x96xf32, #tpu.memory_space<vmem>>, vector<1x1x96xf32>
    %13 = vector.shape_cast %12 : vector<1x1x96xf32> to vector<1x96xf32>
    %14 = vector.broadcast %13 : vector<1x96xf32> to vector<8x96xf32>
    %15 = arith.addf %11, %14 : vector<8x96xf32>
    %16 = vector.extract_strided_slice %15 {offsets = [0, 0], sizes = [8, 32], strides = [1, 1]} : vector<8x96xf32> to vector<8x32xf32>
    %cst_13 = arith.constant 0.353553385 : f32
    %17 = vector.broadcast %cst_13 : f32 to vector<8x32xf32>
    %18 = arith.mulf %16, %17 : vector<8x32xf32>
    %19 = vector.extract_strided_slice %15 {offsets = [0, 32], sizes = [8, 32], strides = [1, 1]} : vector<8x96xf32> to vector<8x32xf32>
    %20 = vector.extract_strided_slice %15 {offsets = [0, 64], sizes = [8, 32], strides = [1, 1]} : vector<8x96xf32> to vector<8x32xf32>
    %c0_14 = arith.constant 0 : index
    %c0_15 = arith.constant 0 : index
    %c0_16 = arith.constant 0 : index
    %21 = vector.load %arg7[%c0_14, %c0_15, %c0_16] : memref<2x1x32xf32, #tpu.memory_space<vmem>>, vector<1x1x32xf32>
    %22 = vector.shape_cast %21 : vector<1x1x32xf32> to vector<1x32xf32>
    %23 = vector.broadcast %22 : vector<1x32xf32> to vector<8x32xf32>
    %24 = arith.addf %7, %23 : vector<8x32xf32>
    %25 = vector.extract_strided_slice %18 {offsets = [0, 0], sizes = [8, 8], strides = [1, 1]} : vector<8x32xf32> to vector<8x8xf32>
    %26 = arith.truncf %25 : vector<8x8xf32> to vector<8x8xbf16>
    %27 = vector.extract_strided_slice %19 {offsets = [0, 0], sizes = [8, 8], strides = [1, 1]} : vector<8x32xf32> to vector<8x8xf32>
    %28 = arith.truncf %27 : vector<8x8xf32> to vector<8x8xbf16>
    %29 = vector.extract_strided_slice %20 {offsets = [0, 0], sizes = [8, 8], strides = [1, 1]} : vector<8x32xf32> to vector<8x8xf32>
    %30 = arith.truncf %29 : vector<8x8xf32> to vector<8x8xbf16>
    %cst_17 = arith.constant dense<0.000000e+00> : vector<8x8xf32>
    %31 = tpu.matmul %26, %28, %cst_17 {dimension_numbers = #tpu.dot_dimension_numbers<[1], [1], [0], [0], [0, 0, 1, 0], [], []>} : vector<8x8xbf16>, vector<8x8xbf16>, vector<8x8xf32> -> vector<8x8xf32>
    %cst_18 = arith.constant dense<0xFF800000> : vector<8xf32>
    %32 = vector.multi_reduction <maximumf>, %31, %cst_18 [1] : vector<8x8xf32> to vector<8xf32>
    %33 = vector.shape_cast %32 : vector<8xf32> to vector<8x1xf32>
    %34 = vector.broadcast %33 : vector<8x1xf32> to vector<8x8xf32>
    %35 = arith.subf %31, %34 : vector<8x8xf32>
    %36 = math.exp %35 : vector<8x8xf32>
    %cst_19 = arith.constant dense<0.000000e+00> : vector<8xf32>
    %37 = vector.multi_reduction <add>, %36, %cst_19 [1] : vector<8x8xf32> to vector<8xf32>
    %38 = vector.shape_cast %37 : vector<8xf32> to vector<8x1xf32>
    %39 = tpu.reciprocal %38 {approx = true} : vector<8x1xf32> -> vector<8x1xf32>
    %40 = vector.broadcast %39 : vector<8x1xf32> to vector<8x8xf32>
    %41 = arith.mulf %36, %40 : vector<8x8xf32>
    %42 = arith.truncf %41 : vector<8x8xf32> to vector<8x8xbf16>
    %cst_20 = arith.constant dense<0.000000e+00> : vector<8x8xf32>
    %43 = tpu.matmul %42, %30, %cst_20 {dimension_numbers = #tpu.dot_dimension_numbers<[1], [0], [0], [1], [0, 0, 1, 1], [], []>} : vector<8x8xbf16>, vector<8x8xbf16>, vector<8x8xf32> -> vector<8x8xf32>
    %44 = arith.truncf %43 : vector<8x8xf32> to vector<8x8xbf16>
    %c0_21 = arith.constant 0 : index
    %c0_22 = arith.constant 0 : index
    %c0_23 = arith.constant 0 : index
    %c0_24 = arith.constant 0 : index
    %45 = vector.load %arg6[%c0_21, %c0_22, %c0_23, %c0_24] : memref<2x4x8x32xbf16, #tpu.memory_space<vmem>>, vector<1x1x8x32xbf16>
    %46 = vector.shape_cast %45 : vector<1x1x8x32xbf16> to vector<8x32xbf16>
    %cst_25 = arith.constant dense<0.000000e+00> : vector<8x32xf32>
    %47 = tpu.matmul %44, %46, %cst_25 {dimension_numbers = #tpu.dot_dimension_numbers<[1], [0], [0], [1], [0, 0, 1, 1], [], []>} : vector<8x8xbf16>, vector<8x32xbf16>, vector<8x32xf32> -> vector<8x32xf32>
    %48 = arith.addf %24, %47 : vector<8x32xf32>
    %49 = vector.extract_strided_slice %18 {offsets = [0, 8], sizes = [8, 8], strides = [1, 1]} : vector<8x32xf32> to vector<8x8xf32>
    %50 = arith.truncf %49 : vector<8x8xf32> to vector<8x8xbf16>
    %51 = vector.extract_strided_slice %19 {offsets = [0, 8], sizes = [8, 8], strides = [1, 1]} : vector<8x32xf32> to vector<8x8xf32>
    %52 = arith.truncf %51 : vector<8x8xf32> to vector<8x8xbf16>
    %53 = vector.extract_strided_slice %20 {offsets = [0, 8], sizes = [8, 8], strides = [1, 1]} : vector<8x32xf32> to vector<8x8xf32>
    %54 = arith.truncf %53 : vector<8x8xf32> to vector<8x8xbf16>
    %cst_26 = arith.constant dense<0.000000e+00> : vector<8x8xf32>
    %55 = tpu.matmul %50, %52, %cst_26 {dimension_numbers = #tpu.dot_dimension_numbers<[1], [1], [0], [0], [0, 0, 1, 0], [], []>} : vector<8x8xbf16>, vector<8x8xbf16>, vector<8x8xf32> -> vector<8x8xf32>
    %cst_27 = arith.constant dense<0xFF800000> : vector<8xf32>
    %56 = vector.multi_reduction <maximumf>, %55, %cst_27 [1] : vector<8x8xf32> to vector<8xf32>
    %57 = vector.shape_cast %56 : vector<8xf32> to vector<8x1xf32>
    %58 = vector.broadcast %57 : vector<8x1xf32> to vector<8x8xf32>
    %59 = arith.subf %55, %58 : vector<8x8xf32>
    %60 = math.exp %59 : vector<8x8xf32>
    %cst_28 = arith.constant dense<0.000000e+00> : vector<8xf32>
    %61 = vector.multi_reduction <add>, %60, %cst_28 [1] : vector<8x8xf32> to vector<8xf32>
    %62 = vector.shape_cast %61 : vector<8xf32> to vector<8x1xf32>
    %63 = tpu.reciprocal %62 {approx = true} : vector<8x1xf32> -> vector<8x1xf32>
    %64 = vector.broadcast %63 : vector<8x1xf32> to vector<8x8xf32>
    %65 = arith.mulf %60, %64 : vector<8x8xf32>
    %66 = arith.truncf %65 : vector<8x8xf32> to vector<8x8xbf16>
    %cst_29 = arith.constant dense<0.000000e+00> : vector<8x8xf32>
    %67 = tpu.matmul %66, %54, %cst_29 {dimension_numbers = #tpu.dot_dimension_numbers<[1], [0], [0], [1], [0, 0, 1, 1], [], []>} : vector<8x8xbf16>, vector<8x8xbf16>, vector<8x8xf32> -> vector<8x8xf32>
    %68 = arith.truncf %67 : vector<8x8xf32> to vector<8x8xbf16>
    %c0_30 = arith.constant 0 : index
    %c1 = arith.constant 1 : index
    %c0_31 = arith.constant 0 : index
    %c0_32 = arith.constant 0 : index
    %69 = vector.load %arg6[%c0_30, %c1, %c0_31, %c0_32] : memref<2x4x8x32xbf16, #tpu.memory_space<vmem>>, vector<1x1x8x32xbf16>
    %70 = vector.shape_cast %69 : vector<1x1x8x32xbf16> to vector<8x32xbf16>
    %cst_33 = arith.constant dense<0.000000e+00> : vector<8x32xf32>
    %71 = tpu.matmul %68, %70, %cst_33 {dimension_numbers = #tpu.dot_dimension_numbers<[1], [0], [0], [1], [0, 0, 1, 1], [], []>} : vector<8x8xbf16>, vector<8x32xbf16>, vector<8x32xf32> -> vector<8x32xf32>
    %72 = arith.addf %48, %71 : vector<8x32xf32>
    %73 = vector.extract_strided_slice %18 {offsets = [0, 16], sizes = [8, 8], strides = [1, 1]} : vector<8x32xf32> to vector<8x8xf32>
    %74 = arith.truncf %73 : vector<8x8xf32> to vector<8x8xbf16>
    %75 = vector.extract_strided_slice %19 {offsets = [0, 16], sizes = [8, 8], strides = [1, 1]} : vector<8x32xf32> to vector<8x8xf32>
    %76 = arith.truncf %75 : vector<8x8xf32> to vector<8x8xbf16>
    %77 = vector.extract_strided_slice %20 {offsets = [0, 16], sizes = [8, 8], strides = [1, 1]} : vector<8x32xf32> to vector<8x8xf32>
    %78 = arith.truncf %77 : vector<8x8xf32> to vector<8x8xbf16>
    %cst_34 = arith.constant dense<0.000000e+00> : vector<8x8xf32>
    %79 = tpu.matmul %74, %76, %cst_34 {dimension_numbers = #tpu.dot_dimension_numbers<[1], [1], [0], [0], [0, 0, 1, 0], [], []>} : vector<8x8xbf16>, vector<8x8xbf16>, vector<8x8xf32> -> vector<8x8xf32>
    %cst_35 = arith.constant dense<0xFF800000> : vector<8xf32>
    %80 = vector.multi_reduction <maximumf>, %79, %cst_35 [1] : vector<8x8xf32> to vector<8xf32>
    %81 = vector.shape_cast %80 : vector<8xf32> to vector<8x1xf32>
    %82 = vector.broadcast %81 : vector<8x1xf32> to vector<8x8xf32>
    %83 = arith.subf %79, %82 : vector<8x8xf32>
    %84 = math.exp %83 : vector<8x8xf32>
    %cst_36 = arith.constant dense<0.000000e+00> : vector<8xf32>
    %85 = vector.multi_reduction <add>, %84, %cst_36 [1] : vector<8x8xf32> to vector<8xf32>
    %86 = vector.shape_cast %85 : vector<8xf32> to vector<8x1xf32>
    %87 = tpu.reciprocal %86 {approx = true} : vector<8x1xf32> -> vector<8x1xf32>
    %88 = vector.broadcast %87 : vector<8x1xf32> to vector<8x8xf32>
    %89 = arith.mulf %84, %88 : vector<8x8xf32>
    %90 = arith.truncf %89 : vector<8x8xf32> to vector<8x8xbf16>
    %cst_37 = arith.constant dense<0.000000e+00> : vector<8x8xf32>
    %91 = tpu.matmul %90, %78, %cst_37 {dimension_numbers = #tpu.dot_dimension_numbers<[1], [0], [0], [1], [0, 0, 1, 1], [], []>} : vector<8x8xbf16>, vector<8x8xbf16>, vector<8x8xf32> -> vector<8x8xf32>
    %92 = arith.truncf %91 : vector<8x8xf32> to vector<8x8xbf16>
    %c0_38 = arith.constant 0 : index
    %c2 = arith.constant 2 : index
    %c0_39 = arith.constant 0 : index
    %c0_40 = arith.constant 0 : index
    %93 = vector.load %arg6[%c0_38, %c2, %c0_39, %c0_40] : memref<2x4x8x32xbf16, #tpu.memory_space<vmem>>, vector<1x1x8x32xbf16>
    %94 = vector.shape_cast %93 : vector<1x1x8x32xbf16> to vector<8x32xbf16>
    %cst_41 = arith.constant dense<0.000000e+00> : vector<8x32xf32>
    %95 = tpu.matmul %92, %94, %cst_41 {dimension_numbers = #tpu.dot_dimension_numbers<[1], [0], [0], [1], [0, 0, 1, 1], [], []>} : vector<8x8xbf16>, vector<8x32xbf16>, vector<8x32xf32> -> vector<8x32xf32>
    %96 = arith.addf %72, %95 : vector<8x32xf32>
    %97 = vector.extract_strided_slice %18 {offsets = [0, 24], sizes = [8, 8], strides = [1, 1]} : vector<8x32xf32> to vector<8x8xf32>
    %98 = arith.truncf %97 : vector<8x8xf32> to vector<8x8xbf16>
    %99 = vector.extract_strided_slice %19 {offsets = [0, 24], sizes = [8, 8], strides = [1, 1]} : vector<8x32xf32> to vector<8x8xf32>
    %100 = arith.truncf %99 : vector<8x8xf32> to vector<8x8xbf16>
    %101 = vector.extract_strided_slice %20 {offsets = [0, 24], sizes = [8, 8], strides = [1, 1]} : vector<8x32xf32> to vector<8x8xf32>
    %102 = arith.truncf %101 : vector<8x8xf32> to vector<8x8xbf16>
    %cst_42 = arith.constant dense<0.000000e+00> : vector<8x8xf32>
    %103 = tpu.matmul %98, %100, %cst_42 {dimension_numbers = #tpu.dot_dimension_numbers<[1], [1], [0], [0], [0, 0, 1, 0], [], []>} : vector<8x8xbf16>, vector<8x8xbf16>, vector<8x8xf32> -> vector<8x8xf32>
    %cst_43 = arith.constant dense<0xFF800000> : vector<8xf32>
    %104 = vector.multi_reduction <maximumf>, %103, %cst_43 [1] : vector<8x8xf32> to vector<8xf32>
    %105 = vector.shape_cast %104 : vector<8xf32> to vector<8x1xf32>
    %106 = vector.broadcast %105 : vector<8x1xf32> to vector<8x8xf32>
    %107 = arith.subf %103, %106 : vector<8x8xf32>
    %108 = math.exp %107 : vector<8x8xf32>
    %cst_44 = arith.constant dense<0.000000e+00> : vector<8xf32>
    %109 = vector.multi_reduction <add>, %108, %cst_44 [1] : vector<8x8xf32> to vector<8xf32>
    %110 = vector.shape_cast %109 : vector<8xf32> to vector<8x1xf32>
    %111 = tpu.reciprocal %110 {approx = true} : vector<8x1xf32> -> vector<8x1xf32>
    %112 = vector.broadcast %111 : vector<8x1xf32> to vector<8x8xf32>
    %113 = arith.mulf %108, %112 : vector<8x8xf32>
    %114 = arith.truncf %113 : vector<8x8xf32> to vector<8x8xbf16>
    %cst_45 = arith.constant dense<0.000000e+00> : vector<8x8xf32>
    %115 = tpu.matmul %114, %102, %cst_45 {dimension_numbers = #tpu.dot_dimension_numbers<[1], [0], [0], [1], [0, 0, 1, 1], [], []>} : vector<8x8xbf16>, vector<8x8xbf16>, vector<8x8xf32> -> vector<8x8xf32>
    %116 = arith.truncf %115 : vector<8x8xf32> to vector<8x8xbf16>
    %c0_46 = arith.constant 0 : index
    %c3 = arith.constant 3 : index
    %c0_47 = arith.constant 0 : index
    %c0_48 = arith.constant 0 : index
    %117 = vector.load %arg6[%c0_46, %c3, %c0_47, %c0_48] : memref<2x4x8x32xbf16, #tpu.memory_space<vmem>>, vector<1x1x8x32xbf16>
    %118 = vector.shape_cast %117 : vector<1x1x8x32xbf16> to vector<8x32xbf16>
    %cst_49 = arith.constant dense<0.000000e+00> : vector<8x32xf32>
    %119 = tpu.matmul %116, %118, %cst_49 {dimension_numbers = #tpu.dot_dimension_numbers<[1], [0], [0], [1], [0, 0, 1, 1], [], []>} : vector<8x8xbf16>, vector<8x32xbf16>, vector<8x32xf32> -> vector<8x32xf32>
    %120 = arith.addf %96, %119 : vector<8x32xf32>
    %c0_50 = arith.constant 0 : index
    %c0_51 = arith.constant 0 : index
    %c0_52 = arith.constant 0 : index
    %121 = vector.load %arg8[%c0_50, %c0_51, %c0_52] : memref<2x1x32xf32, #tpu.memory_space<vmem>>, vector<1x1x32xf32>
    %122 = vector.shape_cast %121 : vector<1x1x32xf32> to vector<1x32xf32>
    %c0_53 = arith.constant 0 : index
    %c0_54 = arith.constant 0 : index
    %c0_55 = arith.constant 0 : index
    %123 = vector.load %arg9[%c0_53, %c0_54, %c0_55] : memref<2x1x32xf32, #tpu.memory_space<vmem>>, vector<1x1x32xf32>
    %124 = vector.shape_cast %123 : vector<1x1x32xf32> to vector<1x32xf32>
    %cst_56 = arith.constant dense<0.000000e+00> : vector<8xf32>
    %125 = vector.multi_reduction <add>, %120, %cst_56 [1] : vector<8x32xf32> to vector<8xf32>
    %126 = vector.shape_cast %125 : vector<8xf32> to vector<8x1xf32>
    %cst_57 = arith.constant 3.200000e+01 : f32
    %127 = vector.broadcast %cst_57 : f32 to vector<8x1xf32>
    %128 = arith.divf %126, %127 : vector<8x1xf32>
    %129 = vector.broadcast %128 : vector<8x1xf32> to vector<8x32xf32>
    %130 = arith.subf %120, %129 : vector<8x32xf32>
    %131 = arith.mulf %130, %130 : vector<8x32xf32>
    %cst_58 = arith.constant dense<0.000000e+00> : vector<8xf32>
    %132 = vector.multi_reduction <add>, %131, %cst_58 [1] : vector<8x32xf32> to vector<8xf32>
    %133 = vector.shape_cast %132 : vector<8xf32> to vector<8x1xf32>
    %cst_59 = arith.constant 3.200000e+01 : f32
    %134 = vector.broadcast %cst_59 : f32 to vector<8x1xf32>
    %135 = arith.divf %133, %134 : vector<8x1xf32>
    %cst_60 = arith.constant 9.99999974E-6 : f32
    %136 = vector.broadcast %cst_60 : f32 to vector<8x1xf32>
    %137 = arith.addf %135, %136 : vector<8x1xf32>
    %138 = math.rsqrt %137 : vector<8x1xf32>
    %139 = vector.broadcast %138 : vector<8x1xf32> to vector<8x32xf32>
    %140 = arith.mulf %130, %139 : vector<8x32xf32>
    %141 = vector.broadcast %122 : vector<1x32xf32> to vector<8x32xf32>
    %142 = arith.mulf %140, %141 : vector<8x32xf32>
    %143 = vector.broadcast %124 : vector<1x32xf32> to vector<8x32xf32>
    %144 = arith.addf %142, %143 : vector<8x32xf32>
    %145 = arith.truncf %144 : vector<8x32xf32> to vector<8x32xbf16>
    %c0_61 = arith.constant 0 : index
    %c0_62 = arith.constant 0 : index
    %c0_63 = arith.constant 0 : index
    %146 = vector.load %arg10[%c0_61, %c0_62, %c0_63] : memref<2x32x2048xbf16, #tpu.memory_space<vmem>>, vector<1x32x2048xbf16>
    %147 = vector.shape_cast %146 : vector<1x32x2048xbf16> to vector<32x2048xbf16>
    %cst_64 = arith.constant dense<0.000000e+00> : vector<8x2048xf32>
    %148 = tpu.matmul %145, %147, %cst_64 {dimension_numbers = #tpu.dot_dimension_numbers<[1], [0], [0], [1], [0, 0, 1, 1], [], []>} : vector<8x32xbf16>, vector<32x2048xbf16>, vector<8x2048xf32> -> vector<8x2048xf32>
    %c0_65 = arith.constant 0 : index
    %c0_66 = arith.constant 0 : index
    %c0_67 = arith.constant 0 : index
    %149 = vector.load %arg11[%c0_65, %c0_66, %c0_67] : memref<2x1x2048xf32, #tpu.memory_space<vmem>>, vector<1x1x2048xf32>
    %150 = vector.shape_cast %149 : vector<1x1x2048xf32> to vector<1x2048xf32>
    %151 = vector.broadcast %150 : vector<1x2048xf32> to vector<8x2048xf32>
    %152 = arith.addf %148, %151 : vector<8x2048xf32>
    %cst_68 = arith.constant 0.000000e+00 : f32
    %153 = vector.broadcast %cst_68 : f32 to vector<8x2048xf32>
    %154 = arith.maximumf %152, %153 : vector<8x2048xf32>
    %155 = arith.truncf %154 : vector<8x2048xf32> to vector<8x2048xbf16>
    %c0_69 = arith.constant 0 : index
    %c0_70 = arith.constant 0 : index
    %c0_71 = arith.constant 0 : index
    %156 = vector.load %arg12[%c0_69, %c0_70, %c0_71] : memref<2x2048x32xbf16, #tpu.memory_space<vmem>>, vector<1x2048x32xbf16>
    %157 = vector.shape_cast %156 : vector<1x2048x32xbf16> to vector<2048x32xbf16>
    %cst_72 = arith.constant dense<0.000000e+00> : vector<8x32xf32>
    %158 = tpu.matmul %155, %157, %cst_72 {dimension_numbers = #tpu.dot_dimension_numbers<[1], [0], [0], [1], [0, 0, 1, 1], [], []>} : vector<8x2048xbf16>, vector<2048x32xbf16>, vector<8x32xf32> -> vector<8x32xf32>
    %c0_73 = arith.constant 0 : index
    %c0_74 = arith.constant 0 : index
    %c0_75 = arith.constant 0 : index
    %159 = vector.load %arg13[%c0_73, %c0_74, %c0_75] : memref<2x1x32xf32, #tpu.memory_space<vmem>>, vector<1x1x32xf32>
    %160 = vector.shape_cast %159 : vector<1x1x32xf32> to vector<1x32xf32>
    %161 = vector.broadcast %160 : vector<1x32xf32> to vector<8x32xf32>
    %162 = arith.addf %158, %161 : vector<8x32xf32>
    %163 = arith.addf %162, %144 : vector<8x32xf32>
    %c0_76 = arith.constant 0 : index
    %c0_77 = arith.constant 0 : index
    %c0_78 = arith.constant 0 : index
    %164 = vector.load %arg14[%c0_76, %c0_77, %c0_78] : memref<2x1x32xf32, #tpu.memory_space<vmem>>, vector<1x1x32xf32>
    %165 = vector.shape_cast %164 : vector<1x1x32xf32> to vector<1x32xf32>
    %c0_79 = arith.constant 0 : index
    %c0_80 = arith.constant 0 : index
    %c0_81 = arith.constant 0 : index
    %166 = vector.load %arg15[%c0_79, %c0_80, %c0_81] : memref<2x1x32xf32, #tpu.memory_space<vmem>>, vector<1x1x32xf32>
    %167 = vector.shape_cast %166 : vector<1x1x32xf32> to vector<1x32xf32>
    %cst_82 = arith.constant dense<0.000000e+00> : vector<8xf32>
    %168 = vector.multi_reduction <add>, %163, %cst_82 [1] : vector<8x32xf32> to vector<8xf32>
    %169 = vector.shape_cast %168 : vector<8xf32> to vector<8x1xf32>
    %cst_83 = arith.constant 3.200000e+01 : f32
    %170 = vector.broadcast %cst_83 : f32 to vector<8x1xf32>
    %171 = arith.divf %169, %170 : vector<8x1xf32>
    %172 = vector.broadcast %171 : vector<8x1xf32> to vector<8x32xf32>
    %173 = arith.subf %163, %172 : vector<8x32xf32>
    %174 = arith.mulf %173, %173 : vector<8x32xf32>
    %cst_84 = arith.constant dense<0.000000e+00> : vector<8xf32>
    %175 = vector.multi_reduction <add>, %174, %cst_84 [1] : vector<8x32xf32> to vector<8xf32>
    %176 = vector.shape_cast %175 : vector<8xf32> to vector<8x1xf32>
    %cst_85 = arith.constant 3.200000e+01 : f32
    %177 = vector.broadcast %cst_85 : f32 to vector<8x1xf32>
    %178 = arith.divf %176, %177 : vector<8x1xf32>
    %cst_86 = arith.constant 9.99999974E-6 : f32
    %179 = vector.broadcast %cst_86 : f32 to vector<8x1xf32>
    %180 = arith.addf %178, %179 : vector<8x1xf32>
    %181 = math.rsqrt %180 : vector<8x1xf32>
    %182 = vector.broadcast %181 : vector<8x1xf32> to vector<8x32xf32>
    %183 = arith.mulf %173, %182 : vector<8x32xf32>
    %184 = vector.broadcast %165 : vector<1x32xf32> to vector<8x32xf32>
    %185 = arith.mulf %183, %184 : vector<8x32xf32>
    %186 = vector.broadcast %167 : vector<1x32xf32> to vector<8x32xf32>
    %187 = arith.addf %185, %186 : vector<8x32xf32>
    %188 = arith.truncf %187 : vector<8x32xf32> to vector<8x32xbf16>
    %c1_87 = arith.constant 1 : index
    %c0_88 = arith.constant 0 : index
    %c0_89 = arith.constant 0 : index
    %189 = vector.load %arg4[%c1_87, %c0_88, %c0_89] : memref<2x32x96xbf16, #tpu.memory_space<vmem>>, vector<1x32x96xbf16>
    %190 = vector.shape_cast %189 : vector<1x32x96xbf16> to vector<32x96xbf16>
    %cst_90 = arith.constant dense<0.000000e+00> : vector<8x96xf32>
    %191 = tpu.matmul %188, %190, %cst_90 {dimension_numbers = #tpu.dot_dimension_numbers<[1], [0], [0], [1], [0, 0, 1, 1], [], []>} : vector<8x32xbf16>, vector<32x96xbf16>, vector<8x96xf32> -> vector<8x96xf32>
    %c1_91 = arith.constant 1 : index
    %c0_92 = arith.constant 0 : index
    %c0_93 = arith.constant 0 : index
    %192 = vector.load %arg5[%c1_91, %c0_92, %c0_93] : memref<2x1x96xf32, #tpu.memory_space<vmem>>, vector<1x1x96xf32>
    %193 = vector.shape_cast %192 : vector<1x1x96xf32> to vector<1x96xf32>
    %194 = vector.broadcast %193 : vector<1x96xf32> to vector<8x96xf32>
    %195 = arith.addf %191, %194 : vector<8x96xf32>
    %196 = vector.extract_strided_slice %195 {offsets = [0, 0], sizes = [8, 32], strides = [1, 1]} : vector<8x96xf32> to vector<8x32xf32>
    %cst_94 = arith.constant 0.353553385 : f32
    %197 = vector.broadcast %cst_94 : f32 to vector<8x32xf32>
    %198 = arith.mulf %196, %197 : vector<8x32xf32>
    %199 = vector.extract_strided_slice %195 {offsets = [0, 32], sizes = [8, 32], strides = [1, 1]} : vector<8x96xf32> to vector<8x32xf32>
    %200 = vector.extract_strided_slice %195 {offsets = [0, 64], sizes = [8, 32], strides = [1, 1]} : vector<8x96xf32> to vector<8x32xf32>
    %c1_95 = arith.constant 1 : index
    %c0_96 = arith.constant 0 : index
    %c0_97 = arith.constant 0 : index
    %201 = vector.load %arg7[%c1_95, %c0_96, %c0_97] : memref<2x1x32xf32, #tpu.memory_space<vmem>>, vector<1x1x32xf32>
    %202 = vector.shape_cast %201 : vector<1x1x32xf32> to vector<1x32xf32>
    %203 = vector.broadcast %202 : vector<1x32xf32> to vector<8x32xf32>
    %204 = arith.addf %187, %203 : vector<8x32xf32>
    %205 = vector.extract_strided_slice %198 {offsets = [0, 0], sizes = [8, 8], strides = [1, 1]} : vector<8x32xf32> to vector<8x8xf32>
    %206 = arith.truncf %205 : vector<8x8xf32> to vector<8x8xbf16>
    %207 = vector.extract_strided_slice %199 {offsets = [0, 0], sizes = [8, 8], strides = [1, 1]} : vector<8x32xf32> to vector<8x8xf32>
    %208 = arith.truncf %207 : vector<8x8xf32> to vector<8x8xbf16>
    %209 = vector.extract_strided_slice %200 {offsets = [0, 0], sizes = [8, 8], strides = [1, 1]} : vector<8x32xf32> to vector<8x8xf32>
    %210 = arith.truncf %209 : vector<8x8xf32> to vector<8x8xbf16>
    %cst_98 = arith.constant dense<0.000000e+00> : vector<8x8xf32>
    %211 = tpu.matmul %206, %208, %cst_98 {dimension_numbers = #tpu.dot_dimension_numbers<[1], [1], [0], [0], [0, 0, 1, 0], [], []>} : vector<8x8xbf16>, vector<8x8xbf16>, vector<8x8xf32> -> vector<8x8xf32>
    %cst_99 = arith.constant dense<0xFF800000> : vector<8xf32>
    %212 = vector.multi_reduction <maximumf>, %211, %cst_99 [1] : vector<8x8xf32> to vector<8xf32>
    %213 = vector.shape_cast %212 : vector<8xf32> to vector<8x1xf32>
    %214 = vector.broadcast %213 : vector<8x1xf32> to vector<8x8xf32>
    %215 = arith.subf %211, %214 : vector<8x8xf32>
    %216 = math.exp %215 : vector<8x8xf32>
    %cst_100 = arith.constant dense<0.000000e+00> : vector<8xf32>
    %217 = vector.multi_reduction <add>, %216, %cst_100 [1] : vector<8x8xf32> to vector<8xf32>
    %218 = vector.shape_cast %217 : vector<8xf32> to vector<8x1xf32>
    %219 = tpu.reciprocal %218 {approx = true} : vector<8x1xf32> -> vector<8x1xf32>
    %220 = vector.broadcast %219 : vector<8x1xf32> to vector<8x8xf32>
    %221 = arith.mulf %216, %220 : vector<8x8xf32>
    %222 = arith.truncf %221 : vector<8x8xf32> to vector<8x8xbf16>
    %cst_101 = arith.constant dense<0.000000e+00> : vector<8x8xf32>
    %223 = tpu.matmul %222, %210, %cst_101 {dimension_numbers = #tpu.dot_dimension_numbers<[1], [0], [0], [1], [0, 0, 1, 1], [], []>} : vector<8x8xbf16>, vector<8x8xbf16>, vector<8x8xf32> -> vector<8x8xf32>
    %224 = arith.truncf %223 : vector<8x8xf32> to vector<8x8xbf16>
    %c1_102 = arith.constant 1 : index
    %c0_103 = arith.constant 0 : index
    %c0_104 = arith.constant 0 : index
    %c0_105 = arith.constant 0 : index
    %225 = vector.load %arg6[%c1_102, %c0_103, %c0_104, %c0_105] : memref<2x4x8x32xbf16, #tpu.memory_space<vmem>>, vector<1x1x8x32xbf16>
    %226 = vector.shape_cast %225 : vector<1x1x8x32xbf16> to vector<8x32xbf16>
    %cst_106 = arith.constant dense<0.000000e+00> : vector<8x32xf32>
    %227 = tpu.matmul %224, %226, %cst_106 {dimension_numbers = #tpu.dot_dimension_numbers<[1], [0], [0], [1], [0, 0, 1, 1], [], []>} : vector<8x8xbf16>, vector<8x32xbf16>, vector<8x32xf32> -> vector<8x32xf32>
    %228 = arith.addf %204, %227 : vector<8x32xf32>
    %229 = vector.extract_strided_slice %198 {offsets = [0, 8], sizes = [8, 8], strides = [1, 1]} : vector<8x32xf32> to vector<8x8xf32>
    %230 = arith.truncf %229 : vector<8x8xf32> to vector<8x8xbf16>
    %231 = vector.extract_strided_slice %199 {offsets = [0, 8], sizes = [8, 8], strides = [1, 1]} : vector<8x32xf32> to vector<8x8xf32>
    %232 = arith.truncf %231 : vector<8x8xf32> to vector<8x8xbf16>
    %233 = vector.extract_strided_slice %200 {offsets = [0, 8], sizes = [8, 8], strides = [1, 1]} : vector<8x32xf32> to vector<8x8xf32>
    %234 = arith.truncf %233 : vector<8x8xf32> to vector<8x8xbf16>
    %cst_107 = arith.constant dense<0.000000e+00> : vector<8x8xf32>
    %235 = tpu.matmul %230, %232, %cst_107 {dimension_numbers = #tpu.dot_dimension_numbers<[1], [1], [0], [0], [0, 0, 1, 0], [], []>} : vector<8x8xbf16>, vector<8x8xbf16>, vector<8x8xf32> -> vector<8x8xf32>
    %cst_108 = arith.constant dense<0xFF800000> : vector<8xf32>
    %236 = vector.multi_reduction <maximumf>, %235, %cst_108 [1] : vector<8x8xf32> to vector<8xf32>
    %237 = vector.shape_cast %236 : vector<8xf32> to vector<8x1xf32>
    %238 = vector.broadcast %237 : vector<8x1xf32> to vector<8x8xf32>
    %239 = arith.subf %235, %238 : vector<8x8xf32>
    %240 = math.exp %239 : vector<8x8xf32>
    %cst_109 = arith.constant dense<0.000000e+00> : vector<8xf32>
    %241 = vector.multi_reduction <add>, %240, %cst_109 [1] : vector<8x8xf32> to vector<8xf32>
    %242 = vector.shape_cast %241 : vector<8xf32> to vector<8x1xf32>
    %243 = tpu.reciprocal %242 {approx = true} : vector<8x1xf32> -> vector<8x1xf32>
    %244 = vector.broadcast %243 : vector<8x1xf32> to vector<8x8xf32>
    %245 = arith.mulf %240, %244 : vector<8x8xf32>
    %246 = arith.truncf %245 : vector<8x8xf32> to vector<8x8xbf16>
    %cst_110 = arith.constant dense<0.000000e+00> : vector<8x8xf32>
    %247 = tpu.matmul %246, %234, %cst_110 {dimension_numbers = #tpu.dot_dimension_numbers<[1], [0], [0], [1], [0, 0, 1, 1], [], []>} : vector<8x8xbf16>, vector<8x8xbf16>, vector<8x8xf32> -> vector<8x8xf32>
    %248 = arith.truncf %247 : vector<8x8xf32> to vector<8x8xbf16>
    %c1_111 = arith.constant 1 : index
    %c1_112 = arith.constant 1 : index
    %c0_113 = arith.constant 0 : index
    %c0_114 = arith.constant 0 : index
    %249 = vector.load %arg6[%c1_111, %c1_112, %c0_113, %c0_114] : memref<2x4x8x32xbf16, #tpu.memory_space<vmem>>, vector<1x1x8x32xbf16>
    %250 = vector.shape_cast %249 : vector<1x1x8x32xbf16> to vector<8x32xbf16>
    %cst_115 = arith.constant dense<0.000000e+00> : vector<8x32xf32>
    %251 = tpu.matmul %248, %250, %cst_115 {dimension_numbers = #tpu.dot_dimension_numbers<[1], [0], [0], [1], [0, 0, 1, 1], [], []>} : vector<8x8xbf16>, vector<8x32xbf16>, vector<8x32xf32> -> vector<8x32xf32>
    %252 = arith.addf %228, %251 : vector<8x32xf32>
    %253 = vector.extract_strided_slice %198 {offsets = [0, 16], sizes = [8, 8], strides = [1, 1]} : vector<8x32xf32> to vector<8x8xf32>
    %254 = arith.truncf %253 : vector<8x8xf32> to vector<8x8xbf16>
    %255 = vector.extract_strided_slice %199 {offsets = [0, 16], sizes = [8, 8], strides = [1, 1]} : vector<8x32xf32> to vector<8x8xf32>
    %256 = arith.truncf %255 : vector<8x8xf32> to vector<8x8xbf16>
    %257 = vector.extract_strided_slice %200 {offsets = [0, 16], sizes = [8, 8], strides = [1, 1]} : vector<8x32xf32> to vector<8x8xf32>
    %258 = arith.truncf %257 : vector<8x8xf32> to vector<8x8xbf16>
    %cst_116 = arith.constant dense<0.000000e+00> : vector<8x8xf32>
    %259 = tpu.matmul %254, %256, %cst_116 {dimension_numbers = #tpu.dot_dimension_numbers<[1], [1], [0], [0], [0, 0, 1, 0], [], []>} : vector<8x8xbf16>, vector<8x8xbf16>, vector<8x8xf32> -> vector<8x8xf32>
    %cst_117 = arith.constant dense<0xFF800000> : vector<8xf32>
    %260 = vector.multi_reduction <maximumf>, %259, %cst_117 [1] : vector<8x8xf32> to vector<8xf32>
    %261 = vector.shape_cast %260 : vector<8xf32> to vector<8x1xf32>
    %262 = vector.broadcast %261 : vector<8x1xf32> to vector<8x8xf32>
    %263 = arith.subf %259, %262 : vector<8x8xf32>
    %264 = math.exp %263 : vector<8x8xf32>
    %cst_118 = arith.constant dense<0.000000e+00> : vector<8xf32>
    %265 = vector.multi_reduction <add>, %264, %cst_118 [1] : vector<8x8xf32> to vector<8xf32>
    %266 = vector.shape_cast %265 : vector<8xf32> to vector<8x1xf32>
    %267 = tpu.reciprocal %266 {approx = true} : vector<8x1xf32> -> vector<8x1xf32>
    %268 = vector.broadcast %267 : vector<8x1xf32> to vector<8x8xf32>
    %269 = arith.mulf %264, %268 : vector<8x8xf32>
    %270 = arith.truncf %269 : vector<8x8xf32> to vector<8x8xbf16>
    %cst_119 = arith.constant dense<0.000000e+00> : vector<8x8xf32>
    %271 = tpu.matmul %270, %258, %cst_119 {dimension_numbers = #tpu.dot_dimension_numbers<[1], [0], [0], [1], [0, 0, 1, 1], [], []>} : vector<8x8xbf16>, vector<8x8xbf16>, vector<8x8xf32> -> vector<8x8xf32>
    %272 = arith.truncf %271 : vector<8x8xf32> to vector<8x8xbf16>
    %c1_120 = arith.constant 1 : index
    %c2_121 = arith.constant 2 : index
    %c0_122 = arith.constant 0 : index
    %c0_123 = arith.constant 0 : index
    %273 = vector.load %arg6[%c1_120, %c2_121, %c0_122, %c0_123] : memref<2x4x8x32xbf16, #tpu.memory_space<vmem>>, vector<1x1x8x32xbf16>
    %274 = vector.shape_cast %273 : vector<1x1x8x32xbf16> to vector<8x32xbf16>
    %cst_124 = arith.constant dense<0.000000e+00> : vector<8x32xf32>
    %275 = tpu.matmul %272, %274, %cst_124 {dimension_numbers = #tpu.dot_dimension_numbers<[1], [0], [0], [1], [0, 0, 1, 1], [], []>} : vector<8x8xbf16>, vector<8x32xbf16>, vector<8x32xf32> -> vector<8x32xf32>
    %276 = arith.addf %252, %275 : vector<8x32xf32>
    %277 = vector.extract_strided_slice %198 {offsets = [0, 24], sizes = [8, 8], strides = [1, 1]} : vector<8x32xf32> to vector<8x8xf32>
    %278 = arith.truncf %277 : vector<8x8xf32> to vector<8x8xbf16>
    %279 = vector.extract_strided_slice %199 {offsets = [0, 24], sizes = [8, 8], strides = [1, 1]} : vector<8x32xf32> to vector<8x8xf32>
    %280 = arith.truncf %279 : vector<8x8xf32> to vector<8x8xbf16>
    %281 = vector.extract_strided_slice %200 {offsets = [0, 24], sizes = [8, 8], strides = [1, 1]} : vector<8x32xf32> to vector<8x8xf32>
    %282 = arith.truncf %281 : vector<8x8xf32> to vector<8x8xbf16>
    %cst_125 = arith.constant dense<0.000000e+00> : vector<8x8xf32>
    %283 = tpu.matmul %278, %280, %cst_125 {dimension_numbers = #tpu.dot_dimension_numbers<[1], [1], [0], [0], [0, 0, 1, 0], [], []>} : vector<8x8xbf16>, vector<8x8xbf16>, vector<8x8xf32> -> vector<8x8xf32>
    %cst_126 = arith.constant dense<0xFF800000> : vector<8xf32>
    %284 = vector.multi_reduction <maximumf>, %283, %cst_126 [1] : vector<8x8xf32> to vector<8xf32>
    %285 = vector.shape_cast %284 : vector<8xf32> to vector<8x1xf32>
    %286 = vector.broadcast %285 : vector<8x1xf32> to vector<8x8xf32>
    %287 = arith.subf %283, %286 : vector<8x8xf32>
    %288 = math.exp %287 : vector<8x8xf32>
    %cst_127 = arith.constant dense<0.000000e+00> : vector<8xf32>
    %289 = vector.multi_reduction <add>, %288, %cst_127 [1] : vector<8x8xf32> to vector<8xf32>
    %290 = vector.shape_cast %289 : vector<8xf32> to vector<8x1xf32>
    %291 = tpu.reciprocal %290 {approx = true} : vector<8x1xf32> -> vector<8x1xf32>
    %292 = vector.broadcast %291 : vector<8x1xf32> to vector<8x8xf32>
    %293 = arith.mulf %288, %292 : vector<8x8xf32>
    %294 = arith.truncf %293 : vector<8x8xf32> to vector<8x8xbf16>
    %cst_128 = arith.constant dense<0.000000e+00> : vector<8x8xf32>
    %295 = tpu.matmul %294, %282, %cst_128 {dimension_numbers = #tpu.dot_dimension_numbers<[1], [0], [0], [1], [0, 0, 1, 1], [], []>} : vector<8x8xbf16>, vector<8x8xbf16>, vector<8x8xf32> -> vector<8x8xf32>
    %296 = arith.truncf %295 : vector<8x8xf32> to vector<8x8xbf16>
    %c1_129 = arith.constant 1 : index
    %c3_130 = arith.constant 3 : index
    %c0_131 = arith.constant 0 : index
    %c0_132 = arith.constant 0 : index
    %297 = vector.load %arg6[%c1_129, %c3_130, %c0_131, %c0_132] : memref<2x4x8x32xbf16, #tpu.memory_space<vmem>>, vector<1x1x8x32xbf16>
    %298 = vector.shape_cast %297 : vector<1x1x8x32xbf16> to vector<8x32xbf16>
    %cst_133 = arith.constant dense<0.000000e+00> : vector<8x32xf32>
    %299 = tpu.matmul %296, %298, %cst_133 {dimension_numbers = #tpu.dot_dimension_numbers<[1], [0], [0], [1], [0, 0, 1, 1], [], []>} : vector<8x8xbf16>, vector<8x32xbf16>, vector<8x32xf32> -> vector<8x32xf32>
    %300 = arith.addf %276, %299 : vector<8x32xf32>
    %c1_134 = arith.constant 1 : index
    %c0_135 = arith.constant 0 : index
    %c0_136 = arith.constant 0 : index
    %301 = vector.load %arg8[%c1_134, %c0_135, %c0_136] : memref<2x1x32xf32, #tpu.memory_space<vmem>>, vector<1x1x32xf32>
    %302 = vector.shape_cast %301 : vector<1x1x32xf32> to vector<1x32xf32>
    %c1_137 = arith.constant 1 : index
    %c0_138 = arith.constant 0 : index
    %c0_139 = arith.constant 0 : index
    %303 = vector.load %arg9[%c1_137, %c0_138, %c0_139] : memref<2x1x32xf32, #tpu.memory_space<vmem>>, vector<1x1x32xf32>
    %304 = vector.shape_cast %303 : vector<1x1x32xf32> to vector<1x32xf32>
    %cst_140 = arith.constant dense<0.000000e+00> : vector<8xf32>
    %305 = vector.multi_reduction <add>, %300, %cst_140 [1] : vector<8x32xf32> to vector<8xf32>
    %306 = vector.shape_cast %305 : vector<8xf32> to vector<8x1xf32>
    %cst_141 = arith.constant 3.200000e+01 : f32
    %307 = vector.broadcast %cst_141 : f32 to vector<8x1xf32>
    %308 = arith.divf %306, %307 : vector<8x1xf32>
    %309 = vector.broadcast %308 : vector<8x1xf32> to vector<8x32xf32>
    %310 = arith.subf %300, %309 : vector<8x32xf32>
    %311 = arith.mulf %310, %310 : vector<8x32xf32>
    %cst_142 = arith.constant dense<0.000000e+00> : vector<8xf32>
    %312 = vector.multi_reduction <add>, %311, %cst_142 [1] : vector<8x32xf32> to vector<8xf32>
    %313 = vector.shape_cast %312 : vector<8xf32> to vector<8x1xf32>
    %cst_143 = arith.constant 3.200000e+01 : f32
    %314 = vector.broadcast %cst_143 : f32 to vector<8x1xf32>
    %315 = arith.divf %313, %314 : vector<8x1xf32>
    %cst_144 = arith.constant 9.99999974E-6 : f32
    %316 = vector.broadcast %cst_144 : f32 to vector<8x1xf32>
    %317 = arith.addf %315, %316 : vector<8x1xf32>
    %318 = math.rsqrt %317 : vector<8x1xf32>
    %319 = vector.broadcast %318 : vector<8x1xf32> to vector<8x32xf32>
    %320 = arith.mulf %310, %319 : vector<8x32xf32>
    %321 = vector.broadcast %302 : vector<1x32xf32> to vector<8x32xf32>
    %322 = arith.mulf %320, %321 : vector<8x32xf32>
    %323 = vector.broadcast %304 : vector<1x32xf32> to vector<8x32xf32>
    %324 = arith.addf %322, %323 : vector<8x32xf32>
    %325 = arith.truncf %324 : vector<8x32xf32> to vector<8x32xbf16>
    %c1_145 = arith.constant 1 : index
    %c0_146 = arith.constant 0 : index
    %c0_147 = arith.constant 0 : index
    %326 = vector.load %arg10[%c1_145, %c0_146, %c0_147] : memref<2x32x2048xbf16, #tpu.memory_space<vmem>>, vector<1x32x2048xbf16>
    %327 = vector.shape_cast %326 : vector<1x32x2048xbf16> to vector<32x2048xbf16>
    %cst_148 = arith.constant dense<0.000000e+00> : vector<8x2048xf32>
    %328 = tpu.matmul %325, %327, %cst_148 {dimension_numbers = #tpu.dot_dimension_numbers<[1], [0], [0], [1], [0, 0, 1, 1], [], []>} : vector<8x32xbf16>, vector<32x2048xbf16>, vector<8x2048xf32> -> vector<8x2048xf32>
    %c1_149 = arith.constant 1 : index
    %c0_150 = arith.constant 0 : index
    %c0_151 = arith.constant 0 : index
    %329 = vector.load %arg11[%c1_149, %c0_150, %c0_151] : memref<2x1x2048xf32, #tpu.memory_space<vmem>>, vector<1x1x2048xf32>
    %330 = vector.shape_cast %329 : vector<1x1x2048xf32> to vector<1x2048xf32>
    %331 = vector.broadcast %330 : vector<1x2048xf32> to vector<8x2048xf32>
    %332 = arith.addf %328, %331 : vector<8x2048xf32>
    %cst_152 = arith.constant 0.000000e+00 : f32
    %333 = vector.broadcast %cst_152 : f32 to vector<8x2048xf32>
    %334 = arith.maximumf %332, %333 : vector<8x2048xf32>
    %335 = arith.truncf %334 : vector<8x2048xf32> to vector<8x2048xbf16>
    %c1_153 = arith.constant 1 : index
    %c0_154 = arith.constant 0 : index
    %c0_155 = arith.constant 0 : index
    %336 = vector.load %arg12[%c1_153, %c0_154, %c0_155] : memref<2x2048x32xbf16, #tpu.memory_space<vmem>>, vector<1x2048x32xbf16>
    %337 = vector.shape_cast %336 : vector<1x2048x32xbf16> to vector<2048x32xbf16>
    %cst_156 = arith.constant dense<0.000000e+00> : vector<8x32xf32>
    %338 = tpu.matmul %335, %337, %cst_156 {dimension_numbers = #tpu.dot_dimension_numbers<[1], [0], [0], [1], [0, 0, 1, 1], [], []>} : vector<8x2048xbf16>, vector<2048x32xbf16>, vector<8x32xf32> -> vector<8x32xf32>
    %c1_157 = arith.constant 1 : index
    %c0_158 = arith.constant 0 : index
    %c0_159 = arith.constant 0 : index
    %339 = vector.load %arg13[%c1_157, %c0_158, %c0_159] : memref<2x1x32xf32, #tpu.memory_space<vmem>>, vector<1x1x32xf32>
    %340 = vector.shape_cast %339 : vector<1x1x32xf32> to vector<1x32xf32>
    %341 = vector.broadcast %340 : vector<1x32xf32> to vector<8x32xf32>
    %342 = arith.addf %338, %341 : vector<8x32xf32>
    %343 = arith.addf %342, %324 : vector<8x32xf32>
    %c1_160 = arith.constant 1 : index
    %c0_161 = arith.constant 0 : index
    %c0_162 = arith.constant 0 : index
    %344 = vector.load %arg14[%c1_160, %c0_161, %c0_162] : memref<2x1x32xf32, #tpu.memory_space<vmem>>, vector<1x1x32xf32>
    %345 = vector.shape_cast %344 : vector<1x1x32xf32> to vector<1x32xf32>
    %c1_163 = arith.constant 1 : index
    %c0_164 = arith.constant 0 : index
    %c0_165 = arith.constant 0 : index
    %346 = vector.load %arg15[%c1_163, %c0_164, %c0_165] : memref<2x1x32xf32, #tpu.memory_space<vmem>>, vector<1x1x32xf32>
    %347 = vector.shape_cast %346 : vector<1x1x32xf32> to vector<1x32xf32>
    %cst_166 = arith.constant dense<0.000000e+00> : vector<8xf32>
    %348 = vector.multi_reduction <add>, %343, %cst_166 [1] : vector<8x32xf32> to vector<8xf32>
    %349 = vector.shape_cast %348 : vector<8xf32> to vector<8x1xf32>
    %cst_167 = arith.constant 3.200000e+01 : f32
    %350 = vector.broadcast %cst_167 : f32 to vector<8x1xf32>
    %351 = arith.divf %349, %350 : vector<8x1xf32>
    %352 = vector.broadcast %351 : vector<8x1xf32> to vector<8x32xf32>
    %353 = arith.subf %343, %352 : vector<8x32xf32>
    %354 = arith.mulf %353, %353 : vector<8x32xf32>
    %cst_168 = arith.constant dense<0.000000e+00> : vector<8xf32>
    %355 = vector.multi_reduction <add>, %354, %cst_168 [1] : vector<8x32xf32> to vector<8xf32>
    %356 = vector.shape_cast %355 : vector<8xf32> to vector<8x1xf32>
    %cst_169 = arith.constant 3.200000e+01 : f32
    %357 = vector.broadcast %cst_169 : f32 to vector<8x1xf32>
    %358 = arith.divf %356, %357 : vector<8x1xf32>
    %cst_170 = arith.constant 9.99999974E-6 : f32
    %359 = vector.broadcast %cst_170 : f32 to vector<8x1xf32>
    %360 = arith.addf %358, %359 : vector<8x1xf32>
    %361 = math.rsqrt %360 : vector<8x1xf32>
    %362 = vector.broadcast %361 : vector<8x1xf32> to vector<8x32xf32>
    %363 = arith.mulf %353, %362 : vector<8x32xf32>
    %364 = vector.broadcast %345 : vector<1x32xf32> to vector<8x32xf32>
    %365 = arith.mulf %363, %364 : vector<8x32xf32>
    %366 = vector.broadcast %347 : vector<1x32xf32> to vector<8x32xf32>
    %367 = arith.addf %365, %366 : vector<8x32xf32>
    %368 = arith.truncf %367 : vector<8x32xf32> to vector<8x32xbf16>
    %c0_171 = arith.constant 0 : index
    %c0_172 = arith.constant 0 : index
    %369 = vector.load %arg16[%c0_171, %c0_172] : memref<32x128xbf16, #tpu.memory_space<vmem>>, vector<32x128xbf16>
    %cst_173 = arith.constant dense<0.000000e+00> : vector<8x128xf32>
    %370 = tpu.matmul %368, %369, %cst_173 {dimension_numbers = #tpu.dot_dimension_numbers<[1], [0], [0], [1], [0, 0, 1, 1], [], []>} : vector<8x32xbf16>, vector<32x128xbf16>, vector<8x128xf32> -> vector<8x128xf32>
    %c0_174 = arith.constant 0 : index
    %c0_175 = arith.constant 0 : index
    %371 = vector.load %arg17[%c0_174, %c0_175] : memref<1x128xf32, #tpu.memory_space<vmem>>, vector<1x128xf32>
    %372 = vector.broadcast %371 : vector<1x128xf32> to vector<8x128xf32>
    %373 = arith.addf %370, %372 : vector<8x128xf32>
    %c0_176 = arith.constant 0 : index
    %c0_177 = arith.constant 0 : index
    %c0_178 = arith.constant 0 : index
    %374 = vector.load %arg18[%c0_176, %c0_177, %c0_178] : memref<1x8x128xf32, #tpu.memory_space<vmem>>, vector<1x8x128xf32>
    %375 = vector.shape_cast %374 : vector<1x8x128xf32> to vector<8x128xf32>
    %376 = vector.shape_cast %373 : vector<8x128xf32> to vector<1x8x128xf32>
    tpu.vector_store %arg18[%c0_176, %c0_177, %c0_178], %376 {strides = array<i32>} : memref<1x8x128xf32, #tpu.memory_space<vmem>>, vector<1x8x128xf32>,
    return
  }
  func.func @transform_0(%arg0: i32) -> (i32, i32, i32) {
    %c0_i32 = arith.constant 0 : i32
    %c0_i32_0 = arith.constant 0 : i32
    %c0_i32_1 = arith.constant 0 : i32
    return %arg0, %c0_i32, %c0_i32_0 : i32, i32, i32
  }
  func.func @transform_1(%arg0: i32) -> (i32, i32) {
    %c0_i32 = arith.constant 0 : i32
    %c0_i32_0 = arith.constant 0 : i32
    %c0_i32_1 = arith.constant 0 : i32
    return %c0_i32, %c0_i32_0 : i32, i32
  }
  func.func @transform_2(%arg0: i32) -> (i32, i32) {
    %c0_i32 = arith.constant 0 : i32
    %c0_i32_0 = arith.constant 0 : i32
    %c0_i32_1 = arith.constant 0 : i32
    return %c0_i32, %c0_i32_0 : i32, i32
  }
  func.func @transform_3(%arg0: i32) -> (i32, i32, i32) {
    %c0_i32 = arith.constant 0 : i32
    %c0_i32_0 = arith.constant 0 : i32
    %c0_i32_1 = arith.constant 0 : i32
    %c0_i32_2 = arith.constant 0 : i32
    return %c0_i32, %c0_i32_0, %c0_i32_1 : i32, i32, i32
  }
  func.func @transform_4(%arg0: i32) -> (i32, i32, i32) {
    %c0_i32 = arith.constant 0 : i32
    %c0_i32_0 = arith.constant 0 : i32
    %c0_i32_1 = arith.constant 0 : i32
    %c0_i32_2 = arith.constant 0 : i32
    return %c0_i32, %c0_i32_0, %c0_i32_1 : i32, i32, i32
  }
  func.func @transform_5(%arg0: i32) -> (i32, i32, i32, i32) {
    %c0_i32 = arith.constant 0 : i32
    %c0_i32_0 = arith.constant 0 : i32
    %c0_i32_1 = arith.constant 0 : i32
    %c0_i32_2 = arith.constant 0 : i32
    %c0_i32_3 = arith.constant 0 : i32
    return %c0_i32, %c0_i32_0, %c0_i32_1, %c0_i32_2 : i32, i32, i32, i32
  }
  func.func @transform_6(%arg0: i32) -> (i32, i32, i32) {
    %c0_i32 = arith.constant 0 : i32
    %c0_i32_0 = arith.constant 0 : i32
    %c0_i32_1 = arith.constant 0 : i32
    %c0_i32_2 = arith.constant 0 : i32
    return %c0_i32, %c0_i32_0, %c0_i32_1 : i32, i32, i32
  }
  func.func @transform_7(%arg0: i32) -> (i32, i32, i32) {
    %c0_i32 = arith.constant 0 : i32
    %c0_i32_0 = arith.constant 0 : i32
    %c0_i32_1 = arith.constant 0 : i32
    %c0_i32_2 = arith.constant 0 : i32
    return %c0_i32, %c0_i32_0, %c0_i32_1 : i32, i32, i32
  }
  func.func @transform_8(%arg0: i32) -> (i32, i32, i32) {
    %c0_i32 = arith.constant 0 : i32
    %c0_i32_0 = arith.constant 0 : i32
    %c0_i32_1 = arith.constant 0 : i32
    %c0_i32_2 = arith.constant 0 : i32
    return %c0_i32, %c0_i32_0, %c0_i32_1 : i32, i32, i32
  }
  func.func @transform_9(%arg0: i32) -> (i32, i32, i32) {
    %c0_i32 = arith.constant 0 : i32
    %c0_i32_0 = arith.constant 0 : i32
    %c0_i32_1 = arith.constant 0 : i32
    %c0_i32_2 = arith.constant 0 : i32
    return %c0_i32, %c0_i32_0, %c0_i32_1 : i32, i32, i32
  }
  func.func @transform_10(%arg0: i32) -> (i32, i32, i32) {
    %c0_i32 = arith.constant 0 : i32
    %c0_i32_0 = arith.constant 0 : i32
    %c0_i32_1 = arith.constant 0 : i32
    %c0_i32_2 = arith.constant 0 : i32
    return %c0_i32, %c0_i32_0, %c0_i32_1 : i32, i32, i32
  }
  func.func @transform_11(%arg0: i32) -> (i32, i32, i32) {
    %c0_i32 = arith.constant 0 : i32
    %c0_i32_0 = arith.constant 0 : i32
    %c0_i32_1 = arith.constant 0 : i32
    %c0_i32_2 = arith.constant 0 : i32
    return %c0_i32, %c0_i32_0, %c0_i32_1 : i32, i32, i32
  }
  func.func @transform_12(%arg0: i32) -> (i32, i32, i32) {
    %c0_i32 = arith.constant 0 : i32
    %c0_i32_0 = arith.constant 0 : i32
    %c0_i32_1 = arith.constant 0 : i32
    %c0_i32_2 = arith.constant 0 : i32
    return %c0_i32, %c0_i32_0, %c0_i32_1 : i32, i32, i32
  }
  func.func @transform_13(%arg0: i32) -> (i32, i32, i32) {
    %c0_i32 = arith.constant 0 : i32
    %c0_i32_0 = arith.constant 0 : i32
    %c0_i32_1 = arith.constant 0 : i32
    %c0_i32_2 = arith.constant 0 : i32
    return %c0_i32, %c0_i32_0, %c0_i32_1 : i32, i32, i32
  }
  func.func @transform_14(%arg0: i32) -> (i32, i32, i32) {
    %c0_i32 = arith.constant 0 : i32
    %c0_i32_0 = arith.constant 0 : i32
    %c0_i32_1 = arith.constant 0 : i32
    %c0_i32_2 = arith.constant 0 : i32
    return %c0_i32, %c0_i32_0, %c0_i32_1 : i32, i32, i32
  }
  func.func @transform_15(%arg0: i32) -> (i32, i32) {
    %c0_i32 = arith.constant 0 : i32
    %c0_i32_0 = arith.constant 0 : i32
    %c0_i32_1 = arith.constant 0 : i32
    return %c0_i32, %c0_i32_0 : i32, i32
  }
  func.func @transform_16(%arg0: i32) -> (i32, i32) {
    %c0_i32 = arith.constant 0 : i32
    %c0_i32_0 = arith.constant 0 : i32
    %c0_i32_1 = arith.constant 0 : i32
    return %c0_i32, %c0_i32_0 : i32, i32
  }
  func.func @transform_17(%arg0: i32) -> (i32, i32, i32) {
    %c0_i32 = arith.constant 0 : i32
    %c0_i32_0 = arith.constant 0 : i32
    %c0_i32_1 = arith.constant 0 : i32
    return %arg0, %c0_i32, %c0_i32_0 : i32, i32, i32
  }
}

</mosaic_0001>

<bundles_post_ra>
// kernel: itransformer_forward.1
= control target key start
LH: loop header
LB: loop body
LE: loop exit
PB: predicated region body
PF: predicated region fallthrough
CT: control target
= control target key end

     0   :  { %s8032_s24 = smov 0   ;;  %s9561_s0 = inlined_call_operand.vmem [shape: f32[2,8,10], index: 0, kind: input, shape index: {}]   ;;  %s9562_s1 = inlined_call_operand.vmem [shape: bf16[10,32], index: 1, kind: input, shape index: {}]   ;;  %s9563_s2 = inlined_call_operand.vmem [shape: f32[1,32], index: 2, kind: input, shape index: {}]   ;;  %s9564_s3 = inlined_call_operand.vmem [shape: bf16[2,32,96], index: 3, kind: input, shape index: {}]   ;;  %s9565_s4 = inlined_call_operand.vmem [shape: f32[2,1,96], index: 4, kind: input, shape index: {}]   ;;  %s9566_s5 = inlined_call_operand.vmem [shape: bf16[2,4,8,32], index: 5, kind: input, shape index: {}]   ;;  %s9567_s6 = inlined_call_operand.vmem [shape: f32[2,1,32], index: 6, kind: input, shape index: {}]   ;;  %s9568_s7 = inlined_call_operand.vmem [shape: f32[2,1,32], index: 7, kind: input, shape index: {}]   ;;  %s9569_s8 = inlined_call_operand.vmem [shape: f32[2,1,32], index: 8, kind: input, shape index: {}]   ;;  %s9570_s9 = inlined_call_operand.vmem [shape: bf16[2,32,2048], index: 9, kind: input, shape index: {}]   ;;  %s9571_s10 = inlined_call_operand.vmem [shape: f32[2,1,2048], index: 10, kind: input, shape index: {}]   ;;  %s9572_s11 = inlined_call_operand.vmem [shape: bf16[2,2048,32], index: 11, kind: input, shape index: {}]   ;;  %s9573_s12 = inlined_call_operand.vmem [shape: f32[2,1,32], index: 12, kind: input, shape index: {}]   ;;  %s9574_s13 = inlined_call_operand.vmem [shape: f32[2,1,32], index: 13, kind: input, shape index: {}]   ;;  %s9575_s14 = inlined_call_operand.vmem [shape: f32[2,1,32], index: 14, kind: input, shape index: {}]   ;;  %s9576_s15 = inlined_call_operand.vmem [shape: bf16[32,128], index: 15, kind: input, shape index: {}]   ;;  %s9577_s16 = inlined_call_operand.vmem [shape: f32[1,128], index: 16, kind: input, shape index: {}]   ;;  %s9578_s17 = inlined_call_operand.vmem [shape: f32[2,8,128], index: 17, kind: output, shape index: {}]  }
   0x1   :  { %9588 = sst [smem:[#allocation2_spill]] %s9561_s0 }
   0x2   :  { %9589 = sst [smem:[#allocation3_spill]] %s9562_s1 }
   0x3 LB: > { %s6280_s25 = sadd.s32 4294967295, %s7926_s24   ;;  %p6284_p0 = scmp.ge.s32.totalorder %s7926_s24, 1  ;;  %s7926_s24 = sphi %s8032_s24, %s27_s24  }
   0x4   : > { %p486_p1 = scmp.lt.s32.totalorder %s7926_s24, 3 }
   0x6   : > { %p487_p2 = pnand %p6284_p0, %p486_p1 }
   0x7   : > { %vm565_vm0 = vcmask (!%p487_p2), 1044480   ;;  %v7928_v0 = vmov (!%p487_p2), 0.0   ;;  %s9590_s28 = sld [smem:[#allocation3_spill]] (!%p487_p2)  ;;  %p536_p3 = scmp.lt.s32.totalorder (!%p487_p2), %s6280_s25, 1  ;;  %v7618_v2 = vld [vmem:[%s9564_s3] sm:$0xff] (!%p487_p2)   ;;  %vm7929_vm1 = vmmov (!%p487_p2), 0  }
   0x8   : > { %490 = sbr.rel (%p487_p2) target bundleno = 7548 (0x1d7c), region = 88  ;;  %7395 = vmatprep.subr.bf16.mxu0 (!%p487_p2), %v7928_v0  ;;  %7401 = vmatprep.subr.bf16.mxu1 (!%p487_p2), %v7928_v0  ;;  %s9591_s1 = sld [smem:[#allocation2_spill]] (!%p487_p2)  ;;  %vm561_vm2 = vcmask (!%p487_p2), 80896   ;;  %v7619_v6 = vld [vmem:[%s9564_s3 + $0x8] sm:$0xff] (!%p487_p2)   ;;  %v6287_v7 = vld [vmem:[%s9563_s2] ss:$0 sm:$0xff] (!%p487_p2) }
   0x9   : > { %7397 = vmatprep.mubr.msk.bf16.mxu0 (!%p487_p2), %vm7929_vm1, %v7928_v0  ;;  %7405 = vmatprep.mubr.msk.bf16.mxu1 (!%p487_p2), %vm7929_vm1, %v7928_v0  ;;  %vm633_vm3 = vcmask (!%p487_p2), 261120   ;;  %v6290_v14 = vld [vmem:[%s9565_s4] ss:$0 sm:$0xff] (!%p487_p2)  ;;  %s7930_s29 = smov (!%p487_p2), 64   ;;  %s7931_s0 = smov (!%p487_p2), 96   ;;  %vm755_vm4 = vcmask (!%p487_p2), 1043456  }
   0xa   : > { %7402 = vmatpush3.bf16.msra.mxu1 (!%p487_p2), %v7618_v2  ;;  %s7932_s18 = smov (!%p487_p2), 88   ;;  %vm691_vm5 = vcmask (!%p487_p2), 64512   ;;  %s9587_s19 = smov (!%p487_p2), 120   ;;  %v800_v47 = vld [vmem:[%s9566_s5] sm:$0xf] (!%p487_p2) }
   0xb   : > { %7403 = vmatprep.subr.bf16.mxu1 (!%p487_p2), %v7928_v0  ;;  %v805_v48 = vsel (!%p487_p2), %vm755_vm4, %v800_v47, 0  ;;  %s9584_s23 = smov (!%p487_p2), 48   ;;  %s9583_s26 = smov (!%p487_p2), 72  }
   0xc   : > { %s9582_s27 = smov (!%p487_p2), 104   ;;  %s9597_s21 = smov (!%p487_p2), 104  }
   0xd   : > { %v7617_v1 = vld [vmem:[%s9590_s28] sm:$0x1f] (!%p487_p2)   ;;  %s9580_s28 = smov (!%p487_p2), 56   ;;  %s9598_s22 = smov (!%p487_p2), 56  }
   0xe   : > { %v567_v3 = vsel (!%p487_p2), %vm565_vm0, %v7617_v1, 0  ;;  %7404 = vmatpush3.bf16.msra.mxu1 (!%p487_p2), %v7619_v6 }
   0xf   : > { %s9602_s25 = smov (!%p536_p3, %s6280_s25), 1  ;;  %7396 = vmatpush3.bf16.msra.mxu0 %v567_v3  ;;  %7415 = vmatprep.subr.bf16.mxu1 %v7928_v0 }
  0x10   : > { %s9579_s30 = sshll.u32 %s9602_s25, 3  ;;  %7409 = vmatprep.subr.bf16.mxu0 %v7928_v0 }
  0x11   : > { %s539_s20 = scalar_lea.vmem %s9591_s1, %s9579_s30  ;;  %s9586_s1 = smov 80  }
  0x12   : > { %v545_v4 = vld [vmem:[%s539_s20] sm:$0xff]  ;;  %s9585_s20 = smov 112   ;;  %s9581_s30 = smov 40  }
  0x13   : > { %v546_v5 = vpack.c.bf16 %v545_v4, %v545_v4 }
  0x15   : > { %7398 = vmatmul.mubr.msk.bf16.vlgmr.msra.gmra.mrb[0].mxu0 %vm561_vm2, %v546_v5 }
  0x16   : > { %7411 = vmatprep.mubr.msk.bf16.mxu0 %vm7929_vm1, %v7928_v0 }
  0xe8   : > { %v603_v8 = vpop.f32.mrb[0].mxu0 }
  0xe9   : > { %v8071_v9 = vadd.f32 %v6287_v7, %v603_v8  ;;  %v7399_v10 = vpop.f32.mrb[1].mxu0 }
  0xea   : > { %v606_v11 = vpop.f32.mrb[2].mxu0 }
  0xeb   : > { %v609_v12 = vpack.c.bf16 %v8071_v9, %v8071_v9  ;;  %v7400_v13 = vpop.f32.mrb[3].mxu0 }
  0xed   : > { %7406 = vmatmul.mubr.msk.bf16.vlgmr.msra.gmra.mrb[0].mxu1 %vm633_vm3, %v609_v12 }
  0xee   : > { %7417 = vmatprep.mubr.msk.bf16.mxu1 %vm7929_vm1, %v7928_v0 }
 0x1c0   : > { %v671_v15 = vpop.f32.mrb[0].mxu1 }
 0x1c1   : > { %v672_v16 = vadd.f32 %v6290_v14, %v671_v15  ;;  %v7407_v17 = vpop.f32.mrb[1].mxu1 }
 0x1c2   : > { %v674_v18 = vpop.f32.mrb[2].mxu1 }
 0x1c3   : > { %v8081_v19 = vpack.c.bf16 %v672_v16, %v672_v16  ;;  %v7408_v20 = vpop.f32.mrb[3].mxu1  ;;  %v677_v25 = vmul.f32 0.35355338, %v672_v16 }
 0x1c5   : > { %750 = vrot.lane.b32.xlu1 %v8081_v19, %s7930_s29  ;;  %689 = vrot.lane.b32.xlu0 %v8081_v19, %s7931_s0  ;;  %v8093_v26 = vpack.c.bf16 %v677_v25, %v677_v25 }
 0x1c9   : > { %851 = vrot.lane.b32.xlu1 %v8081_v19, %s7932_s18 }
 0x237   : > { %v751_v21 = vpop.permute.xlu1 %750  ;;  %v690_v22 = vpop.permute.xlu0 %689 }
 0x238   : > { %v757_v23 = vsel %vm755_vm4, %v751_v21, 0  ;;  %v696_v24 = vsel %vm691_vm5, %v690_v22, 0 }
 0x239   : > { %7410 = vmatpush3.bf16.xpose.msra.mxu0 %v696_v24  ;;  %7416 = vmatpush3.bf16.msra.mxu1 %v757_v23 }
 0x23a   : > { %7427 = vmatprep.subr.bf16.mxu1 %v7928_v0  ;;  %7421 = vmatprep.subr.bf16.mxu0 %v7928_v0 }
 0x23b   : > { %v852_v37 = vpop.permute.xlu1 %851 }
 0x23c   : > { %v857_v43 = vsel %vm691_vm5, %v852_v37, 0 }
 0x240   : > { %7412 = vmatmul.mubr.msk.bf16.vlgmr.msra.gmra.mrb[4].mxu0 %vm691_vm5, %v8093_v26 }
 0x241   : > { %7423 = vmatprep.mubr.msk.bf16.mxu0 %vm7929_vm1, %v7928_v0  ;;  %7422 = vmatpush3.bf16.msra.mxu0 %v805_v48 }
 0x242   : > { %7433 = vmatprep.subr.bf16.mxu0 %v7928_v0 }
 0x313   : > { %v732_v27 = vpop.f32.mrb[4].mxu0 }
 0x314   : > { %v7413_v28 = vpop.f32.mrb[5].mxu0  ;;  %v738_v29 = vsel %vm691_vm5, %v732_v27, -inf }
 0x315   : > { %739 = vmax.xlane.f32.xlu0 %v738_v29  ;;  %v735_v30 = vpop.f32.mrb[6].mxu0  ;;  %v6300_v28 = vld [vmem:[%s9566_s5 + $0x4] sm:$0xf] }
 0x316   : > { %v7414_v31 = vpop.f32.mrb[7].mxu0  ;;  %v966_v29 = vsel %vm755_vm4, %v6300_v28, 0 }
 0x3a2   : > { %v740_v32 = vpop.xlane.xlu0 %739 }
 0x3a3   : > { %v741_v33 = vsub.f32 %v732_v27, %v740_v32 }
 0x3a5   : > { %v742_v34 = vmul.f32 1.442695, %v741_v33 }
 0x3a7   : > { %7880 = vpow2.f32 %v742_v34 }
 0x3b1   : > { %v7881_v35 = vpop.eup %7880 }
 0x3b2   : > { %v744_v36 = vsel %vm691_vm5, %v7881_v35, 0.0 }
 0x3b3   : > { %745 = vadd.xlane.f32.xlu1 %v744_v36 }
 0x3c4   : > { %849 = vrot.lane.b32.xlu1 %v8093_v26, %s9587_s19  ;;  %s9593_s19 = smov 80  }
 0x3c8   : > { %1011 = vrot.lane.b32.xlu1 %v8081_v19, %s9586_s1  ;;  %s9594_s1 = smov 112  }
 0x3cc   : > { %1009 = vrot.lane.b32.xlu1 %v8093_v26, %s9585_s20  ;;  %s9595_s20 = smov 48  }
 0x440   : > { %v746_v38 = vpop.xlane.xlu1 %745 }
 0x441   : > { %7882 = vrcp.f32 %v746_v38 }
 0x444   : > { %v850_v42 = vpop.permute.xlu1 %849 }
 0x448   : > { %v1012_v44 = vpop.permute.xlu1 %1011 }
 0x449   : > { %v1017_v45 = vsel %vm691_vm5, %v1012_v44, 0 }
 0x44b   : > { %v7883_v39 = vpop.eup %7882 }
 0x44c   : > { %v748_v40 = vmul.f32 %v7883_v39, %v7881_v35  ;;  %v1010_v46 = vpop.permute.xlu1 %1009  ;;  %v6304_v39 = vld [vmem:[%s9566_s5 + $0x8] sm:$0xf] }
 0x44e   : > { %v749_v41 = vpack.c.bf16 %v748_v40, %v748_v40 }
 0x450   : > { %7418 = vmatmul.mubr.msk.bf16.vlgmr.msra.gmra.mrb[4].mxu1 %vm691_vm5, %v749_v41 }
 0x451   : > { %7428 = vmatpush3.bf16.xpose.msra.mxu1 %v857_v43  ;;  %7429 = vmatprep.mubr.msk.bf16.mxu1 %vm7929_vm1, %v7928_v0  ;;  %v1126_v43 = vsel %vm755_vm4, %v6304_v39, 0 }
 0x452   : > { %7445 = vmatprep.subr.bf16.mxu1 %v7928_v0 }
 0x458   : > { %7430 = vmatmul.mubr.msk.bf16.vlgmr.msra.gmra.mrb[8].mxu1 %vm691_vm5, %v850_v42 }
 0x459   : > { %7446 = vmatpush3.bf16.xpose.msra.mxu1 %v1017_v45  ;;  %7447 = vmatprep.mubr.msk.bf16.mxu1 %vm7929_vm1, %v7928_v0 }
 0x45a   : > { %7451 = vmatprep.subr.bf16.mxu1 %v7928_v0 }
 0x460   : > { %7448 = vmatmul.mubr.msk.bf16.vlgmr.msra.gmra.mrb[12].mxu1 %vm691_vm5, %v1010_v46 }
 0x461   : > { %7453 = vmatprep.mubr.msk.bf16.mxu1 %vm7929_vm1, %v7928_v0 }
 0x523   : > { %v793_v49 = vpop.f32.mrb[4].mxu1 }
 0x524   : > { %v799_v50 = vpack.c.bf16 %v793_v49, %v793_v49  ;;  %v7419_v51 = vpop.f32.mrb[5].mxu1 }
 0x525   : > { %v796_v52 = vpop.f32.mrb[6].mxu1 }
 0x526   : > { %v7420_v53 = vpop.f32.mrb[7].mxu1  ;;  %7424 = vmatmul.mubr.msk.bf16.vlgmr.msra.gmra.mrb[8].mxu0 %vm691_vm5, %v799_v50 }
 0x527   : > { %7435 = vmatprep.mubr.msk.bf16.mxu0 %vm7929_vm1, %v7928_v0 }
 0x52b   : > { %v893_v54 = vpop.f32.mrb[8].mxu1 }
 0x52c   : > { %v7431_v55 = vpop.f32.mrb[9].mxu1  ;;  %v899_v63 = vsel %vm691_vm5, %v893_v54, -inf }
 0x52d   : > { %v896_v56 = vpop.f32.mrb[10].mxu1 }
 0x52e   : > { %v7432_v57 = vpop.f32.mrb[11].mxu1  ;;  %v6308_v56 = vld [vmem:[%s9566_s5 + $0xc] sm:$0xf] }
 0x533   : > { %v1053_v58 = vpop.f32.mrb[12].mxu1 }
 0x534   : > { %v7449_v59 = vpop.f32.mrb[13].mxu1  ;;  %v1059_v60 = vsel %vm691_vm5, %v1053_v58, -inf }
 0x535   : > { %1060 = vmax.xlane.f32.xlu0 %v1059_v60  ;;  %v1056_v61 = vpop.f32.mrb[14].mxu1  ;;  %v1286_v59 = vsel %vm755_vm4, %v6308_v56, 0  ;;  %v1363_v56 = vld [vmem:[%s9570_s9 + $0x18] sm:$0xff] }
 0x536   : > { %v7450_v62 = vpop.f32.mrb[15].mxu1 }
 0x54b   : > { %1071 = vrot.lane.b32.xlu0 %v8081_v19, %s9584_s23  ;;  %s9596_s23 = smov 72  }
 0x54f   : > { %1171 = vrot.lane.b32.xlu0 %v8081_v19, %s9583_s26 }
 0x553   : > { %1169 = vrot.lane.b32.xlu0 %v8093_v26, %s9582_s27 }
 0x572   : > { %900 = vmax.xlane.f32.xlu0 %v899_v63 }
 0x5c2   : > { %v1061_v1 = vpop.xlane.xlu0 %1060 }
 0x5c3   : > { %v1062_v2 = vsub.f32 %v1053_v58, %v1061_v1  ;;  %v6294_v1 = vld [vmem:[%s9567_s6] ss:$0 sm:$0xff] }
 0x5c5   : > { %v1063_v3 = vmul.f32 1.442695, %v1062_v2  ;;  %v685_v2 = vadd.f32 %v6294_v1, %v8071_v9  ;;  %v1368_v9 = vld [vmem:[%s9570_s9 + $0x40] sm:$0xff]  ;;  %v1387_v1 = vld [vmem:[%s9570_s9 + $0xd8] sm:$0xff] }
 0x5c6   : > { %v1072_v4 = vpop.permute.xlu0 %1071 }
 0x5c7   : > { %7884 = vpow2.f32 %v1063_v3  ;;  %v1077_v5 = vsel %vm755_vm4, %v1072_v4, 0 }
 0x5c8   : > { %7452 = vmatpush3.bf16.msra.mxu1 %v1077_v5 }
 0x5c9   : > { %7463 = vmatprep.subr.bf16.mxu1 %v7928_v0 }
 0x5ca   : > { %v1172_v8 = vpop.permute.xlu0 %1171 }
 0x5cb   : > { %v1177_v21 = vsel %vm691_vm5, %v1172_v8, 0 }
 0x5ce   : > { %v1170_v10 = vpop.permute.xlu0 %1169 }
 0x5d1   : > { %v7885_v6 = vpop.eup %7884 }
 0x5d2   : > { %v1065_v7 = vsel %vm691_vm5, %v7885_v6, 0.0 }
 0x5d3   : > { %1066 = vadd.xlane.f32.xlu1 %v1065_v7 }
 0x5ff   : > { %v901_v11 = vpop.xlane.xlu0 %900 }
 0x600   : > { %v902_v12 = vsub.f32 %v893_v54, %v901_v11 }
 0x602   : > { %v903_v13 = vmul.f32 1.442695, %v902_v12 }
 0x604   : > { %7886 = vpow2.f32 %v903_v13 }
 0x60e   : > { %v7887_v14 = vpop.eup %7886 }
 0x60f   : > { %v905_v15 = vsel %vm691_vm5, %v7887_v14, 0.0 }
 0x610   : > { %906 = vadd.xlane.f32.xlu1 %v905_v15  ;;  %v1360_v15 = vld [vmem:[%s9570_s9] sm:$0xff] }
 0x621   : > { %911 = vrot.lane.b32.xlu1 %v8081_v19, %s9580_s28 }
 0x660   : > { %v1067_v16 = vpop.xlane.xlu1 %1066 }
 0x661   : > { %7888 = vrcp.f32 %v1067_v16  ;;  %v1362_v16 = vld [vmem:[%s9570_s9 + $0x10] sm:$0xff] }
 0x66b   : > { %v7889_v17 = vpop.eup %7888 }
 0x66c   : > { %v1069_v18 = vmul.f32 %v7889_v17, %v7885_v6  ;;  %v6313_v17 = vcombine.high %v1360_v15, %v1368_v9 }
 0x66e   : > { %v1070_v20 = vpack.c.bf16 %v1069_v18, %v1069_v18  ;;  %v1370_v18 = vld [vmem:[%s9570_s9 + $0x50] sm:$0xff] }
 0x670   : > { %7454 = vmatmul.mubr.msk.bf16.vlgmr.msra.gmra.mrb[16].mxu1 %vm691_vm5, %v1070_v20  ;;  %v6312_v20 = vcombine.low %v1360_v15, %v1368_v9  ;;  %v1381_v15 = vld [vmem:[%s9570_s9 + $0xa8] sm:$0xff] }
 0x671   : > { %7464 = vmatpush3.bf16.xpose.msra.mxu1 %v1177_v21  ;;  %7465 = vmatprep.mubr.msk.bf16.mxu1 %vm7929_vm1, %v7928_v0  ;;  %v6316_v21 = vcombine.low %v1362_v16, %v1370_v18  ;;  %v1389_v9 = vld [vmem:[%s9570_s9 + $0xe8] sm:$0xff] }
 0x672   : > { %1639 = vmatprep.subr.bf16.mxu1 %v6313_v17  ;;  %v6339_v17 = vcombine.high %v1381_v15, %v1389_v9 }
 0x678   : > { %7466 = vmatmul.mubr.msk.bf16.vlgmr.msra.gmra.mrb[20].mxu1 %vm691_vm5, %v1170_v10 }
 0x679   : > { %1640 = vmatpush1.bf16.msra.mxu1 %v6312_v20  ;;  %v1367_v20 = vld [vmem:[%s9570_s9 + $0x38] sm:$0xff] }
 0x69d   : > { %v907_v22 = vpop.xlane.xlu1 %906 }
 0x69e   : > { %7890 = vrcp.f32 %v907_v22  ;;  %v6317_v22 = vcombine.high %v1362_v16, %v1370_v18  ;;  %v7621_v18 = vld [vmem:[%s9572_s11] sm:$0xff]  }
 0x6a1   : > { %v912_v23 = vpop.permute.xlu1 %911 }
 0x6a2   : > { %v917_v24 = vsel %vm755_vm4, %v912_v23, 0  ;;  %v1376_v23 = vld [vmem:[%s9570_s9 + $0x80] sm:$0xff] }
 0x6a3   : > { %7434 = vmatpush3.bf16.msra.mxu0 %v917_v24  ;;  %v1384_v24 = vld [vmem:[%s9570_s9 + $0xc0] sm:$0xff] }
 0x6a4   : > { %7439 = vmatprep.subr.bf16.mxu0 %v7928_v0  ;;  %v6328_v28 = vcombine.low %v1376_v23, %v1384_v24 }
 0x6a8   : > { %v7891_v25 = vpop.eup %7890 }
 0x6a9   : > { %v909_v26 = vmul.f32 %v7891_v25, %v7887_v14  ;;  %v1378_v25 = vld [vmem:[%s9570_s9 + $0x90] sm:$0xff] }
 0x6ab   : > { %v910_v27 = vpack.c.bf16 %v909_v26, %v909_v26  ;;  %v6329_v26 = vcombine.high %v1376_v23, %v1384_v24  ;;  %v6338_v23 = vcombine.low %v1381_v15, %v1389_v9 }
 0x6ad   : > { %7436 = vmatmul.mubr.msk.bf16.vlgmr.msra.gmra.mrb[12].mxu0 %vm691_vm5, %v910_v27  ;;  %v1386_v27 = vld [vmem:[%s9570_s9 + $0xd0] sm:$0xff]  ;;  %1641 = vmatprep.subr.bf16.mxu1 %v6329_v26  ;;  %v1383_v26 = vld [vmem:[%s9570_s9 + $0xb8] sm:$0xff] }
 0x6ae   : > { %7441 = vmatprep.mubr.msk.bf16.mxu0 %vm7929_vm1, %v7928_v0  ;;  %7440 = vmatpush3.bf16.msra.mxu0 %v966_v29  ;;  %v6332_v29 = vcombine.low %v1378_v25, %v1386_v27 }
 0x6af   : > { %7457 = vmatprep.subr.bf16.mxu0 %v7928_v0  ;;  %1642 = vmatpush1.bf16.msra.mxu1 %v6328_v28  ;;  %v7624_v28 = vld [vmem:[%s9572_s11 + $0x50] sm:$0xff]  }
 0x743   : > { %v1113_v30 = vpop.f32.mrb[16].mxu1 }
 0x744   : > { %v7455_v31 = vpop.f32.mrb[17].mxu1  ;;  %v1119_v46 = vpack.c.bf16 %v1113_v30, %v1113_v30  ;;  %v6333_v30 = vcombine.high %v1378_v25, %v1386_v27  ;;  %v7623_v25 = vld [vmem:[%s9572_s11 + $0x8] sm:$0xff]   ;;  %v1391_v27 = vld [vmem:[%s9570_s9 + $0xf8] sm:$0xff] }
 0x745   : > { %v1116_v32 = vpop.f32.mrb[18].mxu1  ;;  %v1361_v31 = vld [vmem:[%s9570_s9 + $0x8] sm:$0xff] }
 0x746   : > { %v7456_v33 = vpop.f32.mrb[19].mxu1  ;;  %v1369_v32 = vld [vmem:[%s9570_s9 + $0x48] sm:$0xff] }
 0x747   : > { %v1364_v33 = vld [vmem:[%s9570_s9 + $0x20] sm:$0xff] }
 0x74b   : > { %v1213_v34 = vpop.f32.mrb[20].mxu1 }
 0x74c   : > { %v7467_v35 = vpop.f32.mrb[21].mxu1  ;;  %v1219_v36 = vsel %vm691_vm5, %v1213_v34, -inf }
 0x74d   : > { %1220 = vmax.xlane.f32.xlu1 %v1219_v36  ;;  %v1216_v37 = vpop.f32.mrb[22].mxu1  ;;  %v6315_v35 = vcombine.high %v1361_v31, %v1369_v32  ;;  %v1372_v36 = vld [vmem:[%s9570_s9 + $0x60] sm:$0xff] }
 0x74e   : > { %v7468_v38 = vpop.f32.mrb[23].mxu1  ;;  %v6314_v37 = vcombine.low %v1361_v31, %v1369_v32  ;;  %v6321_v39 = vcombine.high %v1364_v33, %v1372_v36  ;;  %v7626_v31 = vld [vmem:[%s9572_s11 + $0x10] sm:$0xff]   ;;  %v7628_v32 = vld [vmem:[%s9572_s11 + $0x58] sm:$0xff]  }
 0x74f   : > { %v6320_v38 = vcombine.low %v1364_v33, %v1372_v36  ;;  %1680 = vmatprep.subr.bf16.mxu1 %v6315_v35  ;;  %v6342_v33 = vcombine.low %v1383_v26, %v1391_v27  ;;  %v7625_v35 = vld [vmem:[%s9572_s11 + $0xc0] sm:$0xff]   ;;  %v7630_v36 = vld [vmem:[%s9572_s11 + $0x18] sm:$0xff]  }
 0x780   : > { %v953_v40 = vpop.f32.mrb[12].mxu0 }
 0x781   : > { %v959_v41 = vpack.c.bf16 %v953_v40, %v953_v40  ;;  %v7437_v42 = vpop.f32.mrb[13].mxu0 }
 0x782   : > { %v956_v44 = vpop.f32.mrb[14].mxu0 }
 0x783   : > { %v7438_v45 = vpop.f32.mrb[15].mxu0  ;;  %7442 = vmatmul.mubr.msk.bf16.vlgmr.msra.gmra.mrb[8].mxu0 %vm691_vm5, %v959_v41  ;;  %v6310_v44 = vld [vmem:[%s9568_s7] ss:$0 sm:$0xff] }
 0x784   : > { %7458 = vmatpush3.bf16.msra.mxu0 %v1126_v43  ;;  %7459 = vmatprep.mubr.msk.bf16.mxu0 %vm7929_vm1, %v7928_v0 }
 0x785   : > { %7469 = vmatprep.subr.bf16.mxu0 %v7928_v0 }
 0x78f   : > { %7460 = vmatmul.mubr.msk.bf16.vlgmr.msra.gmra.mrb[8].mxu0 %vm691_vm5, %v1119_v46  ;;  %v6311_v46 = vld [vmem:[%s9569_s8] ss:$0 sm:$0xff] }
 0x790   : > { %7471 = vmatprep.mubr.msk.bf16.mxu0 %vm7929_vm1, %v7928_v0 }
 0x7da   : > { %v1221_v47 = vpop.xlane.xlu1 %1220 }
 0x7db   : > { %v1222_v48 = vsub.f32 %v1213_v34, %v1221_v47  ;;  %v7941_v34 = vmov 0  }
 0x7dc   : > { %1671 = vmatprep.mubr.bf16.mxu1 %v7941_v34 }
 0x7dd   : > { %v1223_v49 = vmul.f32 1.442695, %v1222_v48  ;;  %v1377_v48 = vld [vmem:[%s9570_s9 + $0x88] sm:$0xff] }
 0x7df   : > { %7892 = vpow2.f32 %v1223_v49  ;;  %v1385_v49 = vld [vmem:[%s9570_s9 + $0xc8] sm:$0xff] }
 0x7e9   : > { %v7893_v50 = vpop.eup %7892 }
 0x7ea   : > { %v1225_v51 = vsel %vm691_vm5, %v7893_v50, 0.0 }
 0x7eb   : > { %1226 = vadd.xlane.f32.xlu0 %v1225_v51  ;;  %v1388_v51 = vld [vmem:[%s9570_s9 + $0xe0] sm:$0xff] }
 0x801   : > { %1231 = vrot.lane.b32.xlu0 %v8081_v19, %s9581_s30 }
 0x878   : > { %v1227_v52 = vpop.xlane.xlu0 %1226 }
 0x879   : > { %7894 = vrcp.f32 %v1227_v52 }
 0x87c   : > { %v1232_v53 = vpop.permute.xlu0 %1231 }
 0x87d   : > { %v1237_v54 = vsel %vm755_vm4, %v1232_v53, 0 }
 0x87e   : > { %7470 = vmatpush3.bf16.msra.mxu0 %v1237_v54  ;;  %v6331_v54 = vcombine.high %v1377_v48, %v1385_v49 }
 0x87f   : > { %7475 = vmatprep.subr.bf16.mxu0 %v7928_v0 }
 0x883   : > { %v7895_v55 = vpop.eup %7894 }
 0x884   : > { %v1229_v57 = vmul.f32 %v7895_v55, %v7893_v50  ;;  %v1380_v50 = vld [vmem:[%s9570_s9 + $0xa0] sm:$0xff] }
 0x885   : > { %v6337_v55 = vcombine.high %v1380_v50, %v1388_v51 }
 0x886   : > { %v1230_v58 = vpack.c.bf16 %v1229_v57, %v1229_v57  ;;  %v1371_v57 = vld [vmem:[%s9570_s9 + $0x58] sm:$0xff] }
 0x888   : > { %7472 = vmatmul.mubr.msk.bf16.vlgmr.msra.gmra.mrb[16].mxu0 %vm691_vm5, %v1230_v58  ;;  %v1366_v58 = vld [vmem:[%s9570_s9 + $0x30] sm:$0xff] }
 0x889   : > { %7476 = vmatpush3.bf16.msra.mxu0 %v1286_v59  ;;  %7477 = vmatprep.mubr.msk.bf16.mxu0 %vm7929_vm1, %v7928_v0  ;;  %v1374_v59 = vld [vmem:[%s9570_s9 + $0x70] sm:$0xff] }
 0x88a   : > { %1721 = vmatprep.subr.bf16.mxu0 %v6317_v22  ;;  %v7622_v22 = vld [vmem:[%s9572_s11 + $0x48] sm:$0xff]  }
 0x95b   : > { %v1273_v19 = vpop.f32.mrb[16].mxu0 }
 0x95c   : > { %v1279_v60 = vpack.c.bf16 %v1273_v19, %v1273_v19  ;;  %v7473_v61 = vpop.f32.mrb[17].mxu0  ;;  %v6330_v19 = vcombine.low %v1377_v48, %v1385_v49  ;;  %v7640_v48 = vld [vmem:[%s9572_s11 + $0x70] sm:$0xff]   ;;  %v7641_v49 = vld [vmem:[%s9572_s11 + $0xe0] sm:$0xff]  }
 0x95d   : > { %v1276_v62 = vpop.f32.mrb[18].mxu0  ;;  %v6319_v61 = vcombine.high %v1363_v56, %v1371_v57 }
 0x95e   : > { %v7474_v63 = vpop.f32.mrb[19].mxu0  ;;  %7478 = vmatmul.mubr.msk.bf16.vlgmr.msra.gmra.mrb[8].mxu0 %vm691_vm5, %v1279_v60  ;;  %v6336_v60 = vcombine.low %v1380_v50, %v1388_v51  ;;  %v6325_v62 = vcombine.high %v1366_v58, %v1374_v59  ;;  %v7642_v50 = vld [vmem:[%s9572_s11 + $0x30] sm:$0xff]   ;;  %v7643_v51 = vld [vmem:[%s9572_s11 + $0xa0] sm:$0xff]  }
 0x95f   : > { %1722 = vmatpush1.bf16.msra.mxu0 %v6316_v21  ;;  %1753 = vmatprep.mubr.bf16.mxu0 %v7941_v34  ;;  %v1379_v63 = vld [vmem:[%s9570_s9 + $0x98] sm:$0xff] }
 0x960   : > { %1723 = vmatprep.subr.bf16.mxu0 %v6333_v30  ;;  %v1375_v21 = vld [vmem:[%s9570_s9 + $0x78] sm:$0xff]  ;;  %v6343_v30 = vcombine.high %v1383_v26, %v1391_v27 }
 0x961   : > { %v6327_v24 = vcombine.high %v1367_v20, %v1375_v21 }
 0x963   : > { %1724 = vmatpush1.bf16.msra.mxu0 %v6332_v29  ;;  %v6326_v29 = vcombine.low %v1367_v20, %v1375_v21 }
 0x964   : > { %1803 = vmatprep.subr.bf16.mxu0 %v6321_v39  ;;  %v7629_v39 = vld [vmem:[%s9572_s11 + $0xc8] sm:$0xff]  }
 0xa31   : > { %v1322_v3 = vpop.f32.mrb[8].mxu0 }
 0xa32   : > { %v7569_v4 = vadd.f32 %v1322_v3, %v685_v2  ;;  %v7479_v5 = vpop.f32.mrb[9].mxu0  ;;  %v1382_v2 = vld [vmem:[%s9570_s9 + $0xb0] sm:$0xff] }
 0xa33   : > { %v1325_v6 = vpop.f32.mrb[10].mxu0  ;;  %v1390_v3 = vld [vmem:[%s9570_s9 + $0xf0] sm:$0xff]  ;;  %v6324_v5 = vcombine.low %v1366_v58, %v1374_v59  ;;  %v7649_v58 = vld [vmem:[%s9572_s11 + $0x140] sm:$0xff]  }
 0xa34   : > { %v7480_v7 = vpop.f32.mrb[11].mxu0  ;;  %v1331_v8 = vsel %vm633_vm3, %v7569_v4, 0.0  ;;  %v6335_v6 = vcombine.high %v1379_v63, %v1387_v1  ;;  %v7650_v59 = vld [vmem:[%s9572_s11 + $0xb0] sm:$0xff]  }
 0xa35   : > { %1332 = vadd.xlane.f32.xlu0 %v1331_v8  ;;  %v6341_v7 = vcombine.high %v1382_v2, %v1390_v3  ;;  %v1365_v8 = vld [vmem:[%s9570_s9 + $0x28] sm:$0xff] }
 0xac2   : > { %v1333_v10 = vpop.xlane.xlu0 %1332 }
 0xac3   : > { %v1335_v11 = vmul.f32 0.03125, %v1333_v10  ;;  %v1373_v10 = vld [vmem:[%s9570_s9 + $0x68] sm:$0xff] }
 0xac4   : > { %v6322_v16 = vcombine.low %v1365_v8, %v1373_v10 }
 0xac5   : > { %v1336_v12 = vsub.f32 %v7569_v4, %v1335_v11  ;;  %v6318_v4 = vcombine.low %v1363_v56, %v1371_v57  ;;  %v6334_v11 = vcombine.low %v1379_v63, %v1387_v1  ;;  %v7647_v56 = vld [vmem:[%s9572_s11 + $0xa8] sm:$0xff]   ;;  %v7648_v57 = vld [vmem:[%s9572_s11 + $0xf0] sm:$0xff]  }
 0xac7   : > { %v1337_v13 = vmul.f32 %v1336_v12, %v1336_v12 }
 0xac9   : > { %v1338_v14 = vsel %vm633_vm3, %v1337_v13, 0.0  ;;  %v6323_v13 = vcombine.high %v1365_v8, %v1373_v10 }
 0xaca   : > { %1339 = vadd.xlane.f32.xlu1 %v1338_v14  ;;  %v7620_v14 = vld [vmem:[%s9572_s11 + $0x40] sm:$0xff]  }
 0xb57   : > { %v1340_v40 = vpop.xlane.xlu1 %1339 }
 0xb58   : > { %v1341_v41 = vmul.f32 0.03125, %v1340_v40  ;;  %v7634_v40 = vld [vmem:[%s9572_s11 + $0x20] sm:$0xff]  }
 0xb5a   : > { %v1342_v42 = vadd.f32 1e-05, %v1341_v41  ;;  %v7636_v41 = vld [vmem:[%s9572_s11 + $0x68] sm:$0xff]  }
 0xb5c   : > { %7896 = vrsqrt.f32 %v1342_v42  ;;  %v7631_v42 = vld [vmem:[%s9572_s11 + $0x88] sm:$0xff]  }
 0xb66   : > { %v7897_v43 = vpop.eup %7896 }
 0xb67   : > { %v1344_v45 = vmul.f32 %v7897_v43, %v1336_v12  ;;  %v6340_v12 = vcombine.low %v1382_v2, %v1390_v3  ;;  %v7633_v43 = vld [vmem:[%s9572_s11 + $0xd0] sm:$0xff]   ;;  %v8430_v2 = vld [vmem:[%s9571_s10] sm:$0xff] }
 0xb69   : > { %v1351_v47 = vmul.f32 %v6310_v44, %v1344_v45  ;;  %v7638_v44 = vld [vmem:[%s9572_s11 + $0x28] sm:$0xff]   ;;  %v7635_v45 = vld [vmem:[%s9572_s11 + $0x90] sm:$0xff]  }
 0xb6b   : > { %v8244_v52 = vadd.f32 %v6311_v46, %v1351_v47  ;;  %v7637_v46 = vld [vmem:[%s9572_s11 + $0xd8] sm:$0xff]  }
 0xb6c   : > { %v7639_v47 = vld [vmem:[%s9572_s11 + $0x98] sm:$0xff]  }
 0xb6d   : > { %v8248_v53 = vpack.c.bf16 %v8244_v52, %v8244_v52 }
 0xb6f   : > { %6344 = vmatmul.mubr.msk.bf16.vlgmr.msra.gmra.mrb[24].mxu1 %vm633_vm3, %v8248_v53  ;;  %6346 = vmatmul.mubr.msk.bf16.vlgmr.msra.gmra.mrb[20].mxu0 %vm633_vm3, %v8248_v53 }
 0xb70   : > { %1681 = vmatpush1.bf16.msra.mxu1 %v6314_v37  ;;  %1804 = vmatpush1.bf16.msra.mxu0 %v6320_v38  ;;  %v7632_v37 = vld [vmem:[%s9572_s11 + $0x60] sm:$0xff]  }
 0xb71   : > { %1682 = vmatprep.subr.bf16.mxu1 %v6331_v54  ;;  %1805 = vmatprep.subr.bf16.mxu0 %v6337_v55  ;;  %v7627_v38 = vld [vmem:[%s9572_s11 + $0x80] sm:$0xff]   ;;  %v7645_v54 = vld [vmem:[%s9572_s11 + $0xe8] sm:$0xff]   ;;  %v7646_v55 = vld [vmem:[%s9572_s11 + $0x38] sm:$0xff]  }
 0xb72   : > { %1712 = vmatprep.mubr.bf16.mxu1 %v7941_v34  ;;  %1835 = vmatprep.mubr.bf16.mxu0 %v7941_v34 }
 0xb74   : > { %1683 = vmatpush1.bf16.msra.mxu1 %v6330_v19  ;;  %1806 = vmatpush1.bf16.msra.mxu0 %v6336_v60  ;;  %v7652_v19 = vld [vmem:[%s9572_s11 + $0xf8] sm:$0xff]  }
 0xb75   : > { %1762 = vmatprep.subr.bf16.mxu1 %v6319_v61  ;;  %1885 = vmatprep.subr.bf16.mxu0 %v6325_v62  ;;  %v7654_v60 = vld [vmem:[%s9572_s11 + $0xb8] sm:$0xff]   ;;  %v7657_v61 = vld [vmem:[%s9572_s11 + $0x1c0] sm:$0xff]   ;;  %v1396_v62 = vlaneseq }
 0xb77   : > { %6345 = vmatmul.mubr.msk.bf16.vlgmr.msra.gmra.mrb[28].mxu1 %vm633_vm3, %v8248_v53  ;;  %6348 = vmatmul.mubr.msk.bf16.vlgmr.msra.gmra.mrb[24].mxu0 %vm633_vm3, %v8248_v53  ;;  %v8422_v63 = vshrl.u32 %v1396_v62, 7  ;;  %v7662_v62 = vld [vmem:[%s9572_s11 + $0x118] sm:$0xff]  }
 0xb78   : > { %1763 = vmatpush1.bf16.msra.mxu1 %v6318_v4  ;;  %1886 = vmatpush1.bf16.msra.mxu0 %v6324_v5 }
 0xb79   : > { %1764 = vmatprep.subr.bf16.mxu1 %v6335_v6  ;;  %1887 = vmatprep.subr.bf16.mxu0 %v6341_v7  ;;  %v8425_v1 = vsub.s32 0, %v8422_v63  ;;  %v8433_v3 = vsub.s32 1, %v8422_v63  ;;  %v8436_v4 = vsub.s32 5, %v8422_v63 }
 0xb7a   : > { %1794 = vmatprep.mubr.bf16.mxu1 %v7941_v34  ;;  %1917 = vmatprep.mubr.bf16.mxu0 %v7941_v34 }
 0xb7b   : > { %v1399_v5 = vrot.slane %v8430_v2, %v8425_v1  ;;  %v1403_v6 = vrot.slane %v8430_v2, %v8433_v3  ;;  %v1419_v7 = vrot.slane %v8430_v2, %v8436_v4 }
 0xb7c   : > { %1765 = vmatpush1.bf16.msra.mxu1 %v6334_v11  ;;  %1888 = vmatpush1.bf16.msra.mxu0 %v6340_v12 }
 0xb7d   : > { %1844 = vmatprep.subr.bf16.mxu1 %v6323_v13  ;;  %7013 = vmatprep.subr.bf16.mxu0 %v7620_v14  ;;  %v8447_v14 = vsub.s32 2, %v8422_v63 }
 0xb7f   : > { %6347 = vmatmul.mubr.msk.bf16.vlgmr.msra.gmra.mrb[32].mxu1 %vm633_vm3, %v8248_v53  ;;  %6350 = vmatmul.mubr.msk.bf16.vlgmr.msra.gmra.mrb[28].mxu0 %vm633_vm3, %v8248_v53 }
 0xb80   : > { %1845 = vmatpush1.bf16.msra.mxu1 %v6322_v16  ;;  %1876 = vmatprep.mubr.bf16.mxu1 %v7941_v34 }
 0xb81   : > { %1846 = vmatprep.subr.bf16.mxu1 %v6339_v17  ;;  %7014 = vmatpush3.bf16.msra.mxu0 %v7621_v18  ;;  %v8450_v18 = vsub.s32 3, %v8422_v63 }
 0xb82   : > { %7015 = vmatprep.subr.bf16.mxu0 %v7622_v22 }
 0xb83   : > { %v1411_v27 = vrot.slane %v8430_v2, %v8450_v18 }
 0xb84   : > { %1847 = vmatpush1.bf16.msra.mxu1 %v6338_v23 }
 0xb85   : > { %1926 = vmatprep.subr.bf16.mxu1 %v6327_v24  ;;  %7016 = vmatpush3.bf16.msra.mxu0 %v7623_v25  ;;  %v1407_v25 = vrot.slane %v8430_v2, %v8447_v14 }
 0xb86   : > { %7017 = vmatprep.subr.bf16.mxu0 %v7624_v28  ;;  %v7651_v28 = vld [vmem:[%s9572_s11 + $0x100] sm:$0xff]  }
 0xb87   : > { %6349 = vmatmul.mubr.msk.bf16.vlgmr.msra.gmra.mrb[36].mxu1 %vm633_vm3, %v8248_v53 }
 0xb88   : > { %1927 = vmatpush1.bf16.msra.mxu1 %v6326_v29  ;;  %1958 = vmatprep.mubr.bf16.mxu1 %v7941_v34 }
 0xb89   : > { %1928 = vmatprep.subr.bf16.mxu1 %v6343_v30  ;;  %7018 = vmatpush3.bf16.msra.mxu0 %v7626_v31  ;;  %v7653_v30 = vld [vmem:[%s9572_s11 + $0x148] sm:$0xff]  }
 0xb8a   : > { %7019 = vmatprep.subr.bf16.mxu0 %v7628_v32 }
 0xb8c   : > { %1929 = vmatpush1.bf16.msra.mxu1 %v6342_v33 }
 0xb8d   : > { %7035 = vmatprep.subr.bf16.mxu1 %v7625_v35  ;;  %7020 = vmatpush3.bf16.msra.mxu0 %v7630_v36 }
 0xb8e   : > { %7021 = vmatprep.subr.bf16.mxu0 %v7632_v37 }
 0xb8f   : > { %6351 = vmatmul.mubr.msk.bf16.vlgmr.msra.gmra.mrb[40].mxu1 %vm633_vm3, %v8248_v53  ;;  %v7644_v53 = vld [vmem:[%s9572_s11 + $0x78] sm:$0xff]  }
 0xb90   : > { %7036 = vmatpush3.bf16.msra.mxu1 %v7627_v38 }
 0xb91   : > { %7037 = vmatprep.subr.bf16.mxu1 %v7629_v39  ;;  %7022 = vmatpush3.bf16.msra.mxu0 %v7634_v40 }
 0xb92   : > { %7023 = vmatprep.subr.bf16.mxu0 %v7636_v41  ;;  %v7655_v41 = vld [vmem:[%s9572_s11 + $0x108] sm:$0xff]  }
 0xb94   : > { %7038 = vmatpush3.bf16.msra.mxu1 %v7631_v42  ;;  %v8470_v42 = vsub.s32 7, %v8422_v63 }
 0xb95   : > { %7039 = vmatprep.subr.bf16.mxu1 %v7633_v43  ;;  %7024 = vmatpush3.bf16.msra.mxu0 %v7638_v44 }
 0xb96   : > { %7025 = vmatprep.subr.bf16.mxu0 %v7640_v48 }
 0xb98   : > { %7040 = vmatpush3.bf16.msra.mxu1 %v7635_v45 }
 0xb99   : > { %7041 = vmatprep.subr.bf16.mxu1 %v7637_v46  ;;  %7026 = vmatpush3.bf16.msra.mxu0 %v7642_v50  ;;  %v7656_v46 = vld [vmem:[%s9572_s11 + $0x150] sm:$0xff]  }
 0xb9a   : > { %7027 = vmatprep.subr.bf16.mxu0 %v7644_v53  ;;  %v7658_v50 = vld [vmem:[%s9572_s11 + $0x110] sm:$0xff]  }
 0xb9c   : > { %7042 = vmatpush3.bf16.msra.mxu1 %v7639_v47 }
 0xb9d   : > { %7043 = vmatprep.subr.bf16.mxu1 %v7641_v49  ;;  %7028 = vmatpush3.bf16.msra.mxu0 %v7646_v55  ;;  %v1427_v49 = vrot.slane %v8430_v2, %v8470_v42  ;;  %v7661_v55 = vld [vmem:[%s9572_s11 + $0x1c8] sm:$0xff]  }
 0xb9e   : > { %7057 = vmatprep.subr.bf16.mxu0 %v7649_v58 }
 0xba0   : > { %7044 = vmatpush3.bf16.msra.mxu1 %v7643_v51  ;;  %v7659_v51 = vld [vmem:[%s9572_s11 + $0x180] sm:$0xff]  }
 0xba1   : > { %7045 = vmatprep.subr.bf16.mxu1 %v7645_v54  ;;  %v7660_v54 = vld [vmem:[%s9572_s11 + $0x158] sm:$0xff]  }
 0xba4   : > { %7046 = vmatpush3.bf16.msra.mxu1 %v7647_v56 }
 0xba5   : > { %7047 = vmatprep.subr.bf16.mxu1 %v7648_v57 }
 0xba8   : > { %7048 = vmatpush3.bf16.msra.mxu1 %v7650_v59 }
 0xba9   : > { %7049 = vmatprep.subr.bf16.mxu1 %v7652_v19 }
 0xbac   : > { %7050 = vmatpush3.bf16.msra.mxu1 %v7654_v60 }
 0xbad   : > { %7079 = vmatprep.subr.bf16.mxu1 %v7657_v61 }
 0xc42   : > { %v1673_v8 = vpop.f32.mrb[24].mxu1  ;;  %v8444_v10 = vpop.f32.mrb[20].mxu0 }
 0xc43   : > { %v1674_v11 = vadd.f32 %v1673_v8, %v1399_v5  ;;  %v1675_v12 = vpop.f32.mrb[25].mxu1  ;;  %v1757_v13 = vpop.f32.mrb[21].mxu0  ;;  %v7663_v5 = vld [vmem:[%s9572_s11 + $0x188] sm:$0xff]   ;;  %v7664_v8 = vld [vmem:[%s9572_s11 + $0x160] sm:$0xff]  }
 0xc44   : > { %v1676_v15 = vadd.f32 %v1675_v12, %v1403_v6  ;;  %v1758_v9 = vadd.f32 %v1757_v13, %v1419_v7  ;;  %v1677_v16 = vpop.f32.mrb[26].mxu1  ;;  %v1759_v17 = vpop.f32.mrb[22].mxu0 }
 0xc45   : > { %v1967_v20 = vmax.f32 %v1674_v11, 0.0  ;;  %v1678_v21 = vpop.f32.mrb[27].mxu1  ;;  %v1760_v22 = vpop.f32.mrb[23].mxu0  ;;  %v7665_v11 = vld [vmem:[%s9572_s11 + $0x1d0] sm:$0xff]   ;;  %v8514_v16 = vsub.s32 4, %v8422_v63  ;;  %v7668_v17 = vld [vmem:[%s9572_s11 + $0x168] sm:$0xff]  }
 0xc46   : > { %v1968_v23 = vmax.f32 %v1676_v15, 0.0  ;;  %v1972_v24 = vmax.f32 %v1758_v9, 0.0  ;;  %v7666_v15 = vld [vmem:[%s9572_s11 + $0x120] sm:$0xff]   ;;  %v7667_v9 = vld [vmem:[%s9572_s11 + $0x190] sm:$0xff]  }
 0xc47   : > { %v1983_v29 = vpack.c.bf16 %v1967_v20, %v1967_v20  ;;  %v7669_v20 = vld [vmem:[%s9572_s11 + $0x1d8] sm:$0xff]  }
 0xc48   : > { %v1984_v26 = vpack.c.bf16 %v1968_v23, %v1968_v23  ;;  %v1988_v31 = vpack.c.bf16 %v1972_v24, %v1972_v24  ;;  %v8527_v23 = vld [vmem:[%s9571_s10 + $0x8] sm:$0xff] }
 0xc4a   : > { %v1714_v32 = vpop.f32.mrb[28].mxu1  ;;  %v8462_v33 = vpop.f32.mrb[24].mxu0  ;;  %3062 = vmatprep.mubr.bf16.mxu0 %v1984_v26  ;;  %v7671_v26 = vld [vmem:[%s9572_s11 + $0x198] sm:$0xff]  }
 0xc4b   : > { %v1715_v35 = vadd.f32 %v1714_v32, %v1407_v25  ;;  %v1716_v36 = vpop.f32.mrb[29].mxu1  ;;  %v8464_v37 = vpop.f32.mrb[25].mxu0  ;;  %3063 = vmatmul.mubr.bf16.vlgmr.msra.gmra.mrb[32].mxu0 %v1983_v29  ;;  %v7670_v25 = vld [vmem:[%s9572_s11 + $0x128] sm:$0xff]   ;;  %v1435_v32 = vrot.slane %v8527_v23, %v8433_v3 }
 0xc4c   : > { %v1717_v38 = vadd.f32 %v1716_v36, %v1411_v27  ;;  %7058 = vmatpush3.bf16.msra.mxu0 %v7651_v28  ;;  %v1718_v39 = vpop.f32.mrb[30].mxu1  ;;  %v1841_v40 = vpop.f32.mrb[26].mxu0  ;;  %3142 = vmatprep.mubr.bf16.mxu0 %v1988_v31  ;;  %v1415_v27 = vrot.slane %v8430_v2, %v8514_v16  ;;  %v8538_v28 = vsub.s32 6, %v8422_v63  ;;  %v7673_v31 = vld [vmem:[%s9572_s11 + $0x1e0] sm:$0xff]   ;;  %v7674_v63 = vld [vmem:[%s9572_s11 + $0x130] sm:$0xff]  }
 0xc4d   : > { %v1969_v43 = vmax.f32 %v1715_v35, 0.0  ;;  %v1719_v44 = vpop.f32.mrb[31].mxu1  ;;  %v1842_v45 = vpop.f32.mrb[27].mxu0  ;;  %7059 = vmatprep.subr.bf16.mxu0 %v7653_v30  ;;  %v7672_v30 = vld [vmem:[%s9572_s11 + $0x170] sm:$0xff]   ;;  %v7675_v36 = vld [vmem:[%s9572_s11 + $0x1a0] sm:$0xff]   ;;  %v7676_v39 = vld [vmem:[%s9572_s11 + $0x178] sm:$0xff]  }
 0xc4e   : > { %v1970_v47 = vmax.f32 %v1717_v38, 0.0  ;;  %v1455_v35 = vrot.slane %v8527_v23, %v8538_v28  ;;  %v1756_v38 = vadd.f32 %v8444_v10, %v1415_v27  ;;  %v7677_v40 = vld [vmem:[%s9572_s11 + $0x1e8] sm:$0xff]   ;;  %v7697_v27 = vld [vmem:[%s9572_s11 + $0x2d0] sm:$0xff]  }
 0xc4f   : > { %v1985_v53 = vpack.c.bf16 %v1969_v43, %v1969_v43  ;;  %v1840_v43 = vadd.f32 %v8464_v37, %v1435_v32  ;;  %v7701_v32 = vld [vmem:[%s9572_s11 + $0x2d8] sm:$0xff]  }
 0xc50   : > { %v1986_v48 = vpack.c.bf16 %v1970_v47, %v1970_v47  ;;  %7060 = vmatpush3.bf16.msra.mxu0 %v7655_v41  ;;  %v7679_v47 = vld [vmem:[%s9572_s11 + $0x1a8] sm:$0xff]  }
 0xc51   : > { %7061 = vmatprep.subr.bf16.mxu0 %v7656_v46  ;;  %v7678_v46 = vld [vmem:[%s9572_s11 + $0x138] sm:$0xff]  }
 0xc52   : > { %v8489_v56 = vpop.f32.mrb[32].mxu1  ;;  %v8491_v57 = vpop.f32.mrb[28].mxu0  ;;  %3102 = vmatprep.mubr.bf16.mxu1 %v1986_v48  ;;  %v1971_v48 = vmax.f32 %v1756_v38, 0.0  ;;  %v7704_v38 = vld [vmem:[%s9572_s11 + $0x270] sm:$0xff]  }
 0xc53   : > { %v1798_v58 = vpop.f32.mrb[33].mxu1  ;;  %v8493_v59 = vpop.f32.mrb[29].mxu0  ;;  %3103 = vmatmul.mubr.bf16.vlgmr.msra.gmra.mrb[44].mxu1 %v1985_v53  ;;  %v1976_v53 = vmax.f32 %v1840_v43, 0.0  ;;  %v7707_v43 = vld [vmem:[%s9572_s11 + $0x2a0] sm:$0xff]  }
 0xc54   : > { %v1799_v19 = vadd.f32 %v1798_v58, %v1427_v49  ;;  %7062 = vmatpush3.bf16.msra.mxu0 %v7658_v50  ;;  %7080 = vmatpush3.bf16.msra.mxu1 %v7659_v51  ;;  %v1800_v60 = vpop.f32.mrb[34].mxu1  ;;  %v1923_v61 = vpop.f32.mrb[30].mxu0  ;;  %v1423_v49 = vrot.slane %v8430_v2, %v8538_v28  ;;  %v7680_v50 = vld [vmem:[%s9572_s11 + $0x1f0] sm:$0xff]   ;;  %v7681_v51 = vld [vmem:[%s9572_s11 + $0x240] sm:$0xff]   ;;  %v1987_v58 = vpack.c.bf16 %v1971_v48, %v1971_v48 }
 0xc55   : > { %v1801_v6 = vpop.f32.mrb[35].mxu1  ;;  %v1924_v7 = vpop.f32.mrb[31].mxu0  ;;  %7063 = vmatprep.subr.bf16.mxu0 %v7660_v54  ;;  %7081 = vmatprep.subr.bf16.mxu1 %v7661_v55  ;;  %v1443_v54 = vrot.slane %v8527_v23, %v8450_v18  ;;  %v7682_v2 = vld [vmem:[%s9572_s11 + $0x1b0] sm:$0xff]   ;;  %v7683_v55 = vld [vmem:[%s9572_s11 + $0x200] sm:$0xff]   ;;  %v7684_v60 = vld [vmem:[%s9572_s11 + $0x1f8] sm:$0xff]  }
 0xc56   : > { %v1974_v12 = vmax.f32 %v1799_v19, 0.0  ;;  %v1797_v19 = vadd.f32 %v8489_v56, %v1423_v49  ;;  %v7685_v61 = vld [vmem:[%s9572_s11 + $0x248] sm:$0xff]   ;;  %v7686_v6 = vld [vmem:[%s9572_s11 + $0x1b8] sm:$0xff]  }
 0xc57   : > { %v7687_v56 = vld [vmem:[%s9572_s11 + $0x208] sm:$0xff]   ;;  %v7710_v49 = vld [vmem:[%s9572_s11 + $0x238] sm:$0xff]  }
 0xc58   : > { %v1990_v13 = vpack.c.bf16 %v1974_v12, %v1974_v12  ;;  %7064 = vmatpush3.bf16.msra.mxu0 %v7662_v62  ;;  %7082 = vmatpush3.bf16.msra.mxu1 %v7663_v5  ;;  %v1992_v62 = vpack.c.bf16 %v1976_v53, %v1976_v53  ;;  %v1973_v7 = vmax.f32 %v1797_v19, 0.0 }
 0xc59   : > { %7065 = vmatprep.subr.bf16.mxu0 %v7664_v8  ;;  %7083 = vmatprep.subr.bf16.mxu1 %v7665_v11  ;;  %v7688_v8 = vld [vmem:[%s9572_s11 + $0x250] sm:$0xff]   ;;  %v7689_v11 = vld [vmem:[%s9572_s11 + $0x2c0] sm:$0xff]  }
 0xc5a   : > { %v8522_v21 = vpop.f32.mrb[36].mxu1  ;;  %3182 = vmatprep.mubr.bf16.mxu1 %v1990_v13  ;;  %v7690_v13 = vld [vmem:[%s9572_s11 + $0x210] sm:$0xff]  }
 0xc5b   : > { %v1880_v22 = vpop.f32.mrb[37].mxu1 }
 0xc5c   : > { %7066 = vmatpush3.bf16.msra.mxu0 %v7666_v15  ;;  %7084 = vmatpush3.bf16.msra.mxu1 %v7667_v9  ;;  %v1882_v24 = vpop.f32.mrb[38].mxu1  ;;  %v1881_v5 = vadd.f32 %v1880_v22, %v1443_v54  ;;  %v7691_v15 = vld [vmem:[%s9572_s11 + $0x280] sm:$0xff]   ;;  %v1989_v9 = vpack.c.bf16 %v1973_v7, %v1973_v7  ;;  %v1459_v54 = vrot.slane %v8527_v23, %v8470_v42  ;;  %v7720_v7 = vld [vmem:[%s9572_s11 + $0x350] sm:$0xff]  }
 0xc5d   : > { %v1883_v29 = vpop.f32.mrb[39].mxu1  ;;  %7067 = vmatprep.subr.bf16.mxu0 %v7668_v17  ;;  %7085 = vmatprep.subr.bf16.mxu1 %v7669_v20  ;;  %v7692_v17 = vld [vmem:[%s9572_s11 + $0x258] sm:$0xff]   ;;  %v7693_v20 = vld [vmem:[%s9572_s11 + $0x2c8] sm:$0xff]  }
 0xc5e   : > { %v1978_v12 = vmax.f32 %v1881_v5, 0.0  ;;  %v7694_v24 = vld [vmem:[%s9572_s11 + $0x218] sm:$0xff]   ;;  %v7698_v29 = vld [vmem:[%s9572_s11 + $0x220] sm:$0xff]  }
 0xc60   : > { %7068 = vmatpush3.bf16.msra.mxu0 %v7670_v25  ;;  %7086 = vmatpush3.bf16.msra.mxu1 %v7671_v26  ;;  %v1994_v22 = vpack.c.bf16 %v1978_v12, %v1978_v12  ;;  %v7695_v25 = vld [vmem:[%s9572_s11 + $0x288] sm:$0xff]   ;;  %v7696_v26 = vld [vmem:[%s9572_s11 + $0x260] sm:$0xff]  }
 0xc61   : > { %7069 = vmatprep.subr.bf16.mxu0 %v7672_v30  ;;  %7087 = vmatprep.subr.bf16.mxu1 %v7673_v31  ;;  %v7699_v30 = vld [vmem:[%s9572_s11 + $0x290] sm:$0xff]   ;;  %v7700_v31 = vld [vmem:[%s9572_s11 + $0x268] sm:$0xff]   ;;  %v7723_v12 = vld [vmem:[%s9572_s11 + $0x380] sm:$0xff]  }
 0xc62   : > { %v1960_v41 = vpop.f32.mrb[40].mxu1 }
 0xc63   : > { %v8564_v44 = vadd.f32 %v1960_v41, %v1455_v35  ;;  %v8566_v45 = vpop.f32.mrb[41].mxu1  ;;  %v7702_v35 = vld [vmem:[%s9572_s11 + $0x228] sm:$0xff]   ;;  %v7706_v41 = vld [vmem:[%s9572_s11 + $0x230] sm:$0xff]  }
 0xc64   : > { %7070 = vmatpush3.bf16.msra.mxu0 %v7674_v63  ;;  %7088 = vmatpush3.bf16.msra.mxu1 %v7675_v36  ;;  %v1964_v10 = vpop.f32.mrb[42].mxu1  ;;  %v7703_v63 = vld [vmem:[%s9572_s11 + $0x298] sm:$0xff]   ;;  %v1431_v36 = vrot.slane %v8527_v23, %v8425_v1  ;;  %v1963_v5 = vadd.f32 %v8566_v45, %v1459_v54  ;;  %v7721_v45 = vld [vmem:[%s9572_s11 + $0x3c0] sm:$0xff]  }
 0xc65   : > { %v1965_v37 = vpop.f32.mrb[43].mxu1  ;;  %7071 = vmatprep.subr.bf16.mxu0 %v7676_v39  ;;  %7089 = vmatprep.subr.bf16.mxu1 %v7677_v40  ;;  %v7705_v39 = vld [vmem:[%s9572_s11 + $0x2e0] sm:$0xff]   ;;  %v1451_v40 = vrot.slane %v8527_v23, %v8436_v4 }
 0xc66   : > { %v1838_v10 = vadd.f32 %v8462_v33, %v1431_v36  ;;  %v7711_v33 = vld [vmem:[%s9572_s11 + $0x2a8] sm:$0xff]   ;;  %v7737_v36 = vld [vmem:[%s9572_s11 + $0x3e0] sm:$0xff]  }
 0xc67   : > { %v1922_v48 = vadd.f32 %v8493_v59, %v1451_v40  ;;  %v7712_v59 = vld [vmem:[%s9572_s11 + $0x2f0] sm:$0xff]   ;;  %v7740_v40 = vld [vmem:[%s9572_s11 + $0x378] sm:$0xff]  }
 0xc68   : > { %7072 = vmatpush3.bf16.msra.mxu0 %v7678_v46  ;;  %7090 = vmatpush3.bf16.msra.mxu1 %v7679_v47  ;;  %v7708_v46 = vld [vmem:[%s9572_s11 + $0x278] sm:$0xff]   ;;  %v7709_v47 = vld [vmem:[%s9572_s11 + $0x2e8] sm:$0xff]   ;;  %v1975_v37 = vmax.f32 %v1838_v10, 0.0 }
 0xc69   : > { %7091 = vmatprep.subr.bf16.mxu1 %v7680_v50  ;;  %7101 = vmatprep.subr.bf16.mxu0 %v7681_v51  ;;  %v1439_v50 = vrot.slane %v8527_v23, %v8447_v14  ;;  %v7713_v51 = vld [vmem:[%s9572_s11 + $0x340] sm:$0xff]   ;;  %v1980_v53 = vmax.f32 %v1922_v48, 0.0 }
 0xc6b   : > { %3143 = vmatmul.mubr.bf16.vlgmr.msra.gmra.mrb[36].mxu0 %v1987_v58  ;;  %v1991_v58 = vpack.c.bf16 %v1975_v37, %v1975_v37  ;;  %v1879_v19 = vadd.f32 %v8522_v21, %v1439_v50  ;;  %v7718_v21 = vld [vmem:[%s9572_s11 + $0x2b8] sm:$0xff]   ;;  %v1981_v37 = vmax.f32 %v8564_v44, 0.0 }
 0xc6c   : > { %7092 = vmatpush3.bf16.msra.mxu1 %v7682_v2  ;;  %7102 = vmatpush3.bf16.msra.mxu0 %v7683_v55  ;;  %v7714_v2 = vld [vmem:[%s9572_s11 + $0x2b0] sm:$0xff]   ;;  %v7715_v55 = vld [vmem:[%s9572_s11 + $0x300] sm:$0xff]  }
 0xc6d   : > { %3222 = vmatprep.mubr.bf16.mxu0 %v1992_v62  ;;  %7093 = vmatprep.subr.bf16.mxu1 %v7684_v60  ;;  %v7716_v60 = vld [vmem:[%s9572_s11 + $0x2f8] sm:$0xff]   ;;  %v1996_v62 = vpack.c.bf16 %v1980_v53, %v1980_v53  ;;  %v1997_v50 = vpack.c.bf16 %v1981_v37, %v1981_v37 }
 0xc6e   : > { %7103 = vmatprep.subr.bf16.mxu0 %v7685_v61  ;;  %v7717_v61 = vld [vmem:[%s9572_s11 + $0x348] sm:$0xff]  }
 0xc70   : > { %7094 = vmatpush3.bf16.msra.mxu1 %v7686_v6  ;;  %7104 = vmatpush3.bf16.msra.mxu0 %v7687_v56  ;;  %v7719_v6 = vld [vmem:[%s9572_s11 + $0x308] sm:$0xff]   ;;  %v1977_v56 = vmax.f32 %v1879_v19, 0.0 }
 0xc71   : > { %7105 = vmatprep.subr.bf16.mxu0 %v7688_v8  ;;  %7123 = vmatprep.subr.bf16.mxu1 %v7689_v11  ;;  %v1982_v8 = vmax.f32 %v1963_v5, 0.0  ;;  %v7722_v11 = vld [vmem:[%s9572_s11 + $0x310] sm:$0xff]  }
 0xc73   : > { %3183 = vmatmul.mubr.bf16.vlgmr.msra.gmra.mrb[48].mxu1 %v1989_v9  ;;  %v7725_v9 = vld [vmem:[%s9572_s11 + $0x3c8] sm:$0xff]  }
 0xc74   : > { %7106 = vmatpush3.bf16.msra.mxu0 %v7690_v13  ;;  %7124 = vmatpush3.bf16.msra.mxu1 %v7691_v15  ;;  %v1993_v13 = vpack.c.bf16 %v1977_v56, %v1977_v56  ;;  %v7724_v15 = vld [vmem:[%s9572_s11 + $0x358] sm:$0xff]  }
 0xc75   : > { %3262 = vmatprep.mubr.bf16.mxu1 %v1994_v22  ;;  %7107 = vmatprep.subr.bf16.mxu0 %v7692_v17  ;;  %v1998_v17 = vpack.c.bf16 %v1982_v8, %v1982_v8  ;;  %v7727_v22 = vld [vmem:[%s9572_s11 + $0x388] sm:$0xff]  }
 0xc76   : > { %7125 = vmatprep.subr.bf16.mxu1 %v7693_v20  ;;  %v7726_v20 = vld [vmem:[%s9572_s11 + $0x318] sm:$0xff]  }
 0xc78   : > { %7108 = vmatpush3.bf16.msra.mxu0 %v7694_v24  ;;  %7126 = vmatpush3.bf16.msra.mxu1 %v7695_v25  ;;  %v7728_v24 = vld [vmem:[%s9572_s11 + $0x360] sm:$0xff]   ;;  %v7729_v25 = vld [vmem:[%s9572_s11 + $0x3d0] sm:$0xff]  }
 0xc79   : > { %7109 = vmatprep.subr.bf16.mxu0 %v7696_v26  ;;  %7127 = vmatprep.subr.bf16.mxu1 %v7697_v27  ;;  %v7730_v26 = vld [vmem:[%s9572_s11 + $0x320] sm:$0xff]   ;;  %v7731_v27 = vld [vmem:[%s9572_s11 + $0x390] sm:$0xff]  }
 0xc7c   : > { %7110 = vmatpush3.bf16.msra.mxu0 %v7698_v29  ;;  %7128 = vmatpush3.bf16.msra.mxu1 %v7699_v30  ;;  %v7732_v29 = vld [vmem:[%s9572_s11 + $0x368] sm:$0xff]   ;;  %v7733_v30 = vld [vmem:[%s9572_s11 + $0x3d8] sm:$0xff]  }
 0xc7d   : > { %7111 = vmatprep.subr.bf16.mxu0 %v7700_v31  ;;  %7129 = vmatprep.subr.bf16.mxu1 %v7701_v32  ;;  %v7734_v31 = vld [vmem:[%s9572_s11 + $0x328] sm:$0xff]   ;;  %v7735_v32 = vld [vmem:[%s9572_s11 + $0x398] sm:$0xff]  }
 0xc80   : > { %7112 = vmatpush3.bf16.msra.mxu0 %v7702_v35  ;;  %7130 = vmatpush3.bf16.msra.mxu1 %v7703_v63  ;;  %v1447_v35 = vrot.slane %v8527_v23, %v8514_v16  ;;  %v7736_v63 = vld [vmem:[%s9572_s11 + $0x370] sm:$0xff]   ;;  %v7739_v23 = vld [vmem:[%s9572_s11 + $0x3a0] sm:$0xff]  }
 0xc81   : > { %7113 = vmatprep.subr.bf16.mxu0 %v7704_v38  ;;  %7131 = vmatprep.subr.bf16.mxu1 %v7705_v39  ;;  %v7738_v38 = vld [vmem:[%s9572_s11 + $0x330] sm:$0xff]  }
 0xc82   : > { %v1920_v39 = vadd.f32 %v8491_v57, %v1447_v35  ;;  %v7743_v57 = vld [vmem:[%s9572_s11 + $0x3a8] sm:$0xff]  }
 0xc84   : > { %7114 = vmatpush3.bf16.msra.mxu0 %v7706_v41  ;;  %7132 = vmatpush3.bf16.msra.mxu1 %v7707_v43  ;;  %v7741_v41 = vld [vmem:[%s9572_s11 + $0x3e8] sm:$0xff]   ;;  %v7742_v43 = vld [vmem:[%s9572_s11 + $0x338] sm:$0xff]   ;;  %v1979_v10 = vmax.f32 %v1920_v39, 0.0 }
 0xc85   : > { %7115 = vmatprep.subr.bf16.mxu0 %v7708_v46  ;;  %7133 = vmatprep.subr.bf16.mxu1 %v7709_v47  ;;  %v7744_v46 = vld [vmem:[%s9572_s11 + $0x3f0] sm:$0xff]  }
 0xc86   : > { %v7745_v47 = vld [vmem:[%s9572_s11 + $0x3b0] sm:$0xff]   ;;  %v1995_v48 = vpack.c.bf16 %v1979_v10, %v1979_v10 }
 0xc88   : > { %7116 = vmatpush3.bf16.msra.mxu0 %v7710_v49  ;;  %7134 = vmatpush3.bf16.msra.mxu1 %v7711_v33  ;;  %v7746_v49 = vld [vmem:[%s9572_s11 + $0x3f8] sm:$0xff]  }
 0xc89   : > { %7135 = vmatprep.subr.bf16.mxu1 %v7712_v59  ;;  %7145 = vmatprep.subr.bf16.mxu0 %v7713_v51  ;;  %v7747_v33 = vld [vmem:[%s9572_s11 + $0x3b8] sm:$0xff]  }
 0xc8b   : > { %3223 = vmatmul.mubr.bf16.vlgmr.msra.gmra.mrb[40].mxu0 %v1991_v58 }
 0xc8c   : > { %7136 = vmatpush3.bf16.msra.mxu1 %v7714_v2  ;;  %7146 = vmatpush3.bf16.msra.mxu0 %v7715_v55  ;;  %v6352_v55 = vld [vmem:[%s9573_s12] ss:$0 sm:$0xff] }
 0xc8d   : > { %3302 = vmatprep.mubr.bf16.mxu0 %v1996_v62  ;;  %7137 = vmatprep.subr.bf16.mxu1 %v7716_v60 }
 0xc8e   : > { %7147 = vmatprep.subr.bf16.mxu0 %v7717_v61 }
 0xc90   : > { %7138 = vmatpush3.bf16.msra.mxu1 %v7718_v21  ;;  %7148 = vmatpush3.bf16.msra.mxu0 %v7719_v6 }
 0xc91   : > { %7149 = vmatprep.subr.bf16.mxu0 %v7720_v7  ;;  %7167 = vmatprep.subr.bf16.mxu1 %v7721_v45 }
 0xc93   : > { %3263 = vmatmul.mubr.bf16.vlgmr.msra.gmra.mrb[52].mxu1 %v1993_v13 }
 0xc94   : > { %7150 = vmatpush3.bf16.msra.mxu0 %v7722_v11  ;;  %7168 = vmatpush3.bf16.msra.mxu1 %v7723_v12 }
 0xc95   : > { %3342 = vmatprep.mubr.bf16.mxu1 %v1998_v17  ;;  %7151 = vmatprep.subr.bf16.mxu0 %v7724_v15 }
 0xc96   : > { %7169 = vmatprep.subr.bf16.mxu1 %v7725_v9 }
 0xc98   : > { %7152 = vmatpush3.bf16.msra.mxu0 %v7726_v20  ;;  %7170 = vmatpush3.bf16.msra.mxu1 %v7727_v22 }
 0xc99   : > { %7153 = vmatprep.subr.bf16.mxu0 %v7728_v24  ;;  %7171 = vmatprep.subr.bf16.mxu1 %v7729_v25 }
 0xc9c   : > { %7154 = vmatpush3.bf16.msra.mxu0 %v7730_v26  ;;  %7172 = vmatpush3.bf16.msra.mxu1 %v7731_v27 }
 0xc9d   : > { %7155 = vmatprep.subr.bf16.mxu0 %v7732_v29  ;;  %7173 = vmatprep.subr.bf16.mxu1 %v7733_v30 }
 0xca0   : > { %7156 = vmatpush3.bf16.msra.mxu0 %v7734_v31  ;;  %7174 = vmatpush3.bf16.msra.mxu1 %v7735_v32 }
 0xca1   : > { %7157 = vmatprep.subr.bf16.mxu0 %v7736_v63  ;;  %7175 = vmatprep.subr.bf16.mxu1 %v7737_v36 }
 0xca4   : > { %7158 = vmatpush3.bf16.msra.mxu0 %v7738_v38  ;;  %7176 = vmatpush3.bf16.msra.mxu1 %v7739_v23 }
 0xca5   : > { %7159 = vmatprep.subr.bf16.mxu0 %v7740_v40  ;;  %7177 = vmatprep.subr.bf16.mxu1 %v7741_v41 }
 0xca8   : > { %7160 = vmatpush3.bf16.msra.mxu0 %v7742_v43  ;;  %7178 = vmatpush3.bf16.msra.mxu1 %v7743_v57 }
 0xca9   : > { %7179 = vmatprep.subr.bf16.mxu1 %v7744_v46  ;;  %7481 = vmatprep.subr.bf16.mxu0 %v7928_v0 }
 0xcab   : > { %3303 = vmatmul.mubr.bf16.vlgmr.msra.gmra.mrb[44].mxu0 %v1995_v48 }
 0xcac   : > { %7180 = vmatpush3.bf16.msra.mxu1 %v7745_v47  ;;  %7485 = vmatprep.mubr.msk.bf16.mxu0 %vm7929_vm1, %v7928_v0 }
 0xcad   : > { %7181 = vmatprep.subr.bf16.mxu1 %v7746_v49 }
 0xcb0   : > { %7182 = vmatpush3.bf16.msra.mxu1 %v7747_v33 }
 0xcb1   : > { %7489 = vmatprep.subr.bf16.mxu1 %v7928_v0 }
 0xcb3   : > { %3343 = vmatmul.mubr.bf16.vlgmr.msra.gmra.mrb[56].mxu1 %v1997_v50 }
 0xcb4   : > { %7491 = vmatprep.mubr.msk.bf16.mxu1 %vm7929_vm1, %v7928_v0 }
 0xd1e   : > { %v7029_v59 = vpop.f32.mrb[32].mxu0 }
 0xd1f   : > { %v7030_v51 = vpop.f32.mrb[33].mxu0 }
 0xd20   : > { %v7031_v53 = vadd.f32 %v7030_v51, %v7029_v59  ;;  %v7032_v54 = vpop.f32.mrb[34].mxu0 }
 0xd21   : > { %v7033_v2 = vpop.f32.mrb[35].mxu0  ;;  %v7748_v54 = vld [vmem:[%s9564_s3 + $0x10] sm:$0xff]  }
 0xd22   : > { %v3065_v19 = vadd.f32 %v7031_v53, %v6352_v55  ;;  %7482 = vmatpush3.bf16.msra.mxu0 %v7748_v54  ;;  %v7749_v2 = vld [vmem:[%s9564_s3 + $0x18] sm:$0xff]  }
 0xd23   : > { %7483 = vmatprep.subr.bf16.mxu0 %v7928_v0 }
 0xd26   : > { %v7051_v58 = vpop.f32.mrb[44].mxu1  ;;  %7484 = vmatpush3.bf16.msra.mxu0 %v7749_v2 }
 0xd27   : > { %v7052_v44 = vpop.f32.mrb[45].mxu1  ;;  %7495 = vmatprep.subr.bf16.mxu0 %v7928_v0 }
 0xd28   : > { %v7053_v60 = vadd.f32 %v7052_v44, %v7051_v58  ;;  %v7054_v61 = vpop.f32.mrb[46].mxu1 }
 0xd29   : > { %v7055_v62 = vpop.f32.mrb[47].mxu1  ;;  %v6482_v61 = vld [vmem:[%s9575_s14] ss:$0 sm:$0xff] }
 0xd2a   : > { %v3105_v5 = vadd.f32 %v7053_v60, %v3065_v19  ;;  %v6481_v19 = vld [vmem:[%s9574_s13] ss:$0 sm:$0xff] }
 0xd3e   : > { %v7073_v21 = vpop.f32.mrb[36].mxu0 }
 0xd3f   : > { %v7074_v6 = vpop.f32.mrb[37].mxu0 }
 0xd40   : > { %v7075_v56 = vadd.f32 %v7074_v6, %v7073_v21  ;;  %v7076_v7 = vpop.f32.mrb[38].mxu0  ;;  %v6488_v6 = vld [vmem:[%s9565_s4 + $0x1] ss:$0 sm:$0xff] }
 0xd41   : > { %v7077_v45 = vpop.f32.mrb[39].mxu0 }
 0xd42   : > { %v3145_v8 = vadd.f32 %v7075_v56, %v3105_v5 }
 0xd46   : > { %v7095_v11 = vpop.f32.mrb[48].mxu1 }
 0xd47   : > { %v7096_v12 = vpop.f32.mrb[49].mxu1 }
 0xd48   : > { %v7097_v13 = vadd.f32 %v7096_v12, %v7095_v11  ;;  %v7098_v15 = vpop.f32.mrb[50].mxu1 }
 0xd49   : > { %v7099_v9 = vpop.f32.mrb[51].mxu1 }
 0xd4a   : > { %v3185_v17 = vadd.f32 %v7097_v13, %v3145_v8 }
 0xd5e   : > { %v7117_v20 = vpop.f32.mrb[40].mxu0 }
 0xd5f   : > { %v7118_v22 = vpop.f32.mrb[41].mxu0 }
 0xd60   : > { %v7119_v24 = vadd.f32 %v7118_v22, %v7117_v20  ;;  %v7120_v25 = vpop.f32.mrb[42].mxu0 }
 0xd61   : > { %v7121_v26 = vpop.f32.mrb[43].mxu0 }
 0xd62   : > { %v3225_v27 = vadd.f32 %v7119_v24, %v3185_v17 }
 0xd66   : > { %v7139_v29 = vpop.f32.mrb[52].mxu1 }
 0xd67   : > { %v7140_v30 = vpop.f32.mrb[53].mxu1 }
 0xd68   : > { %v7141_v31 = vadd.f32 %v7140_v30, %v7139_v29  ;;  %v7142_v32 = vpop.f32.mrb[54].mxu1 }
 0xd69   : > { %v7143_v35 = vpop.f32.mrb[55].mxu1 }
 0xd6a   : > { %v3265_v63 = vadd.f32 %v7141_v31, %v3225_v27 }
 0xd7e   : > { %v7161_v36 = vpop.f32.mrb[44].mxu0 }
 0xd7f   : > { %v7162_v38 = vpop.f32.mrb[45].mxu0 }
 0xd80   : > { %v7163_v23 = vadd.f32 %v7162_v38, %v7161_v36  ;;  %v7164_v39 = vpop.f32.mrb[46].mxu0 }
 0xd81   : > { %v7165_v40 = vpop.f32.mrb[47].mxu0 }
 0xd82   : > { %v3305_v41 = vadd.f32 %v7163_v23, %v3265_v63 }
 0xd86   : > { %v7183_v43 = vpop.f32.mrb[56].mxu1 }
 0xd87   : > { %v7184_v57 = vpop.f32.mrb[57].mxu1 }
 0xd88   : > { %v7185_v10 = vadd.f32 %v7184_v57, %v7183_v43  ;;  %v7186_v46 = vpop.f32.mrb[58].mxu1 }
 0xd89   : > { %v7187_v47 = vpop.f32.mrb[59].mxu1 }
 0xd8a   : > { %v3345_v48 = vadd.f32 %v7185_v10, %v3305_v41  ;;  %v6496_v47 = vld [vmem:[%s9566_s5 + $0x10] sm:$0xf] }
 0xd8c   : > { %v3350_v49 = vadd.f32 %v3345_v48, %v8244_v52  ;;  %v3577_v48 = vsel %vm755_vm4, %v6496_v47, 0 }
 0xd8e   : > { %v3353_v33 = vsel %vm633_vm3, %v3350_v49, 0.0 }
 0xd8f   : > { %3354 = vadd.xlane.f32.xlu1 %v3353_v33 }
 0xe1c   : > { %v3355_v37 = vpop.xlane.xlu1 %3354 }
 0xe1d   : > { %v3356_v50 = vmul.f32 0.03125, %v3355_v37 }
 0xe1f   : > { %v3357_v59 = vsub.f32 %v3350_v49, %v3356_v50 }
 0xe21   : > { %v3358_v51 = vmul.f32 %v3357_v59, %v3357_v59 }
 0xe23   : > { %v3359_v53 = vsel %vm633_vm3, %v3358_v51, 0.0 }
 0xe24   : > { %3360 = vadd.xlane.f32.xlu1 %v3359_v53 }
 0xeb1   : > { %v3361_v52 = vpop.xlane.xlu1 %3360 }
 0xeb2   : > { %v3362_v55 = vmul.f32 0.03125, %v3361_v52 }
 0xeb4   : > { %v3363_v58 = vadd.f32 1e-05, %v3362_v55 }
 0xeb6   : > { %7898 = vrsqrt.f32 %v3363_v58 }
 0xec0   : > { %v7899_v44 = vpop.eup %7898 }
 0xec1   : > { %v3365_v60 = vmul.f32 %v7899_v44, %v3357_v59 }
 0xec3   : > { %v3372_v62 = vmul.f32 %v6481_v19, %v3365_v60 }
 0xec5   : > { %v8825_v5 = vadd.f32 %v6482_v61, %v3372_v62 }
 0xec7   : > { %v3380_v21 = vpack.c.bf16 %v8825_v5, %v8825_v5 }
 0xec9   : > { %7486 = vmatmul.mubr.msk.bf16.vlgmr.msra.gmra.mrb[48].mxu0 %vm633_vm3, %v3380_v21 }
 0xeca   : > { %7497 = vmatprep.mubr.msk.bf16.mxu0 %vm7929_vm1, %v7928_v0 }
 0xf9c   : > { %v3443_v56 = vpop.f32.mrb[48].mxu0 }
 0xf9d   : > { %v3444_v7 = vadd.f32 %v6488_v6, %v3443_v56  ;;  %v7487_v45 = vpop.f32.mrb[49].mxu0 }
 0xf9e   : > { %v3446_v8 = vpop.f32.mrb[50].mxu0 }
 0xf9f   : > { %v8835_v11 = vpack.c.bf16 %v3444_v7, %v3444_v7  ;;  %v7488_v12 = vpop.f32.mrb[51].mxu0  ;;  %v3449_v9 = vmul.f32 0.35355338, %v3444_v7 }
 0xfa1   : > { %3462 = vrot.lane.b32.xlu1 %v8835_v11, %s7931_s0  ;;  %v8841_v17 = vpack.c.bf16 %v3449_v9, %v3449_v9  ;;  %s9592_s0 = smov 120  }
0x1013   : > { %v3463_v13 = vpop.permute.xlu1 %3462 }
0x1014   : > { %v3468_v15 = vsel %vm691_vm5, %v3463_v13, 0 }
0x1015   : > { %7490 = vmatpush3.bf16.xpose.msra.mxu1 %v3468_v15 }
0x1016   : > { %7501 = vmatprep.subr.bf16.mxu1 %v7928_v0 }
0x101c   : > { %7492 = vmatmul.mubr.msk.bf16.vlgmr.msra.gmra.mrb[60].mxu1 %vm691_vm5, %v8841_v17 }
0x101d   : > { %7503 = vmatprep.mubr.msk.bf16.mxu1 %vm7929_vm1, %v7928_v0  ;;  %7502 = vmatpush3.bf16.msra.mxu1 %v3577_v48  ;;  %v6504_v48 = vld [vmem:[%s9566_s5 + $0x18] sm:$0xf] }
0x101e   : > { %7513 = vmatprep.subr.bf16.mxu1 %v7928_v0 }
0x10ef   : > { %v3504_v20 = vpop.f32.mrb[60].mxu1 }
0x10f0   : > { %v7493_v22 = vpop.f32.mrb[61].mxu1  ;;  %v3510_v24 = vsel %vm691_vm5, %v3504_v20, -inf }
0x10f1   : > { %3511 = vmax.xlane.f32.xlu0 %v3510_v24  ;;  %v3507_v25 = vpop.f32.mrb[62].mxu1 }
0x10f2   : > { %v7494_v26 = vpop.f32.mrb[63].mxu1 }
0x1107   : > { %3522 = vrot.lane.b32.xlu0 %v8835_v11, %s7930_s29 }
0x110b   : > { %3623 = vrot.lane.b32.xlu0 %v8835_v11, %s7932_s18 }
0x110f   : > { %3621 = vrot.lane.b32.xlu0 %v8841_v17, %s9592_s0  ;;  %s9599_s0 = smov 40  }
0x1113   : > { %3783 = vrot.lane.b32.xlu0 %v8835_v11, %s9593_s19 }
0x1117   : > { %3781 = vrot.lane.b32.xlu0 %v8841_v17, %s9594_s1 }
0x117e   : > { %v3512_v27 = vpop.xlane.xlu0 %3511 }
0x117f   : > { %v3513_v29 = vsub.f32 %v3504_v20, %v3512_v27 }
0x1181   : > { %v3514_v30 = vmul.f32 1.442695, %v3513_v29 }
0x1182   : > { %v3523_v31 = vpop.permute.xlu0 %3522 }
0x1183   : > { %7900 = vpow2.f32 %v3514_v30  ;;  %v3528_v32 = vsel %vm755_vm4, %v3523_v31, 0 }
0x1184   : > { %7496 = vmatpush3.bf16.msra.mxu0 %v3528_v32 }
0x1185   : > { %7507 = vmatprep.subr.bf16.mxu0 %v7928_v0 }
0x1186   : > { %v3624_v38 = vpop.permute.xlu0 %3623 }
0x1187   : > { %v3629_v43 = vsel %vm691_vm5, %v3624_v38, 0 }
0x118a   : > { %v3622_v41 = vpop.permute.xlu0 %3621 }
0x118d   : > { %v7901_v35 = vpop.eup %7900 }
0x118e   : > { %v3516_v63 = vsel %vm691_vm5, %v7901_v35, 0.0  ;;  %v3784_v57 = vpop.permute.xlu0 %3783 }
0x118f   : > { %3517 = vadd.xlane.f32.xlu1 %v3516_v63  ;;  %v3789_v10 = vsel %vm691_vm5, %v3784_v57, 0 }
0x1192   : > { %v3782_v46 = vpop.permute.xlu0 %3781 }
0x121c   : > { %v3518_v36 = vpop.xlane.xlu1 %3517 }
0x121d   : > { %7902 = vrcp.f32 %v3518_v36  ;;  %v6500_v36 = vld [vmem:[%s9566_s5 + $0x14] sm:$0xf] }
0x121e   : > { %v3738_v38 = vsel %vm755_vm4, %v6500_v36, 0  ;;  %v6524_v36 = vld [vmem:[%s9570_s9 + $0x150] sm:$0xff] }
0x1227   : > { %v7903_v23 = vpop.eup %7902 }
0x1228   : > { %v3520_v39 = vmul.f32 %v7903_v23, %v7901_v35 }
0x122a   : > { %v3521_v40 = vpack.c.bf16 %v3520_v39, %v3520_v39 }
0x122c   : > { %7498 = vmatmul.mubr.msk.bf16.vlgmr.msra.gmra.mrb[52].mxu0 %vm691_vm5, %v3521_v40 }
0x122d   : > { %7508 = vmatpush3.bf16.xpose.msra.mxu0 %v3629_v43  ;;  %7509 = vmatprep.mubr.msk.bf16.mxu0 %vm7929_vm1, %v7928_v0 }
0x122e   : > { %7525 = vmatprep.subr.bf16.mxu0 %v7928_v0 }
0x1234   : > { %7510 = vmatmul.mubr.msk.bf16.vlgmr.msra.gmra.mrb[56].mxu0 %vm691_vm5, %v3622_v41 }
0x1235   : > { %7526 = vmatpush3.bf16.xpose.msra.mxu0 %v3789_v10  ;;  %7527 = vmatprep.mubr.msk.bf16.mxu0 %vm7929_vm1, %v7928_v0 }
0x1236   : > { %7531 = vmatprep.subr.bf16.mxu0 %v7928_v0 }
0x123c   : > { %7528 = vmatmul.mubr.msk.bf16.vlgmr.msra.gmra.mrb[60].mxu0 %vm691_vm5, %v3782_v46 }
0x123d   : > { %7533 = vmatprep.mubr.msk.bf16.mxu0 %vm7929_vm1, %v7928_v0 }
0x12ff   : > { %v3564_v49 = vpop.f32.mrb[52].mxu0 }
0x1300   : > { %v3570_v33 = vpack.c.bf16 %v3564_v49, %v3564_v49  ;;  %v7499_v37 = vpop.f32.mrb[53].mxu0 }
0x1301   : > { %v3567_v50 = vpop.f32.mrb[54].mxu0 }
0x1302   : > { %v7500_v59 = vpop.f32.mrb[55].mxu0  ;;  %7504 = vmatmul.mubr.msk.bf16.vlgmr.msra.gmra.mrb[64].mxu1 %vm691_vm5, %v3570_v33  ;;  %v3898_v50 = vsel %vm755_vm4, %v6504_v48, 0 }
0x1303   : > { %7515 = vmatprep.mubr.msk.bf16.mxu1 %vm7929_vm1, %v7928_v0 }
0x1307   : > { %v3665_v51 = vpop.f32.mrb[56].mxu0 }
0x1308   : > { %v7511_v53 = vpop.f32.mrb[57].mxu0  ;;  %v3671_v60 = vsel %vm691_vm5, %v3665_v51, -inf }
0x1309   : > { %v3668_v54 = vpop.f32.mrb[58].mxu0 }
0x130a   : > { %v7512_v2 = vpop.f32.mrb[59].mxu0 }
0x130f   : > { %v3825_v52 = vpop.f32.mrb[60].mxu0 }
0x1310   : > { %v7529_v55 = vpop.f32.mrb[61].mxu0  ;;  %v3831_v58 = vsel %vm691_vm5, %v3825_v52, -inf }
0x1311   : > { %3832 = vmax.xlane.f32.xlu1 %v3831_v58  ;;  %v3828_v44 = vpop.f32.mrb[62].mxu0 }
0x1312   : > { %v7530_v19 = vpop.f32.mrb[63].mxu0 }
0x1322   : > { %3843 = vrot.lane.b32.xlu1 %v8835_v11, %s9595_s20 }
0x1326   : > { %3943 = vrot.lane.b32.xlu1 %v8835_v11, %s9596_s23 }
0x132a   : > { %3941 = vrot.lane.b32.xlu1 %v8841_v17, %s9597_s21  ;;  %s9600_s21 = sshll.u32 %s9602_s25, 3 }
0x132b   : > { %s543_s28 = scalar_lea.vmem %s9578_s17, %s9600_s21 }
0x134e   : > { %3672 = vmax.xlane.f32.xlu1 %v3671_v60 }
0x139e   : > { %v3833_v61 = vpop.xlane.xlu1 %3832 }
0x139f   : > { %v3834_v62 = vsub.f32 %v3825_v52, %v3833_v61 }
0x13a1   : > { %v3835_v21 = vmul.f32 1.442695, %v3834_v62  ;;  %v6508_v62 = vld [vmem:[%s9566_s5 + $0x1c] sm:$0xf] }
0x13a2   : > { %v3844_v6 = vpop.permute.xlu1 %3843 }
0x13a3   : > { %7904 = vpow2.f32 %v3835_v21  ;;  %v3849_v56 = vsel %vm755_vm4, %v3844_v6, 0 }
0x13a4   : > { %7532 = vmatpush3.bf16.msra.mxu0 %v3849_v56  ;;  %v4058_v56 = vsel %vm755_vm4, %v6508_v62, 0  ;;  %v6531_v62 = vld [vmem:[%s9570_s9 + $0x188] sm:$0xff] }
0x13a5   : > { %7543 = vmatprep.subr.bf16.mxu0 %v7928_v0 }
0x13a6   : > { %v3944_v8 = vpop.permute.xlu1 %3943 }
0x13a7   : > { %v3949_v27 = vsel %vm691_vm5, %v3944_v8, 0 }
0x13aa   : > { %v3942_v12 = vpop.permute.xlu1 %3941 }
0x13ad   : > { %v7905_v7 = vpop.eup %7904 }
0x13ae   : > { %v3837_v45 = vsel %vm691_vm5, %v7905_v7, 0.0 }
0x13af   : > { %3838 = vadd.xlane.f32.xlu0 %v3837_v45 }
0x13db   : > { %v3673_v13 = vpop.xlane.xlu1 %3672 }
0x13dc   : > { %v3674_v15 = vsub.f32 %v3665_v51, %v3673_v13  ;;  %v6493_v13 = vld [vmem:[%s9567_s6 + $0x1] ss:$0 sm:$0xff] }
0x13de   : > { %v3675_v9 = vmul.f32 1.442695, %v3674_v15  ;;  %v3458_v15 = vadd.f32 %v6493_v13, %v8825_v5  ;;  %v6522_v5 = vld [vmem:[%s9570_s9 + $0x140] sm:$0xff]  ;;  %v6525_v13 = vld [vmem:[%s9570_s9 + $0x158] sm:$0xff] }
0x13e0   : > { %7906 = vpow2.f32 %v3675_v9 }
0x13ea   : > { %v7907_v17 = vpop.eup %7906 }
0x13eb   : > { %v3677_v20 = vsel %vm691_vm5, %v7907_v17, 0.0 }
0x13ec   : > { %3678 = vadd.xlane.f32.xlu0 %v3677_v20 }
0x1402   : > { %3683 = vrot.lane.b32.xlu0 %v8835_v11, %s9598_s22 }
0x143c   : > { %v3839_v22 = vpop.xlane.xlu0 %3838 }
0x143d   : > { %7908 = vrcp.f32 %v3839_v22 }
0x1447   : > { %v7909_v24 = vpop.eup %7908 }
0x1448   : > { %v3841_v25 = vmul.f32 %v7909_v24, %v7905_v7 }
0x144a   : > { %v3842_v26 = vpack.c.bf16 %v3841_v25, %v3841_v25 }
0x144c   : > { %7534 = vmatmul.mubr.msk.bf16.vlgmr.msra.gmra.mrb[64].mxu0 %vm691_vm5, %v3842_v26 }
0x144d   : > { %7544 = vmatpush3.bf16.xpose.msra.mxu0 %v3949_v27  ;;  %7545 = vmatprep.mubr.msk.bf16.mxu0 %vm7929_vm1, %v7928_v0 }
0x1454   : > { %7546 = vmatmul.mubr.msk.bf16.vlgmr.msra.gmra.mrb[68].mxu0 %vm691_vm5, %v3942_v12 }
0x1455   : > { %4446 = vmatprep.mubr.bf16.mxu0 %v7941_v34 }
0x1479   : > { %v3679_v29 = vpop.xlane.xlu0 %3678 }
0x147a   : > { %7910 = vrcp.f32 %v3679_v29 }
0x147d   : > { %v3684_v30 = vpop.permute.xlu0 %3683 }
0x147e   : > { %v3689_v31 = vsel %vm755_vm4, %v3684_v30, 0 }
0x147f   : > { %7514 = vmatpush3.bf16.msra.mxu1 %v3689_v31 }
0x1480   : > { %7519 = vmatprep.subr.bf16.mxu1 %v7928_v0 }
0x1484   : > { %v7911_v32 = vpop.eup %7910 }
0x1485   : > { %v3681_v35 = vmul.f32 %v7911_v32, %v7907_v17  ;;  %v6514_v32 = vld [vmem:[%s9570_s9 + $0x100] sm:$0xff] }
0x1487   : > { %v3682_v63 = vpack.c.bf16 %v3681_v35, %v3681_v35  ;;  %v6516_v35 = vld [vmem:[%s9570_s9 + $0x110] sm:$0xff] }
0x1489   : > { %7516 = vmatmul.mubr.msk.bf16.vlgmr.msra.gmra.mrb[68].mxu1 %vm691_vm5, %v3682_v63  ;;  %v6549_v63 = vcombine.high %v6514_v32, %v6522_v5 }
0x148a   : > { %7521 = vmatprep.mubr.msk.bf16.mxu1 %vm7929_vm1, %v7928_v0  ;;  %7520 = vmatpush3.bf16.msra.mxu1 %v3738_v38  ;;  %v6548_v38 = vcombine.low %v6514_v32, %v6522_v5 }
0x148b   : > { %7537 = vmatprep.subr.bf16.mxu1 %v7928_v0  ;;  %4414 = vmatprep.subr.bf16.mxu0 %v6549_v63  ;;  %v6527_v63 = vld [vmem:[%s9570_s9 + $0x168] sm:$0xff] }
0x148c   : > { %4415 = vmatpush1.bf16.msra.mxu0 %v6548_v38 }
0x151f   : > { %v3885_v23 = vpop.f32.mrb[64].mxu0 }
0x1520   : > { %v7535_v39 = vpop.f32.mrb[65].mxu0  ;;  %v3891_v53 = vpack.c.bf16 %v3885_v23, %v3885_v23  ;;  %v6552_v23 = vcombine.low %v6516_v35, %v6524_v36 }
0x1521   : > { %v3888_v40 = vpop.f32.mrb[66].mxu0  ;;  %v6553_v39 = vcombine.high %v6516_v35, %v6524_v36  ;;  %v6519_v35 = vld [vmem:[%s9570_s9 + $0x128] sm:$0xff] }
0x1522   : > { %v7536_v41 = vpop.f32.mrb[67].mxu0  ;;  %v6530_v40 = vld [vmem:[%s9570_s9 + $0x180] sm:$0xff] }
0x1523   : > { %v6538_v41 = vld [vmem:[%s9570_s9 + $0x1c0] sm:$0xff] }
0x1527   : > { %v3985_v43 = vpop.f32.mrb[68].mxu0 }
0x1528   : > { %v7547_v57 = vpop.f32.mrb[69].mxu0  ;;  %v3991_v10 = vsel %vm691_vm5, %v3985_v43, -inf }
0x1529   : > { %3992 = vmax.xlane.f32.xlu0 %v3991_v10  ;;  %v3988_v46 = vpop.f32.mrb[70].mxu0  ;;  %v6565_v57 = vcombine.high %v6530_v40, %v6538_v41  ;;  %v6540_v10 = vld [vmem:[%s9570_s9 + $0x1d0] sm:$0xff] }
0x152a   : > { %v7548_v47 = vpop.f32.mrb[71].mxu0  ;;  %v6564_v46 = vcombine.low %v6530_v40, %v6538_v41  ;;  %v6535_v40 = vld [vmem:[%s9570_s9 + $0x1a8] sm:$0xff] }
0x152b   : > { %4416 = vmatprep.subr.bf16.mxu0 %v6565_v57  ;;  %v6543_v41 = vld [vmem:[%s9570_s9 + $0x1e8] sm:$0xff] }
0x152c   : > { %4417 = vmatpush1.bf16.msra.mxu0 %v6564_v46  ;;  %v6575_v57 = vcombine.high %v6535_v40, %v6543_v41  ;;  %v6521_v46 = vld [vmem:[%s9570_s9 + $0x138] sm:$0xff] }
0x155c   : > { %v3725_v49 = vpop.f32.mrb[68].mxu1 }
0x155d   : > { %v3731_v33 = vpack.c.bf16 %v3725_v49, %v3725_v49  ;;  %v7517_v37 = vpop.f32.mrb[69].mxu1  ;;  %v6515_v49 = vld [vmem:[%s9570_s9 + $0x108] sm:$0xff] }
0x155e   : > { %v3728_v59 = vpop.f32.mrb[70].mxu1  ;;  %v6518_v37 = vld [vmem:[%s9570_s9 + $0x120] sm:$0xff] }
0x155f   : > { %v7518_v51 = vpop.f32.mrb[71].mxu1  ;;  %7522 = vmatmul.mubr.msk.bf16.vlgmr.msra.gmra.mrb[64].mxu1 %vm691_vm5, %v3731_v33  ;;  %v6523_v33 = vld [vmem:[%s9570_s9 + $0x148] sm:$0xff]  ;;  %v6526_v59 = vld [vmem:[%s9570_s9 + $0x160] sm:$0xff] }
0x1560   : > { %7538 = vmatpush3.bf16.msra.mxu1 %v3898_v50  ;;  %7539 = vmatprep.mubr.msk.bf16.mxu1 %vm7929_vm1, %v7928_v0  ;;  %v6551_v50 = vcombine.high %v6515_v49, %v6523_v33  ;;  %v6550_v51 = vcombine.low %v6515_v49, %v6523_v33  ;;  %v6574_v49 = vcombine.low %v6535_v40, %v6543_v41 }
0x1561   : > { %7549 = vmatprep.subr.bf16.mxu1 %v7928_v0 }
0x1562   : > { %4455 = vmatprep.subr.bf16.mxu0 %v6551_v50  ;;  %v6537_v50 = vld [vmem:[%s9570_s9 + $0x1b8] sm:$0xff] }
0x156b   : > { %7540 = vmatmul.mubr.msk.bf16.vlgmr.msra.gmra.mrb[64].mxu1 %vm691_vm5, %v3891_v53  ;;  %v6556_v53 = vcombine.low %v6518_v37, %v6526_v59 }
0x156c   : > { %7551 = vmatprep.mubr.msk.bf16.mxu1 %vm7929_vm1, %v7928_v0 }
0x15b6   : > { %v3993_v54 = vpop.xlane.xlu0 %3992 }
0x15b7   : > { %v3994_v2 = vsub.f32 %v3985_v43, %v3993_v54  ;;  %v6532_v43 = vld [vmem:[%s9570_s9 + $0x190] sm:$0xff]  ;;  %v6557_v54 = vcombine.high %v6518_v37, %v6526_v59  ;;  %v7753_v37 = vld [vmem:[%s9572_s11 + $0x408] sm:$0xff]   ;;  %v6545_v59 = vld [vmem:[%s9570_s9 + $0x1f8] sm:$0xff] }
0x15b8   : > { %v6568_v47 = vcombine.low %v6532_v43, %v6540_v10  ;;  %v6569_v48 = vcombine.high %v6532_v43, %v6540_v10  ;;  %v6558_v43 = vcombine.low %v6519_v35, %v6527_v63  ;;  %v7751_v10 = vld [vmem:[%s9572_s11 + $0x400] sm:$0xff]  }
0x15b9   : > { %v3995_v52 = vmul.f32 1.442695, %v3994_v2 }
0x15bb   : > { %7912 = vpow2.f32 %v3995_v52 }
0x15c5   : > { %v7913_v55 = vpop.eup %7912 }
0x15c6   : > { %v3997_v58 = vsel %vm691_vm5, %v7913_v55, 0.0 }
0x15c7   : > { %3998 = vadd.xlane.f32.xlu1 %v3997_v58 }
0x15d8   : > { %4003 = vrot.lane.b32.xlu1 %v8835_v11, %s9599_s0 }
0x1654   : > { %v3999_v44 = vpop.xlane.xlu1 %3998 }
0x1655   : > { %7914 = vrcp.f32 %v3999_v44  ;;  %v6512_v44 = vld [vmem:[%s9568_s7 + $0x1] ss:$0 sm:$0xff] }
0x1658   : > { %v4004_v19 = vpop.permute.xlu1 %4003 }
0x1659   : > { %v4009_v60 = vsel %vm755_vm4, %v4004_v19, 0 }
0x165a   : > { %7550 = vmatpush3.bf16.msra.mxu1 %v4009_v60  ;;  %v6513_v60 = vld [vmem:[%s9569_s8 + $0x1] ss:$0 sm:$0xff] }
0x165b   : > { %7555 = vmatprep.subr.bf16.mxu1 %v7928_v0 }
0x165f   : > { %v7915_v61 = vpop.eup %7914 }
0x1660   : > { %v4001_v21 = vmul.f32 %v7915_v61, %v7913_v55 }
0x1662   : > { %v4002_v6 = vpack.c.bf16 %v4001_v21, %v4001_v21  ;;  %v6539_v21 = vld [vmem:[%s9570_s9 + $0x1c8] sm:$0xff] }
0x1664   : > { %7552 = vmatmul.mubr.msk.bf16.vlgmr.msra.gmra.mrb[72].mxu1 %vm691_vm5, %v4002_v6  ;;  %v6534_v6 = vld [vmem:[%s9570_s9 + $0x1a0] sm:$0xff] }
0x1665   : > { %7556 = vmatpush3.bf16.msra.mxu1 %v4058_v56  ;;  %7557 = vmatprep.mubr.msk.bf16.mxu1 %vm7929_vm1, %v7928_v0  ;;  %v6542_v56 = vld [vmem:[%s9570_s9 + $0x1e0] sm:$0xff] }
0x1666   : > { %4496 = vmatprep.subr.bf16.mxu1 %v6553_v39  ;;  %v7750_v39 = vld [vmem:[%s9572_s11 + $0x440] sm:$0xff]  }
0x1737   : > { %v4045_v11 = vpop.f32.mrb[72].mxu1 }
0x1738   : > { %v4051_v7 = vpack.c.bf16 %v4045_v11, %v4045_v11  ;;  %v7553_v45 = vpop.f32.mrb[73].mxu1 }
0x1739   : > { %v4048_v8 = vpop.f32.mrb[74].mxu1  ;;  %v6567_v45 = vcombine.high %v6531_v62, %v6539_v21 }
0x173a   : > { %v7554_v12 = vpop.f32.mrb[75].mxu1  ;;  %7558 = vmatmul.mubr.msk.bf16.vlgmr.msra.gmra.mrb[64].mxu1 %vm691_vm5, %v4051_v7  ;;  %v6573_v8 = vcombine.high %v6534_v6, %v6542_v56 }
0x173b   : > { %4528 = vmatprep.mubr.bf16.mxu1 %v7941_v34  ;;  %4497 = vmatpush1.bf16.msra.mxu1 %v6552_v23  ;;  %v6517_v12 = vld [vmem:[%s9570_s9 + $0x118] sm:$0xff]  ;;  %v6559_v23 = vcombine.high %v6519_v35, %v6527_v63 }
0x173c   : > { %4498 = vmatprep.subr.bf16.mxu1 %v6569_v48  ;;  %v7752_v48 = vld [vmem:[%s9572_s11 + $0x448] sm:$0xff]  }
0x173f   : > { %4499 = vmatpush1.bf16.msra.mxu1 %v6568_v47  ;;  %v6529_v47 = vld [vmem:[%s9570_s9 + $0x178] sm:$0xff] }
0x1740   : > { %4578 = vmatprep.subr.bf16.mxu1 %v6557_v54  ;;  %v6563_v33 = vcombine.high %v6521_v46, %v6529_v47  ;;  %v6579_v54 = vcombine.high %v6537_v50, %v6545_v59 }
0x180d   : > { %v4094_v9 = vpop.f32.mrb[64].mxu1 }
0x180e   : > { %v7570_v17 = vadd.f32 %v4094_v9, %v3458_v15  ;;  %v7559_v20 = vpop.f32.mrb[65].mxu1  ;;  %v6520_v15 = vld [vmem:[%s9570_s9 + $0x130] sm:$0xff] }
0x180f   : > { %v4097_v22 = vpop.f32.mrb[66].mxu1  ;;  %v6528_v9 = vld [vmem:[%s9570_s9 + $0x170] sm:$0xff]  ;;  %v6572_v20 = vcombine.low %v6534_v6, %v6542_v56  ;;  %v7768_v56 = vld [vmem:[%s9572_s11 + $0x428] sm:$0xff]  }
0x1810   : > { %v7560_v24 = vpop.f32.mrb[67].mxu1  ;;  %v4105_v25 = vsel %vm633_vm3, %v7570_v17, 0.0  ;;  %v6555_v22 = vcombine.high %v6517_v12, %v6525_v13  ;;  %v7763_v6 = vld [vmem:[%s9572_s11 + $0x4d0] sm:$0xff]  }
0x1811   : > { %4106 = vadd.xlane.f32.xlu1 %v4105_v25  ;;  %v6561_v24 = vcombine.high %v6520_v15, %v6528_v9  ;;  %v6533_v25 = vld [vmem:[%s9570_s9 + $0x198] sm:$0xff] }
0x189e   : > { %v4107_v26 = vpop.xlane.xlu1 %4106 }
0x189f   : > { %v4108_v27 = vmul.f32 0.03125, %v4107_v26  ;;  %v6541_v26 = vld [vmem:[%s9570_s9 + $0x1d8] sm:$0xff] }
0x18a0   : > { %v6571_v32 = vcombine.high %v6533_v25, %v6541_v26  ;;  %v6570_v36 = vcombine.low %v6533_v25, %v6541_v26  ;;  %v7778_v25 = vld [vmem:[%s9572_s11 + $0x4f0] sm:$0xff]   ;;  %v7779_v26 = vld [vmem:[%s9572_s11 + $0x540] sm:$0xff]  }
0x18a1   : > { %v4109_v29 = vsub.f32 %v7570_v17, %v4108_v27  ;;  %v6566_v17 = vcombine.low %v6531_v62, %v6539_v21  ;;  %v6536_v27 = vld [vmem:[%s9570_s9 + $0x1b0] sm:$0xff]  ;;  %v7766_v62 = vld [vmem:[%s9572_s11 + $0x468] sm:$0xff]  }
0x18a2   : > { %v7761_v21 = vld [vmem:[%s9572_s11 + $0x488] sm:$0xff]  }
0x18a3   : > { %v4110_v30 = vmul.f32 %v4109_v29, %v4109_v29 }
0x18a5   : > { %v4111_v31 = vsel %vm633_vm3, %v4110_v30, 0.0  ;;  %v6554_v30 = vcombine.low %v6517_v12, %v6525_v13  ;;  %v7770_v12 = vld [vmem:[%s9572_s11 + $0x470] sm:$0xff]   ;;  %v7771_v13 = vld [vmem:[%s9572_s11 + $0x4e0] sm:$0xff]  }
0x18a6   : > { %4112 = vadd.xlane.f32.xlu0 %v4111_v31  ;;  %v6560_v31 = vcombine.low %v6520_v15, %v6528_v9  ;;  %v7772_v15 = vld [vmem:[%s9572_s11 + $0x430] sm:$0xff]   ;;  %v7773_v9 = vld [vmem:[%s9572_s11 + $0x4a0] sm:$0xff]  }
0x1933   : > { %v4113_v2 = vpop.xlane.xlu0 %4112 }
0x1934   : > { %v4114_v52 = vmul.f32 0.03125, %v4113_v2  ;;  %v7756_v2 = vld [vmem:[%s9572_s11 + $0x410] sm:$0xff]  }
0x1936   : > { %v4115_v55 = vadd.f32 1e-05, %v4114_v52  ;;  %v7758_v52 = vld [vmem:[%s9572_s11 + $0x458] sm:$0xff]  }
0x1938   : > { %7916 = vrsqrt.f32 %v4115_v55  ;;  %v6578_v55 = vcombine.low %v6537_v50, %v6545_v59 }
0x1942   : > { %v7917_v58 = vpop.eup %7916 }
0x1943   : > { %v4117_v19 = vmul.f32 %v7917_v58, %v4109_v29  ;;  %v6544_v29 = vld [vmem:[%s9570_s9 + $0x1f0] sm:$0xff]  ;;  %v7755_v58 = vld [vmem:[%s9572_s11 + $0x4c0] sm:$0xff]  }
0x1944   : > { %v6577_v5 = vcombine.high %v6536_v27, %v6544_v29  ;;  %v6576_v38 = vcombine.low %v6536_v27, %v6544_v29  ;;  %v7780_v27 = vld [vmem:[%s9572_s11 + $0x4b0] sm:$0xff]   ;;  %v7782_v29 = vld [vmem:[%s9572_s11 + $0x4f8] sm:$0xff]  }
0x1945   : > { %v4124_v61 = vmul.f32 %v6512_v44, %v4117_v19  ;;  %v7760_v44 = vld [vmem:[%s9572_s11 + $0x418] sm:$0xff]   ;;  %v7762_v19 = vld [vmem:[%s9572_s11 + $0x460] sm:$0xff]  }
0x1947   : > { %v8998_v11 = vadd.f32 %v6513_v60, %v4124_v61  ;;  %v7759_v60 = vld [vmem:[%s9572_s11 + $0x4c8] sm:$0xff]   ;;  %v7764_v61 = vld [vmem:[%s9572_s11 + $0x420] sm:$0xff]  }
0x1949   : > { %v9002_v7 = vpack.c.bf16 %v8998_v11, %v8998_v11 }
0x194b   : > { %6580 = vmatmul.mubr.msk.bf16.vlgmr.msra.gmra.mrb[72].mxu0 %vm633_vm3, %v9002_v7  ;;  %6582 = vmatmul.mubr.msk.bf16.vlgmr.msra.gmra.mrb[76].mxu1 %vm633_vm3, %v9002_v7 }
0x194c   : > { %4456 = vmatpush1.bf16.msra.mxu0 %v6550_v51  ;;  %4579 = vmatpush1.bf16.msra.mxu1 %v6556_v53  ;;  %v7754_v51 = vld [vmem:[%s9572_s11 + $0x450] sm:$0xff]   ;;  %v6562_v53 = vcombine.low %v6521_v46, %v6529_v47 }
0x194d   : > { %4457 = vmatprep.subr.bf16.mxu0 %v6567_v45  ;;  %4580 = vmatprep.subr.bf16.mxu1 %v6573_v8  ;;  %v7767_v45 = vld [vmem:[%s9572_s11 + $0x4d8] sm:$0xff]  }
0x194e   : > { %4487 = vmatprep.mubr.bf16.mxu0 %v7941_v34  ;;  %4610 = vmatprep.mubr.bf16.mxu1 %v7941_v34  ;;  %v7769_v8 = vld [vmem:[%s9572_s11 + $0x498] sm:$0xff]  }
0x1950   : > { %4458 = vmatpush1.bf16.msra.mxu0 %v6566_v17  ;;  %4581 = vmatpush1.bf16.msra.mxu1 %v6572_v20  ;;  %v7774_v17 = vld [vmem:[%s9572_s11 + $0x478] sm:$0xff]   ;;  %v7775_v20 = vld [vmem:[%s9572_s11 + $0x4e8] sm:$0xff]  }
0x1951   : > { %4537 = vmatprep.subr.bf16.mxu0 %v6555_v22  ;;  %4660 = vmatprep.subr.bf16.mxu1 %v6561_v24  ;;  %v7776_v22 = vld [vmem:[%s9572_s11 + $0x438] sm:$0xff]   ;;  %v7777_v24 = vld [vmem:[%s9572_s11 + $0x4a8] sm:$0xff]  }
0x1953   : > { %6581 = vmatmul.mubr.msk.bf16.vlgmr.msra.gmra.mrb[76].mxu0 %vm633_vm3, %v9002_v7  ;;  %6584 = vmatmul.mubr.msk.bf16.vlgmr.msra.gmra.mrb[80].mxu1 %vm633_vm3, %v9002_v7 }
0x1954   : > { %4538 = vmatpush1.bf16.msra.mxu0 %v6554_v30  ;;  %4661 = vmatpush1.bf16.msra.mxu1 %v6560_v31  ;;  %v7784_v30 = vld [vmem:[%s9572_s11 + $0x4b8] sm:$0xff]   ;;  %v7787_v31 = vld [vmem:[%s9572_s11 + $0x5c0] sm:$0xff]  }
0x1955   : > { %4539 = vmatprep.subr.bf16.mxu0 %v6571_v32  ;;  %4662 = vmatprep.subr.bf16.mxu1 %v6577_v5  ;;  %v9179_v32 = vld [vmem:[%s9571_s10 + $0x10] sm:$0xff] }
0x1956   : > { %4569 = vmatprep.mubr.bf16.mxu0 %v7941_v34  ;;  %4692 = vmatprep.mubr.bf16.mxu1 %v7941_v34  ;;  %v4174_v5 = vrot.slane %v9179_v32, %v8425_v1  ;;  %v4178_v35 = vrot.slane %v9179_v32, %v8433_v3  ;;  %v4194_v63 = vrot.slane %v9179_v32, %v8436_v4 }
0x1957   : > { %v4186_v59 = vrot.slane %v9179_v32, %v8450_v18 }
0x1958   : > { %4540 = vmatpush1.bf16.msra.mxu0 %v6570_v36  ;;  %4663 = vmatpush1.bf16.msra.mxu1 %v6576_v38 }
0x1959   : > { %4619 = vmatprep.subr.bf16.mxu0 %v6559_v23  ;;  %7216 = vmatprep.subr.bf16.mxu1 %v7750_v39 }
0x195b   : > { %6583 = vmatmul.mubr.msk.bf16.vlgmr.msra.gmra.mrb[80].mxu0 %vm633_vm3, %v9002_v7  ;;  %6586 = vmatmul.mubr.msk.bf16.vlgmr.msra.gmra.mrb[84].mxu1 %vm633_vm3, %v9002_v7 }
0x195c   : > { %4620 = vmatpush1.bf16.msra.mxu0 %v6558_v43  ;;  %4651 = vmatprep.mubr.bf16.mxu0 %v7941_v34 }
0x195d   : > { %4621 = vmatprep.subr.bf16.mxu0 %v6575_v57  ;;  %7217 = vmatpush3.bf16.msra.mxu1 %v7751_v10 }
0x195e   : > { %7218 = vmatprep.subr.bf16.mxu1 %v7752_v48 }
0x1960   : > { %4622 = vmatpush1.bf16.msra.mxu0 %v6574_v49 }
0x1961   : > { %4701 = vmatprep.subr.bf16.mxu0 %v6563_v33  ;;  %7219 = vmatpush3.bf16.msra.mxu1 %v7753_v37  ;;  %v4182_v37 = vrot.slane %v9179_v32, %v8447_v14 }
0x1962   : > { %7220 = vmatprep.subr.bf16.mxu1 %v7754_v51  ;;  %v7781_v51 = vld [vmem:[%s9572_s11 + $0x500] sm:$0xff]  }
0x1963   : > { %6585 = vmatmul.mubr.msk.bf16.vlgmr.msra.gmra.mrb[84].mxu0 %vm633_vm3, %v9002_v7 }
0x1964   : > { %4702 = vmatpush1.bf16.msra.mxu0 %v6562_v53  ;;  %4733 = vmatprep.mubr.bf16.mxu0 %v7941_v34  ;;  %v7757_v34 = vld [vmem:[%s9572_s11 + $0x480] sm:$0xff]  }
0x1965   : > { %4703 = vmatprep.subr.bf16.mxu0 %v6579_v54  ;;  %7221 = vmatpush3.bf16.msra.mxu1 %v7756_v2  ;;  %v7783_v54 = vld [vmem:[%s9572_s11 + $0x548] sm:$0xff]  }
0x1966   : > { %7222 = vmatprep.subr.bf16.mxu1 %v7758_v52 }
0x1968   : > { %4704 = vmatpush1.bf16.msra.mxu0 %v6578_v55 }
0x1969   : > { %7238 = vmatprep.subr.bf16.mxu0 %v7755_v58  ;;  %7223 = vmatpush3.bf16.msra.mxu1 %v7760_v44 }
0x196a   : > { %7224 = vmatprep.subr.bf16.mxu1 %v7762_v19 }
0x196b   : > { %6587 = vmatmul.mubr.msk.bf16.vlgmr.msra.gmra.mrb[88].mxu0 %vm633_vm3, %v9002_v7  ;;  %v7765_v7 = vld [vmem:[%s9572_s11 + $0x490] sm:$0xff]  }
0x196c   : > { %7239 = vmatpush3.bf16.msra.mxu0 %v7757_v34 }
0x196d   : > { %7240 = vmatprep.subr.bf16.mxu0 %v7759_v60  ;;  %7225 = vmatpush3.bf16.msra.mxu1 %v7764_v61 }
0x196e   : > { %7226 = vmatprep.subr.bf16.mxu1 %v7766_v62  ;;  %v7785_v62 = vld [vmem:[%s9572_s11 + $0x508] sm:$0xff]  }
0x1970   : > { %7241 = vmatpush3.bf16.msra.mxu0 %v7761_v21 }
0x1971   : > { %7242 = vmatprep.subr.bf16.mxu0 %v7763_v6  ;;  %7227 = vmatpush3.bf16.msra.mxu1 %v7768_v56 }
0x1972   : > { %7228 = vmatprep.subr.bf16.mxu1 %v7770_v12  ;;  %v4202_v12 = vrot.slane %v9179_v32, %v8470_v42 }
0x1974   : > { %7243 = vmatpush3.bf16.msra.mxu0 %v7765_v7  ;;  %v7786_v7 = vld [vmem:[%s9572_s11 + $0x550] sm:$0xff]  }
0x1975   : > { %7244 = vmatprep.subr.bf16.mxu0 %v7767_v45  ;;  %7229 = vmatpush3.bf16.msra.mxu1 %v7772_v15  ;;  %v7789_v15 = vld [vmem:[%s9572_s11 + $0x580] sm:$0xff]  }
0x1976   : > { %7230 = vmatprep.subr.bf16.mxu1 %v7774_v17  ;;  %v7790_v17 = vld [vmem:[%s9572_s11 + $0x558] sm:$0xff]  }
0x1978   : > { %7245 = vmatpush3.bf16.msra.mxu0 %v7769_v8 }
0x1979   : > { %7246 = vmatprep.subr.bf16.mxu0 %v7771_v13  ;;  %7231 = vmatpush3.bf16.msra.mxu1 %v7776_v22  ;;  %v7788_v13 = vld [vmem:[%s9572_s11 + $0x510] sm:$0xff]  }
0x197a   : > { %7260 = vmatprep.subr.bf16.mxu1 %v7779_v26 }
0x197c   : > { %7247 = vmatpush3.bf16.msra.mxu0 %v7773_v9 }
0x197d   : > { %7248 = vmatprep.subr.bf16.mxu0 %v7775_v20  ;;  %v7791_v20 = vld [vmem:[%s9572_s11 + $0x5c8] sm:$0xff]  }
0x1980   : > { %7249 = vmatpush3.bf16.msra.mxu0 %v7777_v24 }
0x1981   : > { %7250 = vmatprep.subr.bf16.mxu0 %v7778_v25 }
0x1984   : > { %7251 = vmatpush3.bf16.msra.mxu0 %v7780_v27 }
0x1985   : > { %7252 = vmatprep.subr.bf16.mxu0 %v7782_v29 }
0x1988   : > { %7253 = vmatpush3.bf16.msra.mxu0 %v7784_v30 }
0x1989   : > { %7282 = vmatprep.subr.bf16.mxu0 %v7787_v31  ;;  %v7792_v31 = vld [vmem:[%s9572_s11 + $0x518] sm:$0xff]  }
0x1a1e   : > { %v4448_v36 = vpop.f32.mrb[72].mxu0  ;;  %v9187_v38 = vpop.f32.mrb[76].mxu1 }
0x1a1f   : > { %v4449_v23 = vadd.f32 %v4448_v36, %v4174_v5  ;;  %v4450_v39 = vpop.f32.mrb[73].mxu0  ;;  %v4532_v40 = vpop.f32.mrb[77].mxu1  ;;  %v7793_v5 = vld [vmem:[%s9572_s11 + $0x588] sm:$0xff]   ;;  %v7794_v36 = vld [vmem:[%s9572_s11 + $0x560] sm:$0xff]  }
0x1a20   : > { %v4451_v41 = vadd.f32 %v4450_v39, %v4178_v35  ;;  %v4533_v43 = vadd.f32 %v4532_v40, %v4194_v63  ;;  %v4452_v57 = vpop.f32.mrb[74].mxu0  ;;  %v4534_v10 = vpop.f32.mrb[78].mxu1 }
0x1a21   : > { %v4742_v46 = vmax.f32 %v4449_v23, 0.0  ;;  %v4453_v47 = vpop.f32.mrb[75].mxu0  ;;  %v4535_v48 = vpop.f32.mrb[79].mxu1  ;;  %v7795_v23 = vld [vmem:[%s9572_s11 + $0x5d0] sm:$0xff]   ;;  %v7798_v57 = vld [vmem:[%s9572_s11 + $0x568] sm:$0xff]   ;;  %v7799_v10 = vld [vmem:[%s9572_s11 + $0x5d8] sm:$0xff]  }
0x1a22   : > { %v4743_v49 = vmax.f32 %v4451_v41, 0.0  ;;  %v4747_v33 = vmax.f32 %v4533_v43, 0.0  ;;  %v7796_v41 = vld [vmem:[%s9572_s11 + $0x520] sm:$0xff]   ;;  %v7797_v43 = vld [vmem:[%s9572_s11 + $0x590] sm:$0xff]   ;;  %v9258_v48 = vld [vmem:[%s9571_s10 + $0x18] sm:$0xff] }
0x1a23   : > { %v4758_v53 = vpack.c.bf16 %v4742_v46, %v4742_v46 }
0x1a24   : > { %v4759_v50 = vpack.c.bf16 %v4743_v49, %v4743_v49  ;;  %v4763_v2 = vpack.c.bf16 %v4747_v33, %v4747_v33  ;;  %v7800_v33 = vld [vmem:[%s9572_s11 + $0x528] sm:$0xff]  }
0x1a26   : > { %v4489_v52 = vpop.f32.mrb[76].mxu0  ;;  %v9199_v55 = vpop.f32.mrb[80].mxu1  ;;  %5839 = vmatprep.mubr.bf16.mxu1 %v4759_v50  ;;  %v4190_v50 = vrot.slane %v9179_v32, %v8514_v16 }
0x1a27   : > { %v4490_v58 = vadd.f32 %v4489_v52, %v4182_v37  ;;  %v4491_v44 = vpop.f32.mrb[77].mxu0  ;;  %v9201_v19 = vpop.f32.mrb[81].mxu1  ;;  %5840 = vmatmul.mubr.bf16.vlgmr.msra.gmra.mrb[88].mxu1 %v4758_v53  ;;  %v7801_v37 = vld [vmem:[%s9572_s11 + $0x598] sm:$0xff]   ;;  %v7803_v53 = vld [vmem:[%s9572_s11 + $0x5e0] sm:$0xff]   ;;  %v7804_v52 = vld [vmem:[%s9572_s11 + $0x530] sm:$0xff]  }
0x1a28   : > { %v4492_v34 = vadd.f32 %v4491_v44, %v4186_v59  ;;  %7261 = vmatpush3.bf16.msra.mxu1 %v7781_v51  ;;  %v4493_v60 = vpop.f32.mrb[78].mxu0  ;;  %v4616_v61 = vpop.f32.mrb[82].mxu1  ;;  %5919 = vmatprep.mubr.bf16.mxu1 %v4763_v2  ;;  %v7802_v51 = vld [vmem:[%s9572_s11 + $0x570] sm:$0xff]   ;;  %v4230_v2 = vrot.slane %v9258_v48, %v8538_v28  ;;  %v4531_v44 = vadd.f32 %v9187_v38, %v4190_v50  ;;  %v7831_v50 = vld [vmem:[%s9572_s11 + $0x6d8] sm:$0xff]  }
0x1a29   : > { %v4744_v21 = vmax.f32 %v4490_v58, 0.0  ;;  %v4494_v6 = vpop.f32.mrb[79].mxu0  ;;  %v4617_v56 = vpop.f32.mrb[83].mxu1  ;;  %7262 = vmatprep.subr.bf16.mxu1 %v7783_v54  ;;  %v4210_v54 = vrot.slane %v9258_v48, %v8433_v3  ;;  %v7805_v58 = vld [vmem:[%s9572_s11 + $0x5a0] sm:$0xff]   ;;  %v7806_v3 = vld [vmem:[%s9572_s11 + $0x578] sm:$0xff]  }
0x1a2a   : > { %v4745_v45 = vmax.f32 %v4492_v34, 0.0  ;;  %v7807_v34 = vld [vmem:[%s9572_s11 + $0x5e8] sm:$0xff]   ;;  %v7808_v6 = vld [vmem:[%s9572_s11 + $0x538] sm:$0xff]  }
0x1a2b   : > { %v4760_v9 = vpack.c.bf16 %v4744_v21, %v4744_v21  ;;  %v4615_v61 = vadd.f32 %v9201_v19, %v4210_v54  ;;  %v7809_v56 = vld [vmem:[%s9572_s11 + $0x5a8] sm:$0xff]   ;;  %v7834_v54 = vld [vmem:[%s9572_s11 + $0x670] sm:$0xff]  }
0x1a2c   : > { %v4761_v8 = vpack.c.bf16 %v4745_v45, %v4745_v45  ;;  %7263 = vmatpush3.bf16.msra.mxu1 %v7785_v62  ;;  %v4198_v45 = vrot.slane %v9179_v32, %v8538_v28  ;;  %v7812_v28 = vld [vmem:[%s9572_s11 + $0x5b0] sm:$0xff]   ;;  %v7813_v32 = vld [vmem:[%s9572_s11 + $0x600] sm:$0xff]  }
0x1a2d   : > { %7264 = vmatprep.subr.bf16.mxu1 %v7786_v7  ;;  %v4746_v7 = vmax.f32 %v4531_v44, 0.0 }
0x1a2e   : > { %v9223_v22 = vpop.f32.mrb[80].mxu0  ;;  %v9225_v24 = vpop.f32.mrb[84].mxu1  ;;  %5879 = vmatprep.mubr.bf16.mxu0 %v4761_v8  ;;  %v7810_v8 = vld [vmem:[%s9572_s11 + $0x5f0] sm:$0xff]  }
0x1a2f   : > { %v4573_v25 = vpop.f32.mrb[81].mxu0  ;;  %v9227_v26 = vpop.f32.mrb[85].mxu1  ;;  %5880 = vmatmul.mubr.bf16.vlgmr.msra.gmra.mrb[92].mxu0 %v4760_v9  ;;  %v4762_v9 = vpack.c.bf16 %v4746_v7, %v4746_v7  ;;  %v4234_v7 = vrot.slane %v9258_v48, %v8470_v42  ;;  %v7847_v42 = vld [vmem:[%s9572_s11 + $0x748] sm:$0xff]  }
0x1a30   : > { %v4574_v27 = vadd.f32 %v4573_v25, %v4202_v12  ;;  %7265 = vmatpush3.bf16.msra.mxu1 %v7788_v13  ;;  %7283 = vmatpush3.bf16.msra.mxu0 %v7789_v15  ;;  %v4575_v29 = vpop.f32.mrb[82].mxu0  ;;  %v4698_v30 = vpop.f32.mrb[86].mxu1  ;;  %v7811_v12 = vld [vmem:[%s9572_s11 + $0x640] sm:$0xff]   ;;  %v4751_v13 = vmax.f32 %v4615_v61, 0.0  ;;  %v4218_v15 = vrot.slane %v9258_v48, %v8450_v18  ;;  %v7815_v18 = vld [vmem:[%s9572_s11 + $0x648] sm:$0xff]  }
0x1a31   : > { %v4576_v35 = vpop.f32.mrb[83].mxu0  ;;  %v4699_v63 = vpop.f32.mrb[87].mxu1  ;;  %7266 = vmatprep.subr.bf16.mxu1 %v7790_v17  ;;  %7284 = vmatprep.subr.bf16.mxu0 %v7791_v20  ;;  %v4572_v17 = vadd.f32 %v9223_v22, %v4198_v45  ;;  %v7814_v20 = vld [vmem:[%s9572_s11 + $0x5f8] sm:$0xff]   ;;  %v7817_v22 = vld [vmem:[%s9572_s11 + $0x608] sm:$0xff]   ;;  %v7845_v45 = vld [vmem:[%s9572_s11 + $0x700] sm:$0xff]  }
0x1a32   : > { %v4749_v39 = vmax.f32 %v4574_v27, 0.0  ;;  %v4767_v25 = vpack.c.bf16 %v4751_v13, %v4751_v13  ;;  %v7816_v29 = vld [vmem:[%s9572_s11 + $0x5b8] sm:$0xff]   ;;  %v7820_v63 = vld [vmem:[%s9572_s11 + $0x610] sm:$0xff]  }
0x1a33   : > { %v4748_v30 = vmax.f32 %v4572_v17, 0.0 }
0x1a34   : > { %v4765_v40 = vpack.c.bf16 %v4749_v39, %v4749_v39  ;;  %7267 = vmatpush3.bf16.msra.mxu1 %v7792_v31  ;;  %7285 = vmatpush3.bf16.msra.mxu0 %v7793_v5  ;;  %v7818_v31 = vld [vmem:[%s9572_s11 + $0x650] sm:$0xff]   ;;  %v7819_v5 = vld [vmem:[%s9572_s11 + $0x6c0] sm:$0xff]   ;;  %v7822_v39 = vld [vmem:[%s9572_s11 + $0x658] sm:$0xff]  }
0x1a35   : > { %7268 = vmatprep.subr.bf16.mxu1 %v7794_v36  ;;  %7286 = vmatprep.subr.bf16.mxu0 %v7795_v23  ;;  %v7821_v36 = vld [vmem:[%s9572_s11 + $0x680] sm:$0xff]   ;;  %v4764_v23 = vpack.c.bf16 %v4748_v30, %v4748_v30  ;;  %v7856_v30 = vld [vmem:[%s9572_s11 + $0x718] sm:$0xff]  }
0x1a36   : > { %v9253_v46 = vpop.f32.mrb[84].mxu0  ;;  %5959 = vmatprep.mubr.bf16.mxu0 %v4765_v40  ;;  %v7823_v40 = vld [vmem:[%s9572_s11 + $0x6c8] sm:$0xff]  }
0x1a37   : > { %v4655_v47 = vpop.f32.mrb[85].mxu0 }
0x1a38   : > { %7269 = vmatpush3.bf16.msra.mxu1 %v7796_v41  ;;  %7287 = vmatpush3.bf16.msra.mxu0 %v7797_v43  ;;  %v4657_v49 = vpop.f32.mrb[86].mxu0  ;;  %v4656_v27 = vadd.f32 %v4655_v47, %v4218_v15  ;;  %v7824_v43 = vld [vmem:[%s9572_s11 + $0x618] sm:$0xff]   ;;  %v7827_v47 = vld [vmem:[%s9572_s11 + $0x6d0] sm:$0xff]  }
0x1a39   : > { %v4658_v59 = vpop.f32.mrb[87].mxu0  ;;  %7270 = vmatprep.subr.bf16.mxu1 %v7798_v57  ;;  %7288 = vmatprep.subr.bf16.mxu0 %v7799_v10  ;;  %v7825_v57 = vld [vmem:[%s9572_s11 + $0x688] sm:$0xff]   ;;  %v7826_v10 = vld [vmem:[%s9572_s11 + $0x660] sm:$0xff]  }
0x1a3a   : > { %v4753_v35 = vmax.f32 %v4656_v27, 0.0  ;;  %v7828_v49 = vld [vmem:[%s9572_s11 + $0x620] sm:$0xff]   ;;  %v7832_v59 = vld [vmem:[%s9572_s11 + $0x628] sm:$0xff]   ;;  %v7854_v27 = vld [vmem:[%s9572_s11 + $0x758] sm:$0xff]  }
0x1a3c   : > { %7271 = vmatpush3.bf16.msra.mxu1 %v7800_v33  ;;  %7289 = vmatpush3.bf16.msra.mxu0 %v7801_v37  ;;  %v4769_v41 = vpack.c.bf16 %v4753_v35, %v4753_v35  ;;  %v7829_v33 = vld [vmem:[%s9572_s11 + $0x690] sm:$0xff]   ;;  %v7830_v37 = vld [vmem:[%s9572_s11 + $0x668] sm:$0xff]  }
0x1a3d   : > { %7272 = vmatprep.subr.bf16.mxu1 %v7802_v51  ;;  %7290 = vmatprep.subr.bf16.mxu0 %v7803_v53  ;;  %v7833_v51 = vld [vmem:[%s9572_s11 + $0x698] sm:$0xff]   ;;  %v4206_v53 = vrot.slane %v9258_v48, %v8425_v1  ;;  %v7837_v1 = vld [vmem:[%s9572_s11 + $0x6a0] sm:$0xff]   ;;  %v7859_v35 = vld [vmem:[%s9572_s11 + $0x7d0] sm:$0xff]  }
0x1a3e   : > { %v4735_v60 = vpop.f32.mrb[88].mxu0 }
0x1a3f   : > { %v9292_v62 = vadd.f32 %v4735_v60, %v4230_v2  ;;  %v9294_v21 = vpop.f32.mrb[89].mxu0  ;;  %v7835_v2 = vld [vmem:[%s9572_s11 + $0x6e0] sm:$0xff]   ;;  %v4613_v44 = vadd.f32 %v9199_v55, %v4206_v53  ;;  %v7840_v60 = vld [vmem:[%s9572_s11 + $0x638] sm:$0xff]   ;;  %v7841_v55 = vld [vmem:[%s9572_s11 + $0x6a8] sm:$0xff]  }
0x1a40   : > { %7273 = vmatpush3.bf16.msra.mxu1 %v7804_v52  ;;  %7291 = vmatpush3.bf16.msra.mxu0 %v7805_v58  ;;  %v4739_v38 = vpop.f32.mrb[90].mxu0  ;;  %v4226_v52 = vrot.slane %v9258_v48, %v8436_v4  ;;  %v7836_v58 = vld [vmem:[%s9572_s11 + $0x630] sm:$0xff]   ;;  %v7839_v4 = vld [vmem:[%s9572_s11 + $0x6e8] sm:$0xff]   ;;  %v4738_v15 = vadd.f32 %v9294_v21, %v4234_v7  ;;  %v7851_v21 = vld [vmem:[%s9572_s11 + $0x7c0] sm:$0xff]  }
0x1a41   : > { %v4740_v19 = vpop.f32.mrb[91].mxu0  ;;  %7274 = vmatprep.subr.bf16.mxu1 %v7806_v3  ;;  %7292 = vmatprep.subr.bf16.mxu0 %v7807_v34  ;;  %v7838_v3 = vld [vmem:[%s9572_s11 + $0x678] sm:$0xff]   ;;  %v4750_v61 = vmax.f32 %v4613_v44, 0.0  ;;  %v4214_v38 = vrot.slane %v9258_v48, %v8447_v14  ;;  %v7844_v14 = vld [vmem:[%s9572_s11 + $0x6b0] sm:$0xff]  }
0x1a42   : > { %v4697_v34 = vadd.f32 %v9227_v26, %v4226_v52  ;;  %v7842_v26 = vld [vmem:[%s9572_s11 + $0x6f0] sm:$0xff]   ;;  %v4757_v17 = vmax.f32 %v4738_v15, 0.0  ;;  %v4756_v52 = vmax.f32 %v9292_v62, 0.0 }
0x1a43   : > { %v4766_v19 = vpack.c.bf16 %v4750_v61, %v4750_v61 }
0x1a44   : > { %7275 = vmatpush3.bf16.msra.mxu1 %v7808_v6  ;;  %7293 = vmatpush3.bf16.msra.mxu0 %v7809_v56  ;;  %v7843_v6 = vld [vmem:[%s9572_s11 + $0x740] sm:$0xff]   ;;  %v4755_v56 = vmax.f32 %v4697_v34, 0.0 }
0x1a45   : > { %7294 = vmatprep.subr.bf16.mxu0 %v7810_v8  ;;  %7304 = vmatprep.subr.bf16.mxu1 %v7811_v12  ;;  %v4654_v8 = vadd.f32 %v9253_v46, %v4214_v38  ;;  %v7846_v12 = vld [vmem:[%s9572_s11 + $0x6f8] sm:$0xff]  }
0x1a46   : > { %v4771_v13 = vpack.c.bf16 %v4755_v56, %v4755_v56  ;;  %v7848_v46 = vld [vmem:[%s9572_s11 + $0x6b8] sm:$0xff]  }
0x1a47   : > { %5920 = vmatmul.mubr.bf16.vlgmr.msra.gmra.mrb[92].mxu1 %v4762_v9  ;;  %v7850_v9 = vld [vmem:[%s9572_s11 + $0x750] sm:$0xff]  }
0x1a48   : > { %7295 = vmatpush3.bf16.msra.mxu0 %v7812_v28  ;;  %7305 = vmatpush3.bf16.msra.mxu1 %v7813_v32  ;;  %v7849_v28 = vld [vmem:[%s9572_s11 + $0x708] sm:$0xff]   ;;  %v4752_v32 = vmax.f32 %v4654_v8, 0.0 }
0x1a49   : > { %5999 = vmatprep.mubr.bf16.mxu1 %v4767_v25  ;;  %7296 = vmatprep.subr.bf16.mxu0 %v7814_v20  ;;  %v7852_v20 = vld [vmem:[%s9572_s11 + $0x710] sm:$0xff]  }
0x1a4a   : > { %7306 = vmatprep.subr.bf16.mxu1 %v7815_v18  ;;  %v7853_v18 = vld [vmem:[%s9572_s11 + $0x780] sm:$0xff]   ;;  %v4768_v25 = vpack.c.bf16 %v4752_v32, %v4752_v32 }
0x1a4c   : > { %7297 = vmatpush3.bf16.msra.mxu0 %v7816_v29  ;;  %7307 = vmatpush3.bf16.msra.mxu1 %v7817_v22  ;;  %v7855_v29 = vld [vmem:[%s9572_s11 + $0x7c8] sm:$0xff]   ;;  %v4773_v22 = vpack.c.bf16 %v4757_v17, %v4757_v17 }
0x1a4d   : > { %7308 = vmatprep.subr.bf16.mxu1 %v7818_v31  ;;  %7326 = vmatprep.subr.bf16.mxu0 %v7819_v5  ;;  %v7857_v31 = vld [vmem:[%s9572_s11 + $0x788] sm:$0xff]   ;;  %v7858_v5 = vld [vmem:[%s9572_s11 + $0x760] sm:$0xff]  }
0x1a4f   : > { %5960 = vmatmul.mubr.bf16.vlgmr.msra.gmra.mrb[96].mxu0 %v4764_v23  ;;  %v7862_v23 = vld [vmem:[%s9572_s11 + $0x768] sm:$0xff]  }
0x1a50   : > { %7309 = vmatpush3.bf16.msra.mxu1 %v7820_v63  ;;  %7327 = vmatpush3.bf16.msra.mxu0 %v7821_v36  ;;  %v7860_v63 = vld [vmem:[%s9572_s11 + $0x720] sm:$0xff]   ;;  %v7861_v36 = vld [vmem:[%s9572_s11 + $0x790] sm:$0xff]  }
0x1a51   : > { %6039 = vmatprep.mubr.bf16.mxu0 %v4769_v41  ;;  %7310 = vmatprep.subr.bf16.mxu1 %v7822_v39  ;;  %v7863_v39 = vld [vmem:[%s9572_s11 + $0x7d8] sm:$0xff]  }
0x1a52   : > { %7328 = vmatprep.subr.bf16.mxu0 %v7823_v40  ;;  %v7864_v40 = vld [vmem:[%s9572_s11 + $0x728] sm:$0xff]   ;;  %v7865_v41 = vld [vmem:[%s9572_s11 + $0x798] sm:$0xff]  }
0x1a54   : > { %7311 = vmatpush3.bf16.msra.mxu1 %v7824_v43  ;;  %7329 = vmatpush3.bf16.msra.mxu0 %v7825_v57  ;;  %v4222_v43 = vrot.slane %v9258_v48, %v8514_v16  ;;  %v7866_v57 = vld [vmem:[%s9572_s11 + $0x770] sm:$0xff]   ;;  %v7869_v16 = vld [vmem:[%s9572_s11 + $0x7a0] sm:$0xff]  }
0x1a55   : > { %7312 = vmatprep.subr.bf16.mxu1 %v7826_v10  ;;  %7330 = vmatprep.subr.bf16.mxu0 %v7827_v47  ;;  %v7867_v10 = vld [vmem:[%s9572_s11 + $0x7e0] sm:$0xff]   ;;  %v7868_v47 = vld [vmem:[%s9572_s11 + $0x730] sm:$0xff]  }
0x1a56   : > { %v4695_v48 = vadd.f32 %v9225_v24, %v4222_v43  ;;  %v7873_v24 = vld [vmem:[%s9572_s11 + $0x7a8] sm:$0xff]  }
0x1a58   : > { %7313 = vmatpush3.bf16.msra.mxu1 %v7828_v49  ;;  %7331 = vmatpush3.bf16.msra.mxu0 %v7829_v33  ;;  %v7870_v49 = vld [vmem:[%s9572_s11 + $0x778] sm:$0xff]   ;;  %v7871_v33 = vld [vmem:[%s9572_s11 + $0x7e8] sm:$0xff]  }
0x1a59   : > { %7314 = vmatprep.subr.bf16.mxu1 %v7830_v37  ;;  %7332 = vmatprep.subr.bf16.mxu0 %v7831_v50  ;;  %v7872_v37 = vld [vmem:[%s9572_s11 + $0x738] sm:$0xff]   ;;  %v4754_v50 = vmax.f32 %v4695_v48, 0.0 }
0x1a5b   : > { %v4770_v53 = vpack.c.bf16 %v4754_v50, %v4754_v50 }
0x1a5c   : > { %7315 = vmatpush3.bf16.msra.mxu1 %v7832_v59  ;;  %7333 = vmatpush3.bf16.msra.mxu0 %v7833_v51  ;;  %v7874_v59 = vld [vmem:[%s9572_s11 + $0x7f0] sm:$0xff]  }
0x1a5d   : > { %7316 = vmatprep.subr.bf16.mxu1 %v7834_v54  ;;  %7334 = vmatprep.subr.bf16.mxu0 %v7835_v2  ;;  %v7875_v51 = vld [vmem:[%s9572_s11 + $0x7b0] sm:$0xff]   ;;  %v7876_v54 = vld [vmem:[%s9572_s11 + $0x7f8] sm:$0xff]  }
0x1a5e   : > { %v7877_v2 = vld [vmem:[%s9572_s11 + $0x7b8] sm:$0xff]  }
0x1a60   : > { %7317 = vmatpush3.bf16.msra.mxu1 %v7836_v58  ;;  %7335 = vmatpush3.bf16.msra.mxu0 %v7837_v1  ;;  %v4772_v58 = vpack.c.bf16 %v4756_v52, %v4756_v52 }
0x1a61   : > { %7318 = vmatprep.subr.bf16.mxu1 %v7838_v3  ;;  %7336 = vmatprep.subr.bf16.mxu0 %v7839_v4 }
0x1a64   : > { %7319 = vmatpush3.bf16.msra.mxu1 %v7840_v60  ;;  %7337 = vmatpush3.bf16.msra.mxu0 %v7841_v55  ;;  %v6845_v60 = vld [vmem:[%s9573_s12 + $0x1] ss:$0 sm:$0xff] }
0x1a65   : > { %7338 = vmatprep.subr.bf16.mxu0 %v7842_v26  ;;  %7348 = vmatprep.subr.bf16.mxu1 %v7843_v6 }
0x1a67   : > { %6000 = vmatmul.mubr.bf16.vlgmr.msra.gmra.mrb[96].mxu1 %v4766_v19 }
0x1a68   : > { %7339 = vmatpush3.bf16.msra.mxu0 %v7844_v14  ;;  %7349 = vmatpush3.bf16.msra.mxu1 %v7845_v45 }
0x1a69   : > { %6079 = vmatprep.mubr.bf16.mxu1 %v4771_v13  ;;  %7340 = vmatprep.subr.bf16.mxu0 %v7846_v12 }
0x1a6a   : > { %7350 = vmatprep.subr.bf16.mxu1 %v7847_v42 }
0x1a6c   : > { %7341 = vmatpush3.bf16.msra.mxu0 %v7848_v46  ;;  %7351 = vmatpush3.bf16.msra.mxu1 %v7849_v28 }
0x1a6d   : > { %7352 = vmatprep.subr.bf16.mxu1 %v7850_v9  ;;  %7370 = vmatprep.subr.bf16.mxu0 %v7851_v21 }
0x1a6f   : > { %6040 = vmatmul.mubr.bf16.vlgmr.msra.gmra.mrb[100].mxu0 %v4768_v25 }
0x1a70   : > { %7353 = vmatpush3.bf16.msra.mxu1 %v7852_v20  ;;  %7371 = vmatpush3.bf16.msra.mxu0 %v7853_v18 }
0x1a71   : > { %6119 = vmatprep.mubr.bf16.mxu0 %v4773_v22  ;;  %7354 = vmatprep.subr.bf16.mxu1 %v7854_v27 }
0x1a72   : > { %7372 = vmatprep.subr.bf16.mxu0 %v7855_v29 }
0x1a74   : > { %7355 = vmatpush3.bf16.msra.mxu1 %v7856_v30  ;;  %7373 = vmatpush3.bf16.msra.mxu0 %v7857_v31 }
0x1a75   : > { %7356 = vmatprep.subr.bf16.mxu1 %v7858_v5  ;;  %7374 = vmatprep.subr.bf16.mxu0 %v7859_v35 }
0x1a78   : > { %7357 = vmatpush3.bf16.msra.mxu1 %v7860_v63  ;;  %7375 = vmatpush3.bf16.msra.mxu0 %v7861_v36 }
0x1a79   : > { %7358 = vmatprep.subr.bf16.mxu1 %v7862_v23  ;;  %7376 = vmatprep.subr.bf16.mxu0 %v7863_v39 }
0x1a7c   : > { %7359 = vmatpush3.bf16.msra.mxu1 %v7864_v40  ;;  %7377 = vmatpush3.bf16.msra.mxu0 %v7865_v41 }
0x1a7d   : > { %7360 = vmatprep.subr.bf16.mxu1 %v7866_v57  ;;  %7378 = vmatprep.subr.bf16.mxu0 %v7867_v10 }
0x1a80   : > { %7361 = vmatpush3.bf16.msra.mxu1 %v7868_v47  ;;  %7379 = vmatpush3.bf16.msra.mxu0 %v7869_v16 }
0x1a81   : > { %7362 = vmatprep.subr.bf16.mxu1 %v7870_v49  ;;  %7380 = vmatprep.subr.bf16.mxu0 %v7871_v33 }
0x1a84   : > { %7363 = vmatpush3.bf16.msra.mxu1 %v7872_v37  ;;  %7381 = vmatpush3.bf16.msra.mxu0 %v7873_v24 }
0x1a85   : > { %7382 = vmatprep.subr.bf16.mxu0 %v7874_v59  ;;  %7561 = vmatprep.subr.bf16.mxu1 %v7928_v0 }
0x1a87   : > { %6080 = vmatmul.mubr.bf16.vlgmr.msra.gmra.mrb[100].mxu1 %v4770_v53  ;;  %v7879_v53 = vld [vmem:[%s9576_s15 + $0x8] sm:$0xff]  }
0x1a88   : > { %7383 = vmatpush3.bf16.msra.mxu0 %v7875_v51  ;;  %7565 = vmatprep.mubr.msk.bf16.mxu1 %vm7929_vm1, %v7928_v0  ;;  %v7878_v51 = vld [vmem:[%s9576_s15] sm:$0xff]  }
0x1a89   : > { %7384 = vmatprep.subr.bf16.mxu0 %v7876_v54  ;;  %7562 = vmatpush3.bf16.msra.mxu1 %v7878_v51 }
0x1a8a   : > { %7563 = vmatprep.subr.bf16.mxu1 %v7928_v0  ;;  %v6978_v0 = vld [vmem:[%s9577_s16] ss:$0 sm:$0xff] }
0x1a8c   : > { %7385 = vmatpush3.bf16.msra.mxu0 %v7877_v2 }
0x1a8d   : > { %7564 = vmatpush3.bf16.msra.mxu1 %v7879_v53 }
0x1a8f   : > { %6120 = vmatmul.mubr.bf16.vlgmr.msra.gmra.mrb[104].mxu0 %v4772_v58  ;;  %v6976_v58 = vld [vmem:[%s9574_s13 + $0x1] ss:$0 sm:$0xff] }
0x1afa   : > { %v7232_v1 = vpop.f32.mrb[88].mxu1 }
0x1afb   : > { %v7233_v44 = vpop.f32.mrb[89].mxu1 }
0x1afc   : > { %v7234_v3 = vadd.f32 %v7233_v44, %v7232_v1  ;;  %v7235_v4 = vpop.f32.mrb[90].mxu1  ;;  %v6977_v44 = vld [vmem:[%s9575_s14 + $0x1] ss:$0 sm:$0xff] }
0x1afd   : > { %v7236_v34 = vpop.f32.mrb[91].mxu1 }
0x1afe   : > { %v5842_v38 = vadd.f32 %v7234_v3, %v6845_v60 }
0x1b02   : > { %v7254_v55 = vpop.f32.mrb[92].mxu0 }
0x1b03   : > { %v7255_v61 = vpop.f32.mrb[93].mxu0 }
0x1b04   : > { %v7256_v26 = vadd.f32 %v7255_v61, %v7254_v55  ;;  %v7257_v6 = vpop.f32.mrb[94].mxu0 }
0x1b05   : > { %v7258_v56 = vpop.f32.mrb[95].mxu0 }
0x1b06   : > { %v5882_v62 = vadd.f32 %v7256_v26, %v5842_v38 }
0x1b1a   : > { %v7276_v7 = vpop.f32.mrb[92].mxu1 }
0x1b1b   : > { %v7277_v14 = vpop.f32.mrb[93].mxu1 }
0x1b1c   : > { %v7278_v45 = vadd.f32 %v7277_v14, %v7276_v7  ;;  %v7279_v19 = vpop.f32.mrb[94].mxu1 }
0x1b1d   : > { %v7280_v8 = vpop.f32.mrb[95].mxu1 }
0x1b1e   : > { %v5922_v12 = vadd.f32 %v7278_v45, %v5882_v62 }
0x1b22   : > { %v7298_v42 = vpop.f32.mrb[96].mxu0 }
0x1b23   : > { %v7299_v13 = vpop.f32.mrb[97].mxu0 }
0x1b24   : > { %v7300_v15 = vadd.f32 %v7299_v13, %v7298_v42  ;;  %v7301_v46 = vpop.f32.mrb[98].mxu0 }
0x1b25   : > { %v7302_v28 = vpop.f32.mrb[99].mxu0 }
0x1b26   : > { %v5962_v32 = vadd.f32 %v7300_v15, %v5922_v12 }
0x1b3a   : > { %v7320_v9 = vpop.f32.mrb[96].mxu1 }
0x1b3b   : > { %v7321_v21 = vpop.f32.mrb[97].mxu1 }
0x1b3c   : > { %v7322_v17 = vadd.f32 %v7321_v21, %v7320_v9  ;;  %v7323_v20 = vpop.f32.mrb[98].mxu1 }
0x1b3d   : > { %v7324_v18 = vpop.f32.mrb[99].mxu1 }
0x1b3e   : > { %v6002_v25 = vadd.f32 %v7322_v17, %v5962_v32 }
0x1b42   : > { %v7342_v27 = vpop.f32.mrb[100].mxu0 }
0x1b43   : > { %v7343_v29 = vpop.f32.mrb[101].mxu0 }
0x1b44   : > { %v7344_v22 = vadd.f32 %v7343_v29, %v7342_v27  ;;  %v7345_v30 = vpop.f32.mrb[102].mxu0 }
0x1b45   : > { %v7346_v31 = vpop.f32.mrb[103].mxu0 }
0x1b46   : > { %v6042_v5 = vadd.f32 %v7344_v22, %v6002_v25 }
0x1b5a   : > { %v7364_v35 = vpop.f32.mrb[100].mxu1 }
0x1b5b   : > { %v7365_v63 = vpop.f32.mrb[101].mxu1 }
0x1b5c   : > { %v7366_v36 = vadd.f32 %v7365_v63, %v7364_v35  ;;  %v7367_v23 = vpop.f32.mrb[102].mxu1 }
0x1b5d   : > { %v7368_v39 = vpop.f32.mrb[103].mxu1 }
0x1b5e   : > { %v6082_v40 = vadd.f32 %v7366_v36, %v6042_v5 }
0x1b62   : > { %v7386_v41 = vpop.f32.mrb[104].mxu0 }
0x1b63   : > { %v7387_v43 = vpop.f32.mrb[105].mxu0 }
0x1b64   : > { %v7388_v57 = vadd.f32 %v7387_v43, %v7386_v41  ;;  %v7389_v10 = vpop.f32.mrb[106].mxu0 }
0x1b65   : > { %v7390_v47 = vpop.f32.mrb[107].mxu0 }
0x1b66   : > { %v6122_v16 = vadd.f32 %v7388_v57, %v6082_v40 }
0x1b68   : > { %v6127_v48 = vadd.f32 %v6122_v16, %v8998_v11 }
0x1b6a   : > { %v6132_v49 = vsel %vm633_vm3, %v6127_v48, 0.0 }
0x1b6b   : > { %6133 = vadd.xlane.f32.xlu0 %v6132_v49 }
0x1bf8   : > { %v6134_v33 = vpop.xlane.xlu0 %6133 }
0x1bf9   : > { %v6135_v37 = vmul.f32 0.03125, %v6134_v33 }
0x1bfb   : > { %v6136_v24 = vsub.f32 %v6127_v48, %v6135_v37 }
0x1bfd   : > { %v6137_v50 = vmul.f32 %v6136_v24, %v6136_v24 }
0x1bff   : > { %v6138_v59 = vsel %vm633_vm3, %v6137_v50, 0.0 }
0x1c00   : > { %6139 = vadd.xlane.f32.xlu0 %v6138_v59 }
0x1c8d   : > { %v6140_v11 = vpop.xlane.xlu0 %6139 }
0x1c8e   : > { %v6141_v54 = vmul.f32 0.03125, %v6140_v11 }
0x1c90   : > { %v6142_v2 = vadd.f32 1e-05, %v6141_v54 }
0x1c92   : > { %7918 = vrsqrt.f32 %v6142_v2 }
0x1c9c   : > { %v7919_v52 = vpop.eup %7918 }
0x1c9d   : > { %v6144_v1 = vmul.f32 %v7919_v52, %v6136_v24 }
0x1c9f   : > { %v6151_v3 = vmul.f32 %v6976_v58, %v6144_v1 }
0x1ca1   : > { %v6158_v4 = vadd.f32 %v6977_v44, %v6151_v3 }
0x1ca3   : > { %v6159_v34 = vpack.c.bf16 %v6158_v4, %v6158_v4 }
0x1ca5   : > { %7566 = vmatmul.mubr.msk.bf16.vlgmr.msra.gmra.mrb[104].mxu1 %vm633_vm3, %v6159_v34 }
0x1d78   : > { %v6220_v60 = vpop.f32.mrb[104].mxu1 }
0x1d79   : > { %v6221_v55 = vadd.f32 %v6978_v0, %v6220_v60  ;;  %v7567_v61 = vpop.f32.mrb[105].mxu1 }
0x1d7a   : > { %v6223_v38 = vpop.f32.mrb[106].mxu1 }
0x1d7b   : > { %6226 = vst [vmem:[%s543_s28] sm:$0xff] %v6221_v55  ;;  %v7568_v26 = vpop.f32.mrb[107].mxu1 }
0x1d7c PF: > { %s27_s24 = sadd.s32 1, %s7926_s24  }
0x1d7d   : > { %p24_p4 = scmp.ge.s32.totalorder %s27_s24, 4  }
0x1d7f   :  { %26 = sbr.rel (!%p24_p4) target bundleno = 3 (0x3), region = 136 }

</bundles_post_ra>
